<compile_context>
chip_gen: v7x
topology: tpu7x:2x2x1
jax: 0.10.0
libtpu: 0.0.40
codegen_flags: <defaults>
</compile_context>

<pallas_src>
import jax
import jax.numpy as jnp
from jax.experimental import pallas as pl
from jax.experimental.pallas import tpu as pltpu

# --- model hyper-parameters (small, consistent with the module) -------------
NODE_FEATURES = 4     # in_channels of A3TGCN2
HIDDEN = 32           # out_channels of A3TGCN2 (fixed to 32 in TemporalGNN)
PERIODS = 8           # periods == T == final linear output dim
BATCH = 2
NUM_NODES = 16


# ----------------------------- Pallas kernel --------------------------------
def temporal_gnn_kernel(x_ref, a_ref, w_ref, b_ref, wcol_ref,
                        lin_w_ref, lin_b_ref, out_ref):
    """Fully fused forward.

    x_ref    : (T*B*N, F)      node features, rows ordered (t, b, n)
    a_ref    : (T*B*N, T*B*N)  block-diag normalized adjacency  I_{T*B} (x) A_hat
    w_ref    : (F, 2H)         folded conv+gate weights [Wz@Gz | Wh@Gh]
    b_ref    : (1, 2H)         folded biases
    wcol_ref : (T*B*N, 1)      softmax(attention)[t] per row
    lin_w_ref: (H, P)          final linear weight
    lin_b_ref: (1, P)          final linear bias
    out_ref  : (B*N, P)
    """
    f32 = jnp.float32
    BN = out_ref.shape[0]
    H = lin_w_ref.shape[0]
    T = x_ref.shape[0] // BN

    # Graph conv for ALL periods & batches in one MXU issue.
    ax = jnp.dot(a_ref[...], x_ref[...], preferred_element_type=f32)            # (TBN, F)
    # Folded GCNConv->gate affine map; z and h~ pre-activations side by side.
    pre = jnp.dot(ax, w_ref[...], preferred_element_type=f32) + b_ref[...]      # (TBN, 2H)

    z = jax.nn.sigmoid(pre[:, :H])
    h_tilde = jnp.tanh(pre[:, H:])
    h_new = (1.0 - z) * h_tilde            # H == 0 in A3TGCN2 -> z*H term is dead
    h_w = h_new * wcol_ref[...]            # attention-weighted hidden states

    # Sum over periods: rows are (t, b, n), so period blocks are contiguous.
    acc = h_w[0:BN, :]
    for t in range(1, T):                  # static unroll: T-1 cheap VPU adds
        acc = acc + h_w[t * BN:(t + 1) * BN, :]

    h_relu = jnp.maximum(acc, 0.0)
    out = jnp.dot(h_relu, lin_w_ref[...], preferred_element_type=f32) + lin_b_ref[...]
    out_ref[...] = out.astype(out_ref.dtype)


# ----------------------------- wrapper ---------------------------------------
def temporal_gnn_forward(x, edge_index, edge_attr, params):
    """x: (B, N, F, T) exactly as PyTorch A3TGCN2 expects it."""
    B, N, FEAT, T = x.shape
    H = params["conv_w"].shape[2]
    P = params["lin_w"].shape[1]

    a_hat = build_gcn_norm_adj(edge_index, edge_attr, N)

    # ---- layout plumbing + exact (one-time, tiny) algebraic folding --------
    # rows ordered (t, b, n); features on lanes
    x_flat = jnp.transpose(x, (3, 0, 1, 2)).reshape(T * B * N, FEAT)
    # block-diagonal adjacency applies A_hat to every (t, b) node block at once
    a_blk = jnp.kron(jnp.eye(T * B, dtype=a_hat.dtype), a_hat)                  # (TBN, TBN)
    # H == 0 always in A3TGCN2: drop the r-gate and fold GCNConv into the gate Linear.
    gz = params["gate_w"][0, :H, :]
    gh = params["gate_w"][2, :H, :]
    w_eff = jnp.concatenate([params["conv_w"][0] @ gz,
                             params["conv_w"][2] @ gh], axis=1)                 # (F, 2H)
    b_eff = jnp.concatenate([params["conv_b"][0] @ gz + params["gate_b"][0],
                             params["conv_b"][2] @ gh + params["gate_b"][2]],
                            axis=1)                                             # (1, 2H)
    # attention softmax hoisted out of the kernel; expand to a per-row column
    probs = jax.nn.softmax(params["att"][0])                                    # (T,)
    w_col = jnp.repeat(probs, B * N)[:, None].astype(jnp.float32)               # (TBN, 1)

    TBN = T * B * N
    out_flat = pl.pallas_call(
        temporal_gnn_kernel,
        out_shape=jax.ShapeDtypeStruct((B * N, P), jnp.float32),
        grid_spec=pltpu.PrefetchScalarGridSpec(
            num_scalar_prefetch=0,
            grid=(1,),                                   # single fused step (B,T folded)
            in_specs=[
                pl.BlockSpec((TBN, FEAT), lambda i: (0, 0)),     # x  (rows t,b,n)
                pl.BlockSpec((TBN, TBN),  lambda i: (0, 0)),     # block-diag A_hat
                pl.BlockSpec((FEAT, 2 * H), lambda i: (0, 0)),   # folded weights
                pl.BlockSpec((1, 2 * H),  lambda i: (0, 0)),     # folded biases
                pl.BlockSpec((TBN, 1),    lambda i: (0, 0)),     # attention column
                pl.BlockSpec((H, P),      lambda i: (0, 0)),     # final linear weight
                pl.BlockSpec((1, P),      lambda i: (0, 0)),     # final linear bias
            ],
            out_specs=pl.BlockSpec((B * N, P), lambda i: (0, 0)),
        ),
        compiler_params=pltpu.CompilerParams(
            dimension_semantics=("arbitrary",)),
    )(x_flat, a_blk, w_eff, b_eff, w_col, params["lin_w"], params["lin_b"])
    return out_flat.reshape(B, N, P)


# ------------------------- plain-JAX glue ------------------------------------
def build_gcn_norm_adj(edge_index, edge_weight, num_nodes):
    """Dense D^-1/2 (A + I) D^-1/2, matching PyG gcn_norm (improved=False)."""
    src = edge_index[0]
    dst = edge_index[1]
    loop = jnp.arange(num_nodes, dtype=edge_index.dtype)
    src = jnp.concatenate([src, loop])
    dst = jnp.concatenate([dst, loop])
    w = jnp.concatenate([edge_weight,
                         jnp.ones((num_nodes,), edge_weight.dtype)])
    deg = jnp.zeros((num_nodes,), w.dtype).at[dst].add(w)
    dinv = jnp.where(deg > 0, jax.lax.rsqrt(deg), 0.0)
    norm = dinv[src] * w * dinv[dst]
    # out_i = sum_{j->i} norm * x_j  =>  A_hat[dst, src] = norm
    return jnp.zeros((num_nodes, num_nodes), w.dtype).at[dst, src].add(norm)


def init_params(key, f, h, p):
    ks = jax.random.split(key, 7)
    scale = 0.1
    return dict(
        conv_w=scale * jax.random.normal(ks[0], (3, f, h), jnp.float32),
        conv_b=scale * jax.random.normal(ks[1], (3, 1, h), jnp.float32),
        gate_w=scale * jax.random.normal(ks[2], (3, 2 * h, h), jnp.float32),
        gate_b=scale * jax.random.normal(ks[3], (3, 1, h), jnp.float32),
        att=jax.random.uniform(ks[4], (1, p), jnp.float32),   # torch.nn.init.uniform_
        lin_w=scale * jax.random.normal(ks[5], (h, p), jnp.float32),
        lin_b=scale * jax.random.normal(ks[6], (1, p), jnp.float32),
    )


def reference_forward(x, a_hat, params):
    """Pure-JAX reference with the FULL gate math (r-gate, H terms) and H=0,
    proving the kernel's dead-code elimination / folding is exact."""
    B, N, FEAT, T = x.shape
    H = params["conv_w"].shape[2]
    probs = jax.nn.softmax(params["att"][0])
    h0 = jnp.zeros((B, N, H), jnp.float32)      # A3TGCN2 passes H=None every period
    h_accum = jnp.zeros((B, N, H), jnp.float32)
    for t in range(T):
        xt = x[..., t]                          # (B, N, F)

        def gcn(i):
            return (jnp.einsum("ij,bjk->bik", a_hat, xt @ params["conv_w"][i])
                    + params["conv_b"][i])

        def gate(i, c, hpart):
            return (c @ params["gate_w"][i, :H] + hpart @ params["gate_w"][i, H:]
                    + params["gate_b"][i])

        cz, cr, ch = gcn(0), gcn(1), gcn(2)
        z = jax.nn.sigmoid(gate(0, cz, h0))
        r = jax.nn.sigmoid(gate(1, cr, h0))
        h_tilde = jnp.tanh(gate(2, ch, h0 * r))
        h_new = z * h0 + (1.0 - z) * h_tilde
        h_accum = h_accum + probs[t] * h_new
    return jnp.maximum(h_accum, 0.0) @ params["lin_w"] + params["lin_b"]


# ------------------------------- main -----------------------------------------
if __name__ == "__main__":
    jax.config.update("jax_default_matmul_precision", "highest")

    key = jax.random.PRNGKey(0)
    kx, kw, kp = jax.random.split(key, 3)

    # x as PyTorch A3TGCN2 expects it: (B, N, F, T)
    x = jax.random.normal(kx, (BATCH, NUM_NODES, NODE_FEATURES, PERIODS),
                          jnp.float32)

    # deterministic ring graph: i <-> i+1, E = 2 * N edges
    fwd = jnp.arange(NUM_NODES, dtype=jnp.int32)
    bwd = (fwd + 1) % NUM_NODES
    edge_index = jnp.stack([jnp.concatenate([fwd, bwd]),
                            jnp.concatenate([bwd, fwd])])            # (2, 32)
    edge_attr = 0.5 + jax.random.uniform(kw, (edge_index.shape[1],),
                                         jnp.float32)                # (32,)

    params = init_params(kp, NODE_FEATURES, HIDDEN, PERIODS)

    out = jax.jit(temporal_gnn_forward)(x, edge_index, edge_attr, params)
    out = jax.block_until_ready(out)                 # (B, N, PERIODS)

    a_hat = build_gcn_norm_adj(edge_index, edge_attr, NUM_NODES)
    ref = reference_forward(x, a_hat, params)
    assert out.shape == (BATCH, NUM_NODES, PERIODS)
    assert jnp.allclose(out, ref, rtol=1e-4, atol=1e-4)

    print("KERNEL_OK")
</pallas_src>

<mosaic_0001>
module attributes {stable_mosaic.version = 11 : i64} {
  func.func private @main(%arg0: i32) attributes {dimension_semantics = [#tpu.dimension_semantics<core_parallel>], iteration_bounds = array<i64: 2>, tpu.core_type = #tpu.core_type<sc_scalar_subcore>, window_params = []} {
    return
  }
}

module attributes {stable_mosaic.version = 11 : i64} {
  func.func private @main(%arg0: i32) attributes {dimension_semantics = [#tpu.dimension_semantics<core_parallel>], iteration_bounds = array<i64: 2>, tpu.core_type = #tpu.core_type<sc_scalar_subcore>, window_params = []} {
    return
  }
}

module attributes {stable_mosaic.version = 11 : i64} {
  func.func @temporal_gnn_kernel(%arg0: i32, %arg1: memref<256x4xf32, #tpu.memory_space<vmem>>, %arg2: memref<256x256xf32, #tpu.memory_space<vmem>>, %arg3: memref<4x64xf32, #tpu.memory_space<vmem>>, %arg4: memref<1x64xf32, #tpu.memory_space<vmem>>, %arg5: memref<256x1xf32, #tpu.memory_space<vmem>>, %arg6: memref<32x8xf32, #tpu.memory_space<vmem>>, %arg7: memref<1x8xf32, #tpu.memory_space<vmem>>, %arg8: memref<32x8xf32, #tpu.memory_space<vmem>>) attributes {dimension_semantics = [#tpu.dimension_semantics<arbitrary>], iteration_bounds = array<i64: 1>, scalar_prefetch = 0 : i64, scratch_operands = 0 : i64, tpu.core_type = #tpu.core_type<tc>, window_params = [{pipeline_mode = #tpu.pipeline_mode<synchronous>, transform_indices = @transform_0, window_bounds = array<i64: 256, 4>}, {pipeline_mode = #tpu.pipeline_mode<synchronous>, transform_indices = @transform_1, window_bounds = array<i64: 256, 256>}, {pipeline_mode = #tpu.pipeline_mode<synchronous>, transform_indices = @transform_2, window_bounds = array<i64: 4, 64>}, {pipeline_mode = #tpu.pipeline_mode<synchronous>, transform_indices = @transform_3, window_bounds = array<i64: 1, 64>}, {pipeline_mode = #tpu.pipeline_mode<synchronous>, transform_indices = @transform_4, window_bounds = array<i64: 256, 1>}, {pipeline_mode = #tpu.pipeline_mode<synchronous>, transform_indices = @transform_5, window_bounds = array<i64: 32, 8>}, {pipeline_mode = #tpu.pipeline_mode<synchronous>, transform_indices = @transform_6, window_bounds = array<i64: 1, 8>}, {pipeline_mode = #tpu.pipeline_mode<synchronous>, transform_indices = @transform_7, window_bounds = array<i64: 32, 8>}]} {
    %c0 = arith.constant 0 : index
    %c0_0 = arith.constant 0 : index
    %0 = vector.load %arg2[%c0, %c0_0] : memref<256x256xf32, #tpu.memory_space<vmem>>, vector<256x256xf32>
    %c0_1 = arith.constant 0 : index
    %c0_2 = arith.constant 0 : index
    %1 = vector.load %arg1[%c0_1, %c0_2] : memref<256x4xf32, #tpu.memory_space<vmem>>, vector<256x4xf32>
    %cst = arith.constant dense<0.000000e+00> : vector<256x4xf32>
    %2 = tpu.matmul %0, %1, %cst {dimension_numbers = #tpu.dot_dimension_numbers<[1], [0], [0], [1], [0, 0, 1, 1], [], []>, precision = #tpu.contract_precision<fp32>} : vector<256x256xf32>, vector<256x4xf32>, vector<256x4xf32> -> vector<256x4xf32>
    %c0_3 = arith.constant 0 : index
    %c0_4 = arith.constant 0 : index
    %3 = vector.load %arg3[%c0_3, %c0_4] : memref<4x64xf32, #tpu.memory_space<vmem>>, vector<4x64xf32>
    %cst_5 = arith.constant dense<0.000000e+00> : vector<256x64xf32>
    %4 = tpu.matmul %2, %3, %cst_5 {dimension_numbers = #tpu.dot_dimension_numbers<[1], [0], [0], [1], [0, 0, 1, 1], [], []>, precision = #tpu.contract_precision<fp32>} : vector<256x4xf32>, vector<4x64xf32>, vector<256x64xf32> -> vector<256x64xf32>
    %c0_6 = arith.constant 0 : index
    %c0_7 = arith.constant 0 : index
    %5 = vector.load %arg4[%c0_6, %c0_7] : memref<1x64xf32, #tpu.memory_space<vmem>>, vector<1x64xf32>
    %6 = vector.broadcast %5 : vector<1x64xf32> to vector<256x64xf32>
    %7 = arith.addf %4, %6 : vector<256x64xf32>
    %8 = vector.extract_strided_slice %7 {offsets = [0, 0], sizes = [256, 32], strides = [1, 1]} : vector<256x64xf32> to vector<256x32xf32>
    %9 = arith.negf %8 : vector<256x32xf32>
    %10 = math.exp %9 : vector<256x32xf32>
    %cst_8 = arith.constant 1.000000e+00 : f32
    %11 = vector.broadcast %cst_8 : f32 to vector<256x32xf32>
    %12 = arith.addf %11, %10 : vector<256x32xf32>
    %13 = arith.divf %11, %12 : vector<256x32xf32>
    %14 = vector.extract_strided_slice %7 {offsets = [0, 32], sizes = [256, 32], strides = [1, 1]} : vector<256x64xf32> to vector<256x32xf32>
    %15 = math.tanh %14 : vector<256x32xf32>
    %cst_9 = arith.constant 1.000000e+00 : f32
    %16 = vector.broadcast %cst_9 : f32 to vector<256x32xf32>
    %17 = arith.subf %16, %13 : vector<256x32xf32>
    %18 = arith.mulf %17, %15 : vector<256x32xf32>
    %c0_10 = arith.constant 0 : index
    %c0_11 = arith.constant 0 : index
    %19 = vector.load %arg5[%c0_10, %c0_11] : memref<256x1xf32, #tpu.memory_space<vmem>>, vector<256x1xf32>
    %20 = vector.broadcast %19 : vector<256x1xf32> to vector<256x32xf32>
    %21 = arith.mulf %18, %20 : vector<256x32xf32>
    %22 = vector.extract_strided_slice %21 {offsets = [0, 0], sizes = [32, 32], strides = [1, 1]} : vector<256x32xf32> to vector<32x32xf32>
    %23 = vector.extract_strided_slice %21 {offsets = [32, 0], sizes = [32, 32], strides = [1, 1]} : vector<256x32xf32> to vector<32x32xf32>
    %24 = arith.addf %22, %23 : vector<32x32xf32>
    %25 = vector.extract_strided_slice %21 {offsets = [64, 0], sizes = [32, 32], strides = [1, 1]} : vector<256x32xf32> to vector<32x32xf32>
    %26 = arith.addf %24, %25 : vector<32x32xf32>
    %27 = vector.extract_strided_slice %21 {offsets = [96, 0], sizes = [32, 32], strides = [1, 1]} : vector<256x32xf32> to vector<32x32xf32>
    %28 = arith.addf %26, %27 : vector<32x32xf32>
    %29 = vector.extract_strided_slice %21 {offsets = [128, 0], sizes = [32, 32], strides = [1, 1]} : vector<256x32xf32> to vector<32x32xf32>
    %30 = arith.addf %28, %29 : vector<32x32xf32>
    %31 = vector.extract_strided_slice %21 {offsets = [160, 0], sizes = [32, 32], strides = [1, 1]} : vector<256x32xf32> to vector<32x32xf32>
    %32 = arith.addf %30, %31 : vector<32x32xf32>
    %33 = vector.extract_strided_slice %21 {offsets = [192, 0], sizes = [32, 32], strides = [1, 1]} : vector<256x32xf32> to vector<32x32xf32>
    %34 = arith.addf %32, %33 : vector<32x32xf32>
    %35 = vector.extract_strided_slice %21 {offsets = [224, 0], sizes = [32, 32], strides = [1, 1]} : vector<256x32xf32> to vector<32x32xf32>
    %36 = arith.addf %34, %35 : vector<32x32xf32>
    %cst_12 = arith.constant 0.000000e+00 : f32
    %37 = vector.broadcast %cst_12 : f32 to vector<32x32xf32>
    %38 = arith.maximumf %36, %37 : vector<32x32xf32>
    %c0_13 = arith.constant 0 : index
    %c0_14 = arith.constant 0 : index
    %39 = vector.load %arg6[%c0_13, %c0_14] : memref<32x8xf32, #tpu.memory_space<vmem>>, vector<32x8xf32>
    %cst_15 = arith.constant dense<0.000000e+00> : vector<32x8xf32>
    %40 = tpu.matmul %38, %39, %cst_15 {dimension_numbers = #tpu.dot_dimension_numbers<[1], [0], [0], [1], [0, 0, 1, 1], [], []>, precision = #tpu.contract_precision<fp32>} : vector<32x32xf32>, vector<32x8xf32>, vector<32x8xf32> -> vector<32x8xf32>
    %c0_16 = arith.constant 0 : index
    %c0_17 = arith.constant 0 : index
    %41 = vector.load %arg7[%c0_16, %c0_17] : memref<1x8xf32, #tpu.memory_space<vmem>>, vector<1x8xf32>
    %42 = vector.broadcast %41 : vector<1x8xf32> to vector<32x8xf32>
    %43 = arith.addf %40, %42 : vector<32x8xf32>
    %c0_18 = arith.constant 0 : index
    %c0_19 = arith.constant 0 : index
    %44 = vector.load %arg8[%c0_18, %c0_19] : memref<32x8xf32, #tpu.memory_space<vmem>>, vector<32x8xf32>
    tpu.vector_store %arg8[%c0_18, %c0_19], %43 {strides = array<i32>} : memref<32x8xf32, #tpu.memory_space<vmem>>, vector<32x8xf32>,
    return
  }
  func.func @transform_0(%arg0: i32) -> (i32, i32) {
    %c0_i32 = arith.constant 0 : i32
    %c0_i32_0 = arith.constant 0 : i32
    %c0_i32_1 = arith.constant 0 : i32
    return %c0_i32, %c0_i32_0 : i32, i32
  }
  func.func @transform_1(%arg0: i32) -> (i32, i32) {
    %c0_i32 = arith.constant 0 : i32
    %c0_i32_0 = arith.constant 0 : i32
    %c0_i32_1 = arith.constant 0 : i32
    return %c0_i32, %c0_i32_0 : i32, i32
  }
  func.func @transform_2(%arg0: i32) -> (i32, i32) {
    %c0_i32 = arith.constant 0 : i32
    %c0_i32_0 = arith.constant 0 : i32
    %c0_i32_1 = arith.constant 0 : i32
    return %c0_i32, %c0_i32_0 : i32, i32
  }
  func.func @transform_3(%arg0: i32) -> (i32, i32) {
    %c0_i32 = arith.constant 0 : i32
    %c0_i32_0 = arith.constant 0 : i32
    %c0_i32_1 = arith.constant 0 : i32
    return %c0_i32, %c0_i32_0 : i32, i32
  }
  func.func @transform_4(%arg0: i32) -> (i32, i32) {
    %c0_i32 = arith.constant 0 : i32
    %c0_i32_0 = arith.constant 0 : i32
    %c0_i32_1 = arith.constant 0 : i32
    return %c0_i32, %c0_i32_0 : i32, i32
  }
  func.func @transform_5(%arg0: i32) -> (i32, i32) {
    %c0_i32 = arith.constant 0 : i32
    %c0_i32_0 = arith.constant 0 : i32
    %c0_i32_1 = arith.constant 0 : i32
    return %c0_i32, %c0_i32_0 : i32, i32
  }
  func.func @transform_6(%arg0: i32) -> (i32, i32) {
    %c0_i32 = arith.constant 0 : i32
    %c0_i32_0 = arith.constant 0 : i32
    %c0_i32_1 = arith.constant 0 : i32
    return %c0_i32, %c0_i32_0 : i32, i32
  }
  func.func @transform_7(%arg0: i32) -> (i32, i32) {
    %c0_i32 = arith.constant 0 : i32
    %c0_i32_0 = arith.constant 0 : i32
    %c0_i32_1 = arith.constant 0 : i32
    return %c0_i32, %c0_i32_0 : i32, i32
  }
}

</mosaic_0001>

<bundles_post_ra>
// kernel: temporal_gnn_forward.1
= control target key start
LH: loop header
LB: loop body
LE: loop exit
PB: predicated region body
PF: predicated region fallthrough
CT: control target
= control target key end

     0   :  { %v11168_v0 = vmov 0.0|0.0   ;;  %vm2825_vm0 = vcmask 1043456   ;;  %vm2728_vm1 = vcmask 31744   ;;  %vm5291_vm2 = vcmask 261120   ;;  %s11120_s0 = inlined_call_operand.vmem [shape: f32[256,4], index: 0, kind: input, shape index: {}]   ;;  %s11121_s1 = inlined_call_operand.vmem [shape: f32[256,256], index: 1, kind: input, shape index: {}]   ;;  %s11122_s2 = inlined_call_operand.vmem [shape: f32[4,64], index: 2, kind: input, shape index: {}]   ;;  %s11123_s4 = inlined_call_operand.vmem [shape: f32[256,1], index: 4, kind: input, shape index: {}]   ;;  %s11124_s3 = inlined_call_operand.vmem [shape: f32[1,64], index: 3, kind: input, shape index: {}]   ;;  %s11125_s5 = inlined_call_operand.vmem [shape: f32[32,8], index: 5, kind: input, shape index: {}]   ;;  %s11126_s6 = inlined_call_operand.vmem [shape: f32[1,8], index: 6, kind: input, shape index: {}]   ;;  %s11127_s7 = inlined_call_operand.vmem [shape: f32[32,8], index: 7, kind: output, shape index: {}]  }
   0x1   :  { %6639 = vmatprep.subr.bf16.mxu0 %v11168_v0  ;;  %v7707_v1 = vld [vmem:[%s11120_s0] sm:$0xff]  ;;  %v7712_v2 = vld [vmem:[%s11120_s0 + $0x8] sm:$0xff]  ;;  %v7717_v3 = vld [vmem:[%s11120_s0 + $0x10] sm:$0xff]  ;;  %6591 = vmatprep.subr.bf16.mxu1 %v11168_v0  ;;  %vm5918_vm3 = vcmask 64512  }
   0x2   :  { %v11162_v4 = vand.u32 4294901760, %v7707_v1  ;;  %v11160_v5 = vand.u32 4294901760, %v7712_v2  ;;  %v7725_v6 = vld [vmem:[%s11120_s0 + $0x18] sm:$0xff]  ;;  %v11158_v7 = vand.u32 4294901760, %v7717_v3  ;;  %v7731_v8 = vld [vmem:[%s11120_s0 + $0x20] sm:$0xff]  ;;  %v7736_v9 = vld [vmem:[%s11120_s0 + $0x28] sm:$0xff] }
   0x3   :  { %v11157_v10 = vand.u32 4294901760, %v7725_v6  ;;  %v11155_v11 = vand.u32 4294901760, %v7731_v8  ;;  %v11154_v12 = vand.u32 4294901760, %v7736_v9  ;;  %v7744_v13 = vld [vmem:[%s11120_s0 + $0x30] sm:$0xff]  ;;  %v7749_v14 = vld [vmem:[%s11120_s0 + $0x38] sm:$0xff]  ;;  %v7822_v39 = vld [vmem:[%s11120_s0 + $0x40] sm:$0xff] }
   0x4   :  { %v7754_v15 = vsub.f32 %v7707_v1, %v11162_v4  ;;  %v7759_v16 = vsub.f32 %v7712_v2, %v11160_v5  ;;  %v7764_v17 = vsub.f32 %v7717_v3, %v11158_v7  ;;  %v11149_v18 = vand.u32 4294901760, %v7744_v13  ;;  %v7827_v40 = vld [vmem:[%s11120_s0 + $0x48] sm:$0xff]  ;;  %v7832_v44 = vld [vmem:[%s11120_s0 + $0x50] sm:$0xff]  ;;  %v7840_v47 = vld [vmem:[%s11120_s0 + $0x58] sm:$0xff] }
   0x5   :  { %v7770_v19 = vsub.f32 %v7725_v6, %v11157_v10  ;;  %v7775_v20 = vsub.f32 %v7731_v8, %v11155_v11  ;;  %v7780_v21 = vsub.f32 %v7736_v9, %v11154_v12  ;;  %v11148_v22 = vand.u32 4294901760, %v7749_v14  ;;  %v7845_v48 = vld [vmem:[%s11120_s0 + $0x60] sm:$0xff]  ;;  %v7854_v53 = vld [vmem:[%s11120_s0 + $0x68] sm:$0xff]  ;;  %v7859_v54 = vld [vmem:[%s11120_s0 + $0x70] sm:$0xff] }
   0x6   :  { %11561 = vst [vmem:[#allocation2_spill] sm:$0xff] %v7754_v15  ;;  %11562 = vst [vmem:[#allocation3_spill] sm:$0xff] %v7759_v16  ;;  %v11137_v23 = vand.u32 4294901760, %v7754_v15  ;;  %v11136_v24 = vand.u32 4294901760, %v7759_v16  ;;  %v11135_v25 = vand.u32 4294901760, %v7764_v17  ;;  %v7789_v26 = vsub.f32 %v7744_v13, %v11149_v18  ;;  %v7883_v63 = vld [vmem:[%s11120_s0 + $0x78] sm:$0xff] }
   0x7   :  { %11563 = vst [vmem:[#allocation4_spill] sm:$0xff] %v7764_v17  ;;  %11564 = vst [vmem:[#allocation5_spill] sm:$0xff] %v7770_v19  ;;  %v11132_v27 = vand.u32 4294901760, %v7770_v19  ;;  %v11131_v28 = vand.u32 4294901760, %v7775_v20  ;;  %v11130_v29 = vand.u32 4294901760, %v7780_v21  ;;  %v7797_v30 = vsub.f32 %v7749_v14, %v11148_v22  ;;  %v8012_v12 = vld [vmem:[%s11120_s0 + $0xb8] sm:$0xff] }
   0x8   :  { %11565 = vst [vmem:[#allocation6_spill] sm:$0xff] %v7775_v20  ;;  %11566 = vst [vmem:[#allocation7_spill] sm:$0xff] %v7780_v21  ;;  %v703_v31 = vsub.f32 %v7754_v15, %v11137_v23  ;;  %v710_v32 = vsub.f32 %v7759_v16, %v11136_v24  ;;  %v717_v33 = vsub.f32 %v7764_v17, %v11135_v25  ;;  %v11129_v34 = vand.u32 4294901760, %v7789_v26  ;;  %v8047_v5 = vld [vmem:[%s11120_s0 + $0xc0] sm:$0xff] }
   0x9   :  { %11567 = vst [vmem:[#allocation8_spill] sm:$0xff] %v7789_v26  ;;  %11568 = vst [vmem:[#allocation9_spill] sm:$0xff] %v7797_v30  ;;  %v724_v35 = vsub.f32 %v7770_v19, %v11132_v27  ;;  %v731_v36 = vsub.f32 %v7775_v20, %v11131_v28  ;;  %v738_v37 = vsub.f32 %v7780_v21, %v11130_v29  ;;  %v11128_v38 = vand.u32 4294901760, %v7797_v30  ;;  %v7926_v27 = vld [vmem:[%s11120_s0 + $0x80] sm:$0xff] }
   0xa   :  { %v704_v41 = vand.u32 4294901760, %v703_v31  ;;  %v711_v42 = vand.u32 4294901760, %v710_v32  ;;  %v718_v43 = vand.u32 4294901760, %v717_v33  ;;  %v745_v46 = vsub.f32 %v7789_v26, %v11129_v34  ;;  %11578 = vst [vmem:[#allocation19_spill] sm:$0xff] %v7926_v27  ;;  %11591 = vst [vmem:[#allocation32_spill] sm:$0xff] %v8012_v12 }
   0xb   :  { %v725_v45 = vand.u32 4294901760, %v724_v35  ;;  %v732_v50 = vand.u32 4294901760, %v731_v36  ;;  %v11147_v51 = vand.u32 4294901760, %v7822_v39  ;;  %v11146_v52 = vand.u32 4294901760, %v7827_v40  ;;  %11597 = vst [vmem:[#allocation37_spill] sm:$0xff] %v8047_v5 }
   0xc   :  { %v7847_v49 = vpack.c.bf16 %v711_v42, %v704_v41  ;;  %v739_v56 = vand.u32 4294901760, %v738_v37  ;;  %v752_v57 = vsub.f32 %v7797_v30, %v11128_v38  ;;  %v11145_v58 = vand.u32 4294901760, %v7832_v44 }
   0xd   :  { %v7861_v55 = vpack.c.bf16 %v725_v45, %v718_v43  ;;  %v7871_v59 = vsub.f32 %v7822_v39, %v11147_v51  ;;  %v7876_v60 = vsub.f32 %v7827_v40, %v11146_v52  ;;  %v11144_v61 = vand.u32 4294901760, %v7840_v47 }
   0xe   :  { %11569 = vst [vmem:[#allocation10_spill] sm:$0xff] %v7847_v49  ;;  %6641 = vmatpush1.bf16.msra.mxu0 %v7847_v49  ;;  %v11140_v62 = vand.u32 4294901760, %v7845_v48  ;;  %v746_v31 = vand.u32 4294901760, %v745_v46  ;;  %v7889_v32 = vsub.f32 %v7832_v44, %v11145_v58  ;;  %v11139_v33 = vand.u32 4294901760, %v7854_v53 }
   0xf   :  { %11570 = vst [vmem:[#allocation11_spill] sm:$0xff] %v7861_v55  ;;  %11571 = vst [vmem:[#allocation12_spill] sm:$0xff] %v7871_v59  ;;  %6642 = vmatprep.subr.bf16.mxu0 %v11168_v0  ;;  %v11138_v35 = vand.u32 4294901760, %v7859_v54  ;;  %v11133_v36 = vand.u32 4294901760, %v7871_v59  ;;  %v11134_v37 = vand.u32 4294901760, %v7876_v60  ;;  %v7898_v41 = vsub.f32 %v7840_v47, %v11144_v61 }
  0x10   :  { %11572 = vst [vmem:[#allocation13_spill] sm:$0xff] %v7876_v60  ;;  %11573 = vst [vmem:[#allocation14_spill] sm:$0xff] %v7889_v32  ;;  %v7903_v42 = vsub.f32 %v7845_v48, %v11140_v62  ;;  %v753_v43 = vand.u32 4294901760, %v752_v57  ;;  %v11141_v45 = vand.u32 4294901760, %v7889_v32  ;;  %v7909_v46 = vsub.f32 %v7854_v53, %v11139_v33 }
  0x11   :  { %11574 = vst [vmem:[#allocation15_spill] sm:$0xff] %v7898_v41  ;;  %v11143_v38 = vand.u32 4294901760, %v7883_v63  ;;  %v7913_v34 = vpack.c.bf16 %v739_v56, %v732_v50  ;;  %v759_v29 = vsub.f32 %v7871_v59, %v11133_v36  ;;  %v766_v57 = vsub.f32 %v7876_v60, %v11134_v37  ;;  %v7938_v37 = vld [vmem:[%s11120_s0 + $0x88] sm:$0xff] }
  0x12   :  { %11575 = vst [vmem:[#allocation16_spill] sm:$0xff] %v7903_v42  ;;  %11576 = vst [vmem:[#allocation17_spill] sm:$0xff] %v7909_v46  ;;  %6644 = vmatpush1.bf16.msra.mxu0 %v7861_v55  ;;  %v11142_v28 = vand.u32 4294901760, %v7898_v41  ;;  %v11150_v50 = vand.u32 4294901760, %v7903_v42  ;;  %v11151_v56 = vand.u32 4294901760, %v7909_v46  ;;  %v7933_v36 = vsub.f32 %v7859_v54, %v11138_v35  ;;  %v8092_v55 = vld [vmem:[%s11120_s0 + $0xd0] sm:$0xff] }
  0x13   :  { %11577 = vst [vmem:[#allocation18_spill] sm:$0xff] %v7913_v34  ;;  %6645 = vmatprep.subr.bf16.mxu0 %v11168_v0  ;;  %11580 = vst [vmem:[#allocation21_spill] sm:$0xff] %v7938_v37  ;;  %v7940_v25 = vpack.c.bf16 %v753_v43, %v746_v31  ;;  %v773_v24 = vsub.f32 %v7889_v32, %v11141_v45  ;;  %v7948_v23 = vsub.f32 %v7883_v63, %v11143_v38  ;;  %v7958_v43 = vld [vmem:[%s11120_s0 + $0x90] sm:$0xff]  ;;  %v7963_v45 = vld [vmem:[%s11120_s0 + $0x98] sm:$0xff] }
  0x14   :  { %11579 = vst [vmem:[#allocation20_spill] sm:$0xff] %v7933_v36  ;;  %v760_v35 = vand.u32 4294901760, %v759_v29  ;;  %v767_v33 = vand.u32 4294901760, %v766_v57  ;;  %v780_v62 = vsub.f32 %v7898_v41, %v11142_v28  ;;  %v11152_v31 = vand.u32 4294901760, %v7926_v27  ;;  %11583 = vst [vmem:[#allocation24_spill] sm:$0xff] %v7958_v43 }
  0x15   :  { %11581 = vst [vmem:[#allocation22_spill] sm:$0xff] %v7940_v25  ;;  %11582 = vst [vmem:[#allocation23_spill] sm:$0xff] %v7948_v23  ;;  %v11153_v29 = vand.u32 4294901760, %v7938_v37  ;;  %v787_v57 = vsub.f32 %v7903_v42, %v11150_v50  ;;  %v794_v28 = vsub.f32 %v7909_v46, %v11151_v56  ;;  %v11156_v38 = vand.u32 4294901760, %v7933_v36  ;;  %v7993_v56 = vld [vmem:[%s11120_s0 + $0xa0] sm:$0xff] }
  0x16   :  { %6647 = vmatpush1.bf16.msra.mxu0 %v7913_v34  ;;  %11584 = vst [vmem:[#allocation25_spill] sm:$0xff] %v7963_v45  ;;  %v774_v61 = vand.u32 4294901760, %v773_v24  ;;  %v11159_v58 = vand.u32 4294901760, %v7948_v23  ;;  %v11161_v52 = vand.u32 4294901760, %v7958_v43  ;;  %v11163_v51 = vand.u32 4294901760, %v7963_v45  ;;  %11588 = vst [vmem:[#allocation29_spill] sm:$0xff] %v7993_v56 }
  0x17   :  { %6648 = vmatprep.subr.bf16.mxu0 %v11168_v0  ;;  %v7978_v22 = vpack.c.bf16 %v767_v33, %v760_v35  ;;  %v781_v18 = vand.u32 4294901760, %v780_v62  ;;  %v7983_v50 = vsub.f32 %v7926_v27, %v11152_v31  ;;  %v7988_v24 = vsub.f32 %v7938_v37, %v11153_v29  ;;  %v7999_v62 = vld [vmem:[%s11120_s0 + $0xa8] sm:$0xff]  ;;  %v8007_v29 = vld [vmem:[%s11120_s0 + $0xb0] sm:$0xff]  ;;  %11608 = vst [vmem:[#allocation44_spill] sm:$0xff] %v8092_v55 }
  0x18   :  { %11589 = vst [vmem:[#allocation30_spill] sm:$0xff] %v7999_v62  ;;  %v788_v33 = vand.u32 4294901760, %v787_v57  ;;  %v795_v35 = vand.u32 4294901760, %v794_v28  ;;  %v801_v31 = vsub.f32 %v7933_v36, %v11156_v38  ;;  %11590 = vst [vmem:[#allocation31_spill] sm:$0xff] %v8007_v29  ;;  %v808_v11 = vsub.f32 %v7948_v23, %v11159_v58 }
  0x19   :  { %11585 = vst [vmem:[#allocation26_spill] sm:$0xff] %v7978_v22  ;;  %11586 = vst [vmem:[#allocation27_spill] sm:$0xff] %v7983_v50  ;;  %v8020_v28 = vsub.f32 %v7958_v43, %v11161_v52  ;;  %v8025_v57 = vsub.f32 %v7963_v45, %v11163_v51  ;;  %v8029_v10 = vpack.c.bf16 %v781_v18, %v774_v61  ;;  %v11167_v7 = vand.u32 4294901760, %v7983_v50 }
  0x1a   :  { %6650 = vmatpush1.bf16.msra.mxu0 %v7940_v25  ;;  %11587 = vst [vmem:[#allocation28_spill] sm:$0xff] %v7988_v24  ;;  %v11166_v58 = vand.u32 4294901760, %v7988_v24  ;;  %v11172_v4 = vand.u32 4294901760, %v8012_v12  ;;  %v802_v51 = vand.u32 4294901760, %v801_v31  ;;  %v809_v25 = vand.u32 4294901760, %v808_v11 }
  0x1b   :  { %6651 = vmatprep.subr.bf16.mxu0 %v11168_v0  ;;  %11592 = vst [vmem:[#allocation33_spill] sm:$0xff] %v8020_v28  ;;  %11593 = vst [vmem:[#allocation34_spill] sm:$0xff] %v8025_v57  ;;  %v11595_v18 = vand.u32 4294901760, %v7993_v56  ;;  %v8050_v52 = vpack.c.bf16 %v795_v35, %v788_v33  ;;  %v815_v11 = vsub.f32 %v7983_v50, %v11167_v7  ;;  %v11601_v38 = vand.u32 4294901760, %v8007_v29 }
  0x1c   :  { %11594 = vst [vmem:[#allocation35_spill] sm:$0xff] %v8029_v10  ;;  %v822_v31 = vsub.f32 %v7988_v24, %v11166_v58  ;;  %v8072_v35 = vsub.f32 %v8012_v12, %v11172_v4  ;;  %v8077_v58 = vld [vmem:[%s11120_s0 + $0xc8] sm:$0xff]  ;;  %v8080_v7 = vpack.c.bf16 %v809_v25, %v802_v51 }
  0x1d   :  { %v8042_v61 = vsub.f32 %v7993_v56, %v11595_v18  ;;  %11598 = vst [vmem:[#allocation38_spill] sm:$0xff] %v8050_v52  ;;  %v11599_v18 = vand.u32 4294901760, %v7999_v62  ;;  %v8067_v33 = vsub.f32 %v8007_v29, %v11601_v38  ;;  %11604 = vst [vmem:[#allocation42_spill] sm:$0xff] %v8077_v58  ;;  %v11607_v38 = vand.u32 4294901760, %v8025_v57  ;;  %v8123_v56 = vld [vmem:[%s11120_s0 + $0xe0] sm:$0xff] }
  0x1e   :  { %6653 = vmatpush1.bf16.msra.mxu0 %v7978_v22  ;;  %11603 = vst [vmem:[#allocation41_spill] sm:$0xff] %v8072_v35  ;;  %11605 = vst [vmem:[#allocation43_spill] sm:$0xff] %v8080_v7  ;;  %v823_v25 = vand.u32 4294901760, %v822_v31  ;;  %v11612_v31 = vand.u32 4294901760, %v8047_v5 }
  0x1f   :  { %6654 = vmatprep.subr.bf16.mxu0 %v11168_v0  ;;  %11596 = vst [vmem:[#allocation36_spill] sm:$0xff] %v8042_v61  ;;  %v8061_v22 = vsub.f32 %v7999_v62, %v11599_v18  ;;  %11602 = vst [vmem:[#allocation40_spill] sm:$0xff] %v8067_v33  ;;  %v836_v34 = vsub.f32 %v8025_v57, %v11607_v38  ;;  %v816_v18 = vand.u32 4294901760, %v815_v11  ;;  %v11610_v38 = vmov 0.0|0.0   ;;  %v8108_v11 = vld [vmem:[%s11121_s1 + $0x8] sm:$0xff] }
  0x20   :  { %11611 = vst [vmem:[#allocation46_spill] sm:$0xff] %v8108_v11  ;;  %v8113_v49 = vsub.f32 %v8047_v5, %v11612_v31  ;;  %v11614_v62 = vand.u32 4294901760, %v8042_v61  ;;  %11615 = vst [vmem:[#allocation48_spill] sm:$0xff] %v8123_v56  ;;  %v8142_v12 = vand.u32 4294901760, %v8108_v11 }
  0x21   :  { %11600 = vst [vmem:[#allocation39_spill] sm:$0xff] %v8061_v22  ;;  %v837_v29 = vand.u32 4294901760, %v836_v34  ;;  %v8126_v45 = vpack.c.bf16 %v823_v25, %v816_v18  ;;  %v11617_v31 = vand.u32 4294901760, %v8061_v22  ;;  %v11618_v34 = vand.u32 4294901760, %v8077_v58 }
  0x22   :  { %6656 = vmatpush1.bf16.msra.mxu0 %v8029_v10  ;;  %11613 = vst [vmem:[#allocation47_spill] sm:$0xff] %v8113_v49  ;;  %v843_v4 = vsub.f32 %v8042_v61, %v11614_v62  ;;  %v8139_v62 = vld [vmem:[%s11120_s0 + $0xe8] sm:$0xff]  ;;  %11621 = vst [vmem:[#allocation52_spill] sm:$0xff] %v8142_v12  ;;  %v11622_v18 = vand.u32 4294901760, %v8067_v33  ;;  %924 = vmatprep.mubr.f32.mxu0 %v8142_v12 }
  0x23   :  { %6657 = vmatprep.subr.bf16.mxu0 %v11168_v0  ;;  %v11606_v0 = vand.u32 4294901760, %v8020_v28  ;;  %11616 = vst [vmem:[#allocation49_spill] sm:$0xff] %v8126_v45  ;;  %v8134_v51 = vsub.f32 %v8077_v58, %v11618_v34  ;;  %11620 = vst [vmem:[#allocation51_spill] sm:$0xff] %v8139_v62  ;;  %v11624_v58 = vand.u32 4294901760, %v8092_v55 }
  0x24   :  { %v857_v25 = vsub.f32 %v8067_v33, %v11622_v18  ;;  %v844_v34 = vand.u32 4294901760, %v843_v4 }
  0x25   :  { %v829_v10 = vsub.f32 %v8020_v28, %v11606_v0  ;;  %v8100_v0 = vld [vmem:[%s11120_s0 + $0xd8] sm:$0xff]  ;;  %11619 = vst [vmem:[#allocation50_spill] sm:$0xff] %v8134_v51  ;;  %v8155_v5 = vsub.f32 %v8092_v55, %v11624_v58  ;;  %v11634_v55 = vand.u32 4294901760, %v8139_v62 }
  0x26   :  { %6659 = vmatpush1.bf16.msra.mxu0 %v8050_v52  ;;  %11609 = vst [vmem:[#allocation45_spill] sm:$0xff] %v8100_v0  ;;  %v11626_v43 = vand.u32 4294901760, %v8100_v0 }
  0x27   :  { %6660 = vmatprep.subr.bf16.mxu0 %v11610_v38  ;;  %v830_v52 = vand.u32 4294901760, %v829_v10  ;;  %v850_v10 = vsub.f32 %v8061_v22, %v11617_v31  ;;  %v11623_v31 = vand.u32 4294901760, %v8072_v35  ;;  %11625 = vst [vmem:[#allocation53_spill] sm:$0xff] %v8155_v5  ;;  %v8198_v27 = vsub.f32 %v8139_v62, %v11634_v55 }
  0x28   :  { %v8162_v37 = vsub.f32 %v8100_v0, %v11626_v43  ;;  %v858_v43 = vand.u32 4294901760, %v857_v25  ;;  %v8180_v0 = vld [vmem:[%s11120_s0 + $0xf8] sm:$0xff] }
  0x29   :  { %v8173_v11 = vpack.c.bf16 %v837_v29, %v830_v52  ;;  %v851_v12 = vand.u32 4294901760, %v850_v10  ;;  %11630 = vst [vmem:[#allocation57_spill] sm:$0xff] %v8180_v0  ;;  %v11632_v29 = vand.u32 4294901760, %v8123_v56  ;;  %11635 = vst [vmem:[#allocation59_spill] sm:$0xff] %v8198_v27 }
  0x2a   :  { %6662 = vmatpush1.bf16.msra.mxu0 %v8080_v7  ;;  %v864_v7 = vsub.f32 %v8072_v35, %v11623_v31  ;;  %11627 = vst [vmem:[#allocation54_spill] sm:$0xff] %v8162_v37  ;;  %v8168_v31 = vld [vmem:[%s11120_s0 + $0xf0] sm:$0xff] }
  0x2b   :  { %6663 = vmatprep.subr.bf16.mxu0 %v11610_v38  ;;  %11628 = vst [vmem:[#allocation55_spill] sm:$0xff] %v8168_v31  ;;  %11629 = vst [vmem:[#allocation56_spill] sm:$0xff] %v8173_v11  ;;  %v8191_v10 = vsub.f32 %v8123_v56, %v11632_v29  ;;  %v8205_v4 = vpack.c.bf16 %v851_v12, %v844_v34  ;;  %v11637_v29 = vand.u32 4294901760, %v8134_v51  ;;  %v11643_v34 = vand.u32 4294901760, %v8180_v0 }
  0x2c   :  { %v865_v18 = vand.u32 4294901760, %v864_v7 }
  0x2d   :  { %11633 = vst [vmem:[#allocation58_spill] sm:$0xff] %v8191_v10  ;;  %11636 = vst [vmem:[#allocation60_spill] sm:$0xff] %v8205_v4  ;;  %v878_v7 = vsub.f32 %v8134_v51, %v11637_v29  ;;  %v11639_v29 = vand.u32 4294901760, %v8155_v5 }
  0x2e   :  { %6665 = vmatpush1.bf16.msra.mxu0 %v8126_v45  ;;  %v11631_v45 = vand.u32 4294901760, %v8113_v49  ;;  %v8212_v55 = vpack.c.bf16 %v865_v18, %v858_v43  ;;  %v11645_v43 = vand.u32 4294901760, %v8191_v10 }
  0x2f   :  { %6666 = vmatprep.subr.bf16.mxu0 %v11610_v38  ;;  %v885_v25 = vsub.f32 %v8155_v5, %v11639_v29  ;;  %v879_v12 = vand.u32 4294901760, %v878_v7 }
  0x30   :  { %v871_v52 = vsub.f32 %v8113_v49, %v11631_v45  ;;  %11638 = vst [vmem:[#allocation61_spill] sm:$0xff] %v8212_v55  ;;  %v8237_v45 = vsub.f32 %v8180_v0, %v11643_v34  ;;  %v899_v7 = vsub.f32 %v8191_v10, %v11645_v43 }
  0x31   :  { %v886_v34 = vand.u32 4294901760, %v885_v25 }
  0x32   :  { %6668 = vmatpush1.bf16.msra.mxu0 %v8173_v11  ;;  %v872_v62 = vand.u32 4294901760, %v871_v52  ;;  %v11640_v11 = vand.u32 4294901760, %v8162_v37  ;;  %v11641_v52 = vand.u32 4294901760, %v8168_v31  ;;  %11644 = vst [vmem:[#allocation63_spill] sm:$0xff] %v8237_v45  ;;  %v11201_v43 = vand.u32 4294901760, %v8237_v45 }
  0x33   :  { %6669 = vmatprep.subr.bf16.mxu0 %v11610_v38 }
  0x34   :  { %v892_v18 = vsub.f32 %v8162_v37, %v11640_v11  ;;  %v8231_v58 = vsub.f32 %v8168_v31, %v11641_v52  ;;  %v11646_v31 = vand.u32 4294901760, %v8198_v27  ;;  %v8257_v56 = vpack.c.bf16 %v879_v12, %v872_v62 }
  0x35   :  { %v900_v11 = vand.u32 4294901760, %v899_v7  ;;  %v920_v25 = vsub.f32 %v8237_v45, %v11201_v43  ;;  %v11653_v43 = vand.u32 4294901760, %v7717_v3  ;;  %v11657_v3 = vand.u32 4294901760, %v7731_v8 }
  0x36   :  { %11642 = vst [vmem:[#allocation62_spill] sm:$0xff] %v8231_v58  ;;  %6671 = vmatpush1.bf16.msra.mxu0 %v8205_v4  ;;  %v893_v0 = vand.u32 4294901760, %v892_v18  ;;  %v906_v29 = vsub.f32 %v8198_v27, %v11646_v31  ;;  %11647 = vst [vmem:[#allocation64_spill] sm:$0xff] %v8257_v56  ;;  %v11200_v52 = vand.u32 4294901760, %v8231_v58  ;;  %v11675_v31 = vand.u32 4294901760, %v7840_v47 }
  0x37   :  { %6672 = vmatprep.subr.bf16.mxu0 %v11610_v38 }
  0x38   :  { %v8268_v18 = vpack.c.bf16 %v893_v0, %v886_v34  ;;  %v907_v12 = vand.u32 4294901760, %v906_v29  ;;  %v913_v4 = vsub.f32 %v8231_v58, %v11200_v52  ;;  %v11650_v0 = vand.u32 4294901760, %v7712_v2 }
  0x39   :  { %v921_v52 = vand.u32 4294901760, %v920_v25  ;;  %v11663_v25 = vand.u32 4294901760, %v7749_v14 }
  0x3a   :  { %6674 = vmatpush1.bf16.msra.mxu0 %v8212_v55  ;;  %11648 = vst [vmem:[#allocation65_spill] sm:$0xff] %v8268_v18  ;;  %v11649_v55 = vand.u32 4294901760, %v7707_v1  ;;  %v8289_v29 = vpack.c.bf16 %v907_v12, %v900_v11  ;;  %v914_v7 = vand.u32 4294901760, %v913_v4  ;;  %v11654_v1 = vand.u32 4294901760, %v7725_v6  ;;  %v8306_v4 = vld [vmem:[%s11121_s1] sm:$0xff]  ;;  %v8318_v11 = vld [vmem:[%s11121_s1 + $0x18] sm:$0xff] }
  0x3b   :  { %6675 = vmatprep.subr.bf16.mxu0 %v11610_v38  ;;  %v11658_v6 = vand.u32 4294901760, %v7736_v9  ;;  %v8327_v8 = vand.u32 4294901760, %v8318_v11  ;;  %v8332_v9 = vld [vmem:[%s11121_s1 + $0x10] sm:$0xff] }
  0x3c   :  { %v8283_v34 = vpack.c.bf16 %v11650_v0, %v11649_v55  ;;  %11652 = vst [vmem:[#allocation67_spill] sm:$0xff] %v8289_v29  ;;  %v8295_v62 = vpack.c.bf16 %v11654_v1, %v11653_v43  ;;  %v8301_v2 = vpack.c.bf16 %v921_v52, %v914_v7  ;;  %v8322_v52 = vand.u32 4294901760, %v8306_v4  ;;  %v8344_v0 = vld [vmem:[%s11121_s1 + $0x28] sm:$0xff]  ;;  %v8362_v1 = vld [vmem:[%s11121_s1 + $0x20] sm:$0xff] }
  0x3d   :  { %v8312_v55 = vpack.c.bf16 %v11658_v6, %v11657_v3  ;;  %11661 = vst [vmem:[#allocation72_spill] sm:$0xff] %v8327_v8  ;;  %v11662_v43 = vand.u32 4294901760, %v7744_v13  ;;  %v8349_v7 = vand.u32 4294901760, %v8332_v9  ;;  %v11666_v13 = vpack.c.bf16 %v7759_v16, %v7754_v15  ;;  %v8480_v16 = vld [vmem:[%s11121_s1 + $0x60] sm:$0xff]  ;;  %v11698_v15 = vld [vmem:[#allocation19_spill] sm:$0xff] }
  0x3e   :  { %6677 = vmatpush1.bf16.msra.mxu0 %v8257_v56  ;;  %11651 = vst [vmem:[#allocation66_spill] sm:$0xff] %v8283_v34  ;;  %6593 = vmatpush1.bf16.msra.mxu1 %v8283_v34  ;;  %11655 = vst [vmem:[#allocation68_spill] sm:$0xff] %v8295_v62  ;;  %v8357_v14 = vand.u32 4294901760, %v8344_v0  ;;  %v11668_v3 = vand.u32 4294901760, %v7822_v39  ;;  %v11669_v6 = vand.u32 4294901760, %v7827_v40  ;;  %v11672_v39 = vpack.c.bf16 %v7770_v19, %v7764_v17 }
  0x3f   :  { %6678 = vmatprep.subr.bf16.mxu0 %v11610_v38  ;;  %6594 = vmatprep.subr.bf16.mxu1 %v11610_v38  ;;  %11656 = vst [vmem:[#allocation69_spill] sm:$0xff] %v8301_v2  ;;  %11659 = vst [vmem:[#allocation70_spill] sm:$0xff] %v8312_v55  ;;  %v8338_v12 = vpack.c.bf16 %v11663_v25, %v11662_v43  ;;  %v8374_v25 = vld [vmem:[%s11121_s1 + $0x38] sm:$0xff]  ;;  %v11691_v17 = vpack.c.bf16 %v7876_v60, %v7871_v59  ;;  %v8509_v60 = vld [vmem:[%s11121_s1 + $0x88] sm:$0xff] }
  0x40   :  { %11660 = vst [vmem:[#allocation71_spill] sm:$0xff] %v8322_v52  ;;  %11665 = vst [vmem:[#allocation74_spill] sm:$0xff] %v8349_v7  ;;  %v8368_v43 = vpack.c.bf16 %v11669_v6, %v11668_v3  ;;  %v8387_v40 = vand.u32 4294901760, %v8374_v25  ;;  %v8392_v3 = vld [vmem:[%s11121_s1 + $0x30] sm:$0xff]  ;;  %v11674_v6 = vand.u32 4294901760, %v7832_v44  ;;  %v11678_v44 = vpack.c.bf16 %v7780_v21, %v7775_v20 }
  0x41   :  { %11664 = vst [vmem:[#allocation73_spill] sm:$0xff] %v8338_v12  ;;  %11667 = vst [vmem:[#allocation75_spill] sm:$0xff] %v8357_v14 }
  0x42   :  { %6680 = vmatpush1.bf16.msra.mxu0 %v8268_v18  ;;  %6596 = vmatpush1.bf16.msra.mxu1 %v8295_v62  ;;  %11670 = vst [vmem:[#allocation76_spill] sm:$0xff] %v8368_v43  ;;  %11673 = vst [vmem:[#allocation78_spill] sm:$0xff] %v8387_v40  ;;  %v11681_v18 = vand.u32 4294901760, %v7854_v53 }
  0x43   :  { %6681 = vmatprep.subr.bf16.mxu0 %v11610_v38  ;;  %6597 = vmatprep.subr.bf16.mxu1 %v11610_v38  ;;  %11696 = vst [vmem:[#allocation91_spill] sm:$0xff] %v8509_v60 }
  0x46   :  { %6683 = vmatpush1.bf16.msra.mxu0 %v8289_v29  ;;  %6599 = vmatpush1.bf16.msra.mxu1 %v8312_v55  ;;  %v8409_v29 = vand.u32 4294901760, %v8392_v3 }
  0x47   :  { %6684 = vmatprep.subr.bf16.mxu0 %v11610_v38  ;;  %6600 = vmatprep.subr.bf16.mxu1 %v11610_v38 }
  0x48   :  { %11677 = vst [vmem:[#allocation80_spill] sm:$0xff] %v8409_v29 }
  0x4a   :  { %6686 = vmatpush1.bf16.msra.mxu0 %v8301_v2  ;;  %6602 = vmatpush1.bf16.msra.mxu1 %v8338_v12  ;;  %v8398_v2 = vpack.c.bf16 %v11675_v31, %v11674_v6  ;;  %v8422_v31 = vld [vmem:[%s11121_s1 + $0x40] sm:$0xff]  ;;  %v11680_v6 = vand.u32 4294901760, %v7845_v48  ;;  %v11684_v48 = vpack.c.bf16 %v7797_v30, %v7789_v26  ;;  %v11688_v26 = vand.u32 4294901760, %v7883_v63  ;;  %v8501_v63 = vld [vmem:[%s11121_s1 + $0x70] sm:$0xff] }
  0x4b   :  { %6687 = vmatprep.subr.bf16.mxu0 %v11610_v38  ;;  %6603 = vmatprep.subr.bf16.mxu1 %v11610_v38  ;;  %v8439_v21 = vand.u32 4294901760, %v8422_v31  ;;  %v8514_v59 = vand.u32 4294901760, %v8501_v63 }
  0x4c   :  { %11676 = vst [vmem:[#allocation79_spill] sm:$0xff] %v8398_v2  ;;  %v8428_v56 = vpack.c.bf16 %v11681_v18, %v11680_v6  ;;  %v8452_v18 = vld [vmem:[%s11121_s1 + $0x50] sm:$0xff]  ;;  %v8458_v6 = vld [vmem:[%s11121_s1 + $0x68] sm:$0xff] }
  0x4d   :  { %926 = vmatmul.mubr.f32.vlgmr.msra.gmra.mrb[0].mxu0 %v8322_v52  ;;  %11683 = vst [vmem:[#allocation83_spill] sm:$0xff] %v8439_v21  ;;  %v8462_v30 = vand.u32 4294901760, %v8452_v18  ;;  %v8472_v19 = vand.u32 4294901760, %v8458_v6  ;;  %11697 = vst [vmem:[#allocation92_spill] sm:$0xff] %v8514_v59 }
  0x4e   :  { %6689 = vmatpush1.bf16.msra.mxu0 %v11666_v13  ;;  %931 = vmatprep.mubr.f32.mxu0 %v8327_v8  ;;  %v8379_v13 = vand.u32 4294901760, %v8362_v1  ;;  %11682 = vst [vmem:[#allocation82_spill] sm:$0xff] %v8428_v56 }
  0x4f   :  { %6690 = vmatprep.subr.bf16.mxu0 %v11610_v38  ;;  %6605 = vmatpush1.bf16.msra.mxu1 %v8368_v43  ;;  %11686 = vst [vmem:[#allocation85_spill] sm:$0xff] %v8462_v30  ;;  %11690 = vst [vmem:[#allocation87_spill] sm:$0xff] %v8472_v19 }
  0x50   :  { %11671 = vst [vmem:[#allocation77_spill] sm:$0xff] %v8379_v13  ;;  %6606 = vmatprep.subr.bf16.mxu1 %v11610_v38 }
  0x51   :  { %933 = vmatmul.mubr.f32.gmra.mrb[2].mxu0 %v8349_v7 }
  0x52   :  { %938 = vmatprep.mubr.f32.mxu0 %v8357_v14  ;;  %6692 = vmatpush1.bf16.msra.mxu0 %v11672_v39  ;;  %v8404_v39 = vld [vmem:[%s11121_s1 + $0x48] sm:$0xff] }
  0x53   :  { %6693 = vmatprep.subr.bf16.mxu0 %v11610_v38  ;;  %6608 = vmatpush1.bf16.msra.mxu1 %v8398_v2  ;;  %v8417_v47 = vand.u32 4294901760, %v8404_v39 }
  0x54   :  { %6609 = vmatprep.subr.bf16.mxu1 %v11610_v38 }
  0x55   :  { %940 = vmatmul.mubr.f32.gmra.mrb[4].mxu0 %v8379_v13  ;;  %11679 = vst [vmem:[#allocation81_spill] sm:$0xff] %v8417_v47 }
  0x56   :  { %945 = vmatprep.mubr.f32.mxu0 %v8387_v40  ;;  %6695 = vmatpush1.bf16.msra.mxu0 %v11678_v44  ;;  %v8434_v44 = vld [vmem:[%s11121_s1 + $0x58] sm:$0xff] }
  0x57   :  { %6696 = vmatprep.subr.bf16.mxu0 %v11610_v38  ;;  %6611 = vmatpush1.bf16.msra.mxu1 %v8428_v56  ;;  %v8447_v53 = vand.u32 4294901760, %v8434_v44  ;;  %v11700_v56 = vld [vmem:[#allocation21_spill] sm:$0xff] }
  0x58   :  { %6612 = vmatprep.subr.bf16.mxu1 %v11610_v38  ;;  %v11701_v2 = vand.u32 4294901760, %v11700_v56  ;;  %v8553_v56 = vld [vmem:[%s11121_s1 + $0x90] sm:$0xff] }
  0x59   :  { %947 = vmatmul.mubr.f32.gmra.mrb[6].mxu0 %v8409_v29  ;;  %11685 = vst [vmem:[#allocation84_spill] sm:$0xff] %v8447_v53 }
  0x5a   :  { %952 = vmatprep.mubr.f32.mxu0 %v8417_v47  ;;  %6698 = vmatpush1.bf16.msra.mxu0 %v11684_v48  ;;  %v11687_v48 = vand.u32 4294901760, %v7859_v54  ;;  %v8485_v54 = vld [vmem:[%s11121_s1 + $0x78] sm:$0xff] }
  0x5b   :  { %6699 = vmatprep.subr.bf16.mxu0 %v11610_v38  ;;  %11692 = vst [vmem:[#allocation88_spill] sm:$0xff] %v8485_v54 }
  0x5c   :  { %v8468_v20 = vpack.c.bf16 %v11688_v26, %v11687_v48  ;;  %v8496_v26 = vand.u32 4294901760, %v8485_v54  ;;  %v11695_v48 = vpack.c.bf16 %v7898_v41, %v7889_v32  ;;  %v8529_v41 = vld [vmem:[%s11121_s1 + $0x80] sm:$0xff]  ;;  %v11705_v32 = vpack.c.bf16 %v7909_v46, %v7903_v42  ;;  %v8561_v46 = vld [vmem:[%s11121_s1 + $0xa8] sm:$0xff] }
  0x5d   :  { %954 = vmatmul.mubr.f32.gmra.mrb[8].mxu0 %v8439_v21  ;;  %11704 = vst [vmem:[#allocation93_spill] sm:$0xff] %v8529_v41  ;;  %11710 = vst [vmem:[#allocation97_spill] sm:$0xff] %v8561_v46  ;;  %v8566_v42 = vand.u32 4294901760, %v8553_v56 }
  0x5e   :  { %11689 = vst [vmem:[#allocation86_spill] sm:$0xff] %v8468_v20  ;;  %959 = vmatprep.mubr.f32.mxu0 %v8447_v53  ;;  %6701 = vmatpush1.bf16.msra.mxu0 %v11691_v17  ;;  %v8492_v17 = vand.u32 4294901760, %v8480_v16  ;;  %11694 = vst [vmem:[#allocation90_spill] sm:$0xff] %v8496_v26 }
  0x5f   :  { %6702 = vmatprep.subr.bf16.mxu0 %v11610_v38  ;;  %6614 = vmatpush1.bf16.msra.mxu1 %v8468_v20  ;;  %v11699_v20 = vand.u32 4294901760, %v11698_v15  ;;  %v8537_v15 = vld [vmem:[%s11121_s1 + $0x98] sm:$0xff]  ;;  %11711 = vst [vmem:[#allocation98_spill] sm:$0xff] %v8566_v42 }
  0x60   :  { %6615 = vmatprep.subr.bf16.mxu1 %v11610_v38  ;;  %11693 = vst [vmem:[#allocation89_spill] sm:$0xff] %v8492_v17  ;;  %11706 = vst [vmem:[#allocation94_spill] sm:$0xff] %v8537_v15 }
  0x61   :  { %961 = vmatmul.mubr.f32.gmra.mrb[10].mxu0 %v8462_v30  ;;  %v8520_v54 = vpack.c.bf16 %v11701_v2, %v11699_v20  ;;  %v8544_v20 = vand.u32 4294901760, %v8529_v41  ;;  %v11709_v2 = vpack.c.bf16 %v7948_v23, %v7933_v36  ;;  %v11714_v41 = vld [vmem:[#allocation25_spill] sm:$0xff]  ;;  %v8581_v23 = vld [vmem:[%s11121_s1 + $0xa0] sm:$0xff]  ;;  %v11719_v36 = vpack.c.bf16 %v7988_v24, %v7983_v50  ;;  %v8613_v24 = vld [vmem:[%s11121_s1 + $0xc8] sm:$0xff] }
  0x62   :  { %966 = vmatprep.mubr.f32.mxu0 %v8472_v19  ;;  %6704 = vmatpush1.bf16.msra.mxu0 %v11695_v48  ;;  %v8524_v48 = vand.u32 4294901760, %v8509_v60  ;;  %v11715_v60 = vand.u32 4294901760, %v11714_v41  ;;  %11718 = vst [vmem:[#allocation99_spill] sm:$0xff] %v8581_v23  ;;  %v8589_v41 = vld [vmem:[%s11121_s1 + $0xb8] sm:$0xff]  ;;  %11724 = vst [vmem:[#allocation103_spill] sm:$0xff] %v8613_v24 }
  0x63   :  { %6705 = vmatprep.subr.bf16.mxu0 %v11610_v38  ;;  %11702 = vst [vmem:[#allocation19_spill] sm:$0xff] %v8520_v54  ;;  %6617 = vmatpush1.bf16.msra.mxu1 %v8520_v54  ;;  %11707 = vst [vmem:[#allocation95_spill] sm:$0xff] %v8544_v20  ;;  %v11712_v54 = vld [vmem:[#allocation24_spill] sm:$0xff] }
  0x64   :  { %11703 = vst [vmem:[#allocation21_spill] sm:$0xff] %v8524_v48  ;;  %6618 = vmatprep.subr.bf16.mxu1 %v11610_v38  ;;  %11720 = vst [vmem:[#allocation100_spill] sm:$0xff] %v8589_v41 }
  0x65   :  { %968 = vmatmul.mubr.f32.gmra.mrb[12].mxu0 %v8492_v17 }
  0x66   :  { %973 = vmatprep.mubr.f32.mxu0 %v8496_v26  ;;  %6707 = vmatpush1.bf16.msra.mxu0 %v11705_v32  ;;  %v8548_v32 = vand.u32 4294901760, %v8537_v15  ;;  %v11713_v15 = vand.u32 4294901760, %v11712_v54  ;;  %v8605_v54 = vld [vmem:[%s11121_s1 + $0xb0] sm:$0xff] }
  0x67   :  { %6708 = vmatprep.subr.bf16.mxu0 %v11610_v38  ;;  %v8618_v50 = vand.u32 4294901760, %v8605_v54 }
  0x68   :  { %11708 = vst [vmem:[#allocation96_spill] sm:$0xff] %v8548_v32 }
  0x69   :  { %975 = vmatmul.mubr.f32.gmra.mrb[14].mxu0 %v8514_v59  ;;  %11725 = vst [vmem:[#allocation104_spill] sm:$0xff] %v8618_v50 }
  0x6a   :  { %980 = vmatprep.mubr.f32.mxu0 %v8524_v48  ;;  %6710 = vmatpush1.bf16.msra.mxu0 %v11709_v2  ;;  %v8572_v48 = vpack.c.bf16 %v11715_v60, %v11713_v15  ;;  %v8576_v2 = vand.u32 4294901760, %v8561_v46  ;;  %v8596_v60 = vand.u32 4294901760, %v8581_v23  ;;  %v11723_v15 = vpack.c.bf16 %v8025_v57, %v8020_v28  ;;  %v11728_v23 = vld [vmem:[#allocation30_spill] sm:$0xff] }
  0x6b   :  { %6711 = vmatprep.subr.bf16.mxu0 %v11610_v38  ;;  %v11729_v46 = vand.u32 4294901760, %v11728_v23  ;;  %v8633_v57 = vld [vmem:[%s11121_s1 + $0xc0] sm:$0xff]  ;;  %v11733_v28 = vpack.c.bf16 %v8061_v22, %v8042_v61  ;;  %v8641_v23 = vld [vmem:[%s11121_s1 + $0xd8] sm:$0xff]  ;;  %v8665_v22 = vld [vmem:[%s11121_s1 + $0xe8] sm:$0xff] }
  0x6c   :  { %11716 = vst [vmem:[#allocation24_spill] sm:$0xff] %v8572_v48  ;;  %11717 = vst [vmem:[#allocation25_spill] sm:$0xff] %v8576_v2  ;;  %6620 = vmatpush1.bf16.msra.mxu1 %v8572_v48  ;;  %v11726_v48 = vld [vmem:[#allocation29_spill] sm:$0xff] }
  0x6d   :  { %982 = vmatmul.mubr.f32.gmra.mrb[16].mxu0 %v8544_v20  ;;  %6621 = vmatprep.subr.bf16.mxu1 %v11610_v38  ;;  %11721 = vst [vmem:[#allocation101_spill] sm:$0xff] %v8596_v60  ;;  %11732 = vst [vmem:[#allocation105_spill] sm:$0xff] %v8633_v57 }
  0x6e   :  { %987 = vmatprep.mubr.f32.mxu0 %v8548_v32  ;;  %6713 = vmatpush1.bf16.msra.mxu0 %v11719_v36  ;;  %v8600_v36 = vand.u32 4294901760, %v8589_v41  ;;  %v11727_v41 = vand.u32 4294901760, %v11726_v48  ;;  %11734 = vst [vmem:[#allocation106_spill] sm:$0xff] %v8641_v23  ;;  %v8657_v48 = vld [vmem:[%s11121_s1 + $0xd0] sm:$0xff]  ;;  %11739 = vst [vmem:[#allocation110_spill] sm:$0xff] %v8665_v22 }
  0x6f   :  { %6714 = vmatprep.subr.bf16.mxu0 %v11610_v38  ;;  %11737 = vst [vmem:[#allocation109_spill] sm:$0xff] %v8657_v48  ;;  %v8670_v61 = vand.u32 4294901760, %v8657_v48 }
  0x70   :  { %11722 = vst [vmem:[#allocation102_spill] sm:$0xff] %v8600_v36 }
  0x71   :  { %989 = vmatmul.mubr.f32.gmra.mrb[18].mxu0 %v8566_v42  ;;  %11740 = vst [vmem:[#allocation111_spill] sm:$0xff] %v8670_v61 }
  0x72   :  { %994 = vmatprep.mubr.f32.mxu0 %v8576_v2  ;;  %6716 = vmatpush1.bf16.msra.mxu0 %v11723_v15  ;;  %v8624_v2 = vpack.c.bf16 %v11729_v46, %v11727_v41  ;;  %v8628_v15 = vand.u32 4294901760, %v8613_v24  ;;  %v8648_v46 = vand.u32 4294901760, %v8633_v57  ;;  %v11738_v41 = vpack.c.bf16 %v8072_v35, %v8067_v33  ;;  %v8685_v35 = vld [vmem:[%s11121_s1 + $0xe0] sm:$0xff] }
  0x73   :  { %6717 = vmatprep.subr.bf16.mxu0 %v11610_v38  ;;  %11747 = vst [vmem:[#allocation112_spill] sm:$0xff] %v8685_v35  ;;  %v11748_v33 = vpack.c.bf16 %v8134_v51, %v8113_v49  ;;  %v8717_v51 = vld [vmem:[%s11121_s1 + $0x108] sm:$0xff] }
  0x74   :  { %11730 = vst [vmem:[#allocation29_spill] sm:$0xff] %v8624_v2  ;;  %11731 = vst [vmem:[#allocation30_spill] sm:$0xff] %v8628_v15  ;;  %6623 = vmatpush1.bf16.msra.mxu1 %v8624_v2  ;;  %v11743_v2 = vld [vmem:[#allocation32_spill] sm:$0xff] }
  0x75   :  { %996 = vmatmul.mubr.f32.gmra.mrb[20].mxu0 %v8596_v60  ;;  %6624 = vmatprep.subr.bf16.mxu1 %v11610_v38  ;;  %11735 = vst [vmem:[#allocation107_spill] sm:$0xff] %v8648_v46  ;;  %v11744_v24 = vand.u32 4294901760, %v11743_v2  ;;  %v8693_v2 = vld [vmem:[%s11121_s1 + $0xf8] sm:$0xff]  ;;  %11754 = vst [vmem:[#allocation117_spill] sm:$0xff] %v8717_v51 }
  0x76   :  { %1001 = vmatprep.mubr.f32.mxu0 %v8600_v36  ;;  %6719 = vmatpush1.bf16.msra.mxu0 %v11733_v28  ;;  %v8652_v28 = vand.u32 4294901760, %v8641_v23  ;;  %v11741_v23 = vld [vmem:[#allocation31_spill] sm:$0xff]  ;;  %11749 = vst [vmem:[#allocation113_spill] sm:$0xff] %v8693_v2 }
  0x77   :  { %6720 = vmatprep.subr.bf16.mxu0 %v11610_v38  ;;  %v11742_v57 = vand.u32 4294901760, %v11741_v23  ;;  %v11753_v23 = vpack.c.bf16 %v8162_v37, %v8155_v5  ;;  %v8737_v37 = vld [vmem:[%s11121_s1 + $0x100] sm:$0xff]  ;;  %v11763_v5 = vpack.c.bf16 %v8198_v27, %v8191_v10  ;;  %v8769_v27 = vld [vmem:[%s11121_s1 + $0x128] sm:$0xff] }
  0x78   :  { %11736 = vst [vmem:[#allocation108_spill] sm:$0xff] %v8652_v28  ;;  %11762 = vst [vmem:[#allocation119_spill] sm:$0xff] %v8737_v37 }
  0x79   :  { %1003 = vmatmul.mubr.f32.gmra.mrb[22].mxu0 %v8618_v50  ;;  %11769 = vst [vmem:[#allocation124_spill] sm:$0xff] %v8769_v27 }
  0x7a   :  { %1008 = vmatprep.mubr.f32.mxu0 %v8628_v15  ;;  %6722 = vmatpush1.bf16.msra.mxu0 %v11738_v41  ;;  %v8676_v15 = vpack.c.bf16 %v11744_v24, %v11742_v57  ;;  %v8680_v41 = vand.u32 4294901760, %v8665_v22  ;;  %v8700_v24 = vand.u32 4294901760, %v8685_v35  ;;  %v8704_v57 = vand.u32 4294901760, %v8693_v2  ;;  %v11756_v2 = vld [vmem:[#allocation37_spill] sm:$0xff]  ;;  %v11758_v22 = vld [vmem:[#allocation42_spill] sm:$0xff] }
  0x7b   :  { %6723 = vmatprep.subr.bf16.mxu0 %v11610_v38  ;;  %v11757_v35 = vand.u32 4294901760, %v11756_v2  ;;  %v11768_v2 = vpack.c.bf16 %v8237_v45, %v8231_v58  ;;  %v8789_v45 = vld [vmem:[%s11121_s1 + $0x120] sm:$0xff]  ;;  %v8794_v58 = vld [vmem:[%s11121_s1 + $0x138] sm:$0xff] }
  0x7c   :  { %11745 = vst [vmem:[#allocation31_spill] sm:$0xff] %v8676_v15  ;;  %11746 = vst [vmem:[#allocation32_spill] sm:$0xff] %v8680_v41  ;;  %6626 = vmatpush1.bf16.msra.mxu1 %v8676_v15 }
  0x7d   :  { %1010 = vmatmul.mubr.f32.gmra.mrb[24].mxu0 %v8648_v46  ;;  %6627 = vmatprep.subr.bf16.mxu1 %v11610_v38  ;;  %11750 = vst [vmem:[#allocation114_spill] sm:$0xff] %v8700_v24  ;;  %11751 = vst [vmem:[#allocation115_spill] sm:$0xff] %v8704_v57 }
  0x7e   :  { %1015 = vmatprep.mubr.f32.mxu0 %v8652_v28  ;;  %6725 = vmatpush1.bf16.msra.mxu0 %v11748_v33  ;;  %v8709_v33 = vld [vmem:[%s11121_s1 + $0xf0] sm:$0xff]  ;;  %11777 = vst [vmem:[#allocation126_spill] sm:$0xff] %v8789_v45  ;;  %11778 = vst [vmem:[#allocation127_spill] sm:$0xff] %v8794_v58 }
  0x7f   :  { %6726 = vmatprep.subr.bf16.mxu0 %v11610_v38  ;;  %11752 = vst [vmem:[#allocation116_spill] sm:$0xff] %v8709_v33  ;;  %v8722_v49 = vand.u32 4294901760, %v8709_v33 }
  0x81   :  { %1017 = vmatmul.mubr.f32.gmra.mrb[26].mxu0 %v8670_v61  ;;  %11755 = vst [vmem:[#allocation118_spill] sm:$0xff] %v8722_v49 }
  0x82   :  { %1022 = vmatprep.mubr.f32.mxu0 %v8680_v41  ;;  %6728 = vmatpush1.bf16.msra.mxu0 %v11753_v23  ;;  %v11759_v41 = vand.u32 4294901760, %v11758_v22  ;;  %v8732_v23 = vand.u32 4294901760, %v8717_v51  ;;  %v8745_v22 = vld [vmem:[%s11121_s1 + $0x118] sm:$0xff] }
  0x83   :  { %6729 = vmatprep.subr.bf16.mxu0 %v11610_v38  ;;  %11764 = vst [vmem:[#allocation120_spill] sm:$0xff] %v8745_v22  ;;  %v11773_v51 = vld [vmem:[#allocation45_spill] sm:$0xff] }
  0x84   :  { %v8728_v48 = vpack.c.bf16 %v11759_v41, %v11757_v35  ;;  %11761 = vst [vmem:[#allocation42_spill] sm:$0xff] %v8732_v23  ;;  %v8752_v35 = vand.u32 4294901760, %v8737_v37  ;;  %v8761_v41 = vld [vmem:[%s11121_s1 + $0x110] sm:$0xff] }
  0x85   :  { %1024 = vmatmul.mubr.f32.gmra.mrb[28].mxu0 %v8700_v24  ;;  %11767 = vst [vmem:[#allocation123_spill] sm:$0xff] %v8761_v41  ;;  %v8774_v10 = vand.u32 4294901760, %v8761_v41  ;;  %v11786_v41 = vld [vmem:[#allocation51_spill] sm:$0xff] }
  0x86   :  { %11760 = vst [vmem:[#allocation37_spill] sm:$0xff] %v8728_v48  ;;  %1029 = vmatprep.mubr.f32.mxu0 %v8704_v57  ;;  %6731 = vmatpush1.bf16.msra.mxu0 %v11763_v5  ;;  %11765 = vst [vmem:[#allocation121_spill] sm:$0xff] %v8752_v35  ;;  %v8756_v5 = vand.u32 4294901760, %v8745_v22  ;;  %v11771_v22 = vld [vmem:[#allocation44_spill] sm:$0xff] }
  0x87   :  { %6732 = vmatprep.subr.bf16.mxu0 %v11610_v38  ;;  %6629 = vmatpush1.bf16.msra.mxu1 %v8728_v48  ;;  %11770 = vst [vmem:[#allocation125_spill] sm:$0xff] %v8774_v10  ;;  %v11772_v37 = vand.u32 4294901760, %v11771_v22  ;;  %v8814_v22 = vld [vmem:[%s11121_s1 + $0x148] sm:$0xff] }
  0x88   :  { %6630 = vmatprep.subr.bf16.mxu1 %v11610_v38  ;;  %11766 = vst [vmem:[#allocation122_spill] sm:$0xff] %v8756_v5  ;;  %11782 = vst [vmem:[#allocation131_spill] sm:$0xff] %v8814_v22 }
  0x89   :  { %1031 = vmatmul.mubr.f32.gmra.mrb[30].mxu0 %v8722_v49 }
  0x8a   :  { %1036 = vmatprep.mubr.f32.mxu0 %v8732_v23  ;;  %6734 = vmatpush1.bf16.msra.mxu0 %v11768_v2  ;;  %v11774_v23 = vand.u32 4294901760, %v11773_v51  ;;  %v8784_v2 = vand.u32 4294901760, %v8769_v27  ;;  %v8804_v51 = vand.u32 4294901760, %v8794_v58  ;;  %v11784_v27 = vld [vmem:[#allocation48_spill] sm:$0xff]  ;;  %v11787_v58 = vand.u32 4294901760, %v11786_v41 }
  0x8b   :  { %6735 = vmatprep.subr.bf16.mxu0 %v11610_v38  ;;  %v8853_v41 = vld [vmem:[%s11121_s1 + $0x150] sm:$0xff] }
  0x8c   :  { %v8780_v33 = vpack.c.bf16 %v11774_v23, %v11772_v37  ;;  %11776 = vst [vmem:[#allocation45_spill] sm:$0xff] %v8784_v2  ;;  %v8800_v37 = vand.u32 4294901760, %v8789_v45  ;;  %11780 = vst [vmem:[#allocation129_spill] sm:$0xff] %v8804_v51  ;;  %v8809_v23 = vld [vmem:[%s11121_s1 + $0x130] sm:$0xff] }
  0x8d   :  { %1038 = vmatmul.mubr.f32.gmra.mrb[32].mxu0 %v8752_v35  ;;  %11781 = vst [vmem:[#allocation130_spill] sm:$0xff] %v8809_v23  ;;  %v8818_v45 = vand.u32 4294901760, %v8809_v23  ;;  %v8833_v35 = vld [vmem:[%s11121_s1 + $0x140] sm:$0xff]  ;;  %v8838_v23 = vld [vmem:[%s11121_s1 + $0x158] sm:$0xff]  ;;  %11794 = vst [vmem:[#allocation137_spill] sm:$0xff] %v8853_v41 }
  0x8e   :  { %11775 = vst [vmem:[#allocation44_spill] sm:$0xff] %v8780_v33  ;;  %1043 = vmatprep.mubr.f32.mxu0 %v8756_v5  ;;  %6632 = vmatpush1.bf16.msra.mxu1 %v8780_v33  ;;  %11779 = vst [vmem:[#allocation128_spill] sm:$0xff] %v8800_v37  ;;  %v8828_v5 = vand.u32 4294901760, %v8814_v22  ;;  %v11796_v22 = vld [vmem:[#allocation55_spill] sm:$0xff] }
  0x8f   :  { %6633 = vmatprep.subr.bf16.mxu1 %v11610_v38  ;;  %11783 = vst [vmem:[#allocation132_spill] sm:$0xff] %v8818_v45  ;;  %11790 = vst [vmem:[#allocation133_spill] sm:$0xff] %v8833_v35 }
  0x90   :  { %11789 = vst [vmem:[#allocation51_spill] sm:$0xff] %v8828_v5  ;;  %11791 = vst [vmem:[#allocation134_spill] sm:$0xff] %v8838_v23 }
  0x91   :  { %1045 = vmatmul.mubr.f32.gmra.mrb[34].mxu0 %v8774_v10 }
  0x92   :  { %1050 = vmatprep.mubr.f32.mxu0 %v8784_v2  ;;  %v11785_v2 = vand.u32 4294901760, %v11784_v27  ;;  %v8844_v27 = vand.u32 4294901760, %v8833_v35 }
  0x94   :  { %v8824_v10 = vpack.c.bf16 %v11787_v58, %v11785_v2  ;;  %11792 = vst [vmem:[#allocation135_spill] sm:$0xff] %v8844_v27  ;;  %v8848_v58 = vand.u32 4294901760, %v8838_v23  ;;  %v8857_v2 = vand.u32 4294901760, %v8853_v41  ;;  %v11801_v23 = vld [vmem:[#allocation52_spill] sm:$0xff]  ;;  %v8874_v41 = vsub.f32 %v8306_v4, %v8322_v52 }
  0x95   :  { %1052 = vmatmul.mubr.f32.gmra.mrb[36].mxu0 %v8800_v37  ;;  %v8891_v4 = vsub.f32 %v8344_v0, %v8357_v14  ;;  %v8909_v0 = vsub.f32 %v8392_v3, %v8409_v29  ;;  %v8926_v3 = vsub.f32 %v8434_v44, %v8447_v53  ;;  %v8945_v44 = vsub.f32 %v8480_v16, %v8492_v17  ;;  %v11805_v16 = vld [vmem:[#allocation21_spill] sm:$0xff]  ;;  %v11842_v53 = vld [vmem:[#allocation127_spill] sm:$0xff]  ;;  %v76_v14 = vld [vmem:[%s11121_s1 + $0x190] sm:$0xff] }
  0x96   :  { %11788 = vst [vmem:[#allocation48_spill] sm:$0xff] %v8824_v10  ;;  %1057 = vmatprep.mubr.f32.mxu0 %v8804_v51  ;;  %6635 = vmatpush1.bf16.msra.mxu1 %v8824_v10  ;;  %11793 = vst [vmem:[#allocation136_spill] sm:$0xff] %v8848_v58  ;;  %v11798_v51 = vld [vmem:[#allocation57_spill] sm:$0xff]  ;;  %v80_v52 = vld [vmem:[%s11121_s1 + $0x1b0] sm:$0xff] }
  0x97   :  { %6636 = vmatprep.subr.bf16.mxu1 %v11610_v38  ;;  %11795 = vst [vmem:[#allocation138_spill] sm:$0xff] %v8857_v2  ;;  %v11799_v35 = vand.u32 4294901760, %v11798_v51  ;;  %v11804_v51 = vld [vmem:[#allocation79_spill] sm:$0xff] }
  0x99   :  { %1059 = vmatmul.mubr.f32.gmra.mrb[38].mxu0 %v8818_v45  ;;  %v11797_v45 = vand.u32 4294901760, %v11796_v22  ;;  %v11806_v22 = vld [vmem:[#allocation91_spill] sm:$0xff] }
  0x9a   :  { %1064 = vmatprep.mubr.f32.mxu0 %v8828_v5  ;;  %v11802_v5 = vld [vmem:[#allocation46_spill] sm:$0xff]  ;;  %v8962_v17 = vsub.f32 %v11806_v22, %v11805_v16  ;;  %v8981_v22 = vsub.f32 %v8553_v56, %v8566_v42  ;;  %v11815_v56 = vld [vmem:[#allocation100_spill] sm:$0xff] }
  0x9b   :  { %v8863_v37 = vpack.c.bf16 %v11799_v35, %v11797_v45  ;;  %v8868_v10 = vsub.f32 %v11802_v5, %v11801_v23  ;;  %v8880_v45 = vsub.f32 %v8318_v11, %v8327_v8  ;;  %v8885_v35 = vsub.f32 %v8332_v9, %v8349_v7  ;;  %v79_v7 = vld [vmem:[%s11121_s1 + $0x1a8] sm:$0xff]  ;;  %v78_v8 = vld [vmem:[%s11121_s1 + $0x1a0] sm:$0xff] }
  0x9c   :  { %v8897_v11 = vsub.f32 %v8362_v1, %v8379_v13  ;;  %v8903_v9 = vsub.f32 %v8374_v25, %v8387_v40  ;;  %v8914_v1 = vsub.f32 %v8404_v39, %v8417_v47  ;;  %v8921_v25 = vsub.f32 %v8422_v31, %v8439_v21  ;;  %v75_v40 = vld [vmem:[%s11121_s1 + $0x188] sm:$0xff]  ;;  %v74_v13 = vld [vmem:[%s11121_s1 + $0x180] sm:$0xff] }
  0x9d   :  { %1066 = vmatmul.mubr.f32.gmra.mrb[40].mxu0 %v8844_v27  ;;  %11800 = vst [vmem:[#allocation55_spill] sm:$0xff] %v8863_v37  ;;  %6638 = vmatpush1.bf16.msra.mxu1 %v8863_v37  ;;  %v8933_v39 = vsub.f32 %v8452_v18, %v8462_v30  ;;  %v8938_v31 = vsub.f32 %v8458_v6, %v8472_v19  ;;  %v11803_v18 = vld [vmem:[#allocation88_spill] sm:$0xff]  ;;  %v11807_v19 = vld [vmem:[#allocation82_spill] sm:$0xff]  ;;  %v83_v23 = vld [vmem:[%s11121_s1 + $0x1c8] sm:$0xff] }
  0x9e   :  { %1071 = vmatprep.mubr.f32.mxu0 %v8848_v58  ;;  %6927 = vmatprep.subr.bf16.mxu1 %v11610_v38  ;;  %v8950_v5 = vsub.f32 %v11803_v18, %v8496_v26  ;;  %v8957_v6 = vsub.f32 %v8501_v63, %v8514_v59  ;;  %v11808_v18 = vld [vmem:[#allocation93_spill] sm:$0xff]  ;;  %v11809_v63 = vld [vmem:[#allocation94_spill] sm:$0xff]  ;;  %v8998_v42 = vsub.f32 %v11815_v56, %v8600_v36 }
  0x9f   :  { %v8969_v26 = vsub.f32 %v11808_v18, %v8544_v20  ;;  %v8974_v59 = vsub.f32 %v11809_v63, %v8548_v32  ;;  %v11811_v18 = vld [vmem:[#allocation25_spill] sm:$0xff]  ;;  %v11814_v63 = vld [vmem:[#allocation99_spill] sm:$0xff] }
  0xa0   :  { %v11812_v20 = vld [vmem:[#allocation97_spill] sm:$0xff]  ;;  %v8993_v32 = vsub.f32 %v11814_v63, %v8596_v60  ;;  %v11817_v63 = vld [vmem:[#allocation30_spill] sm:$0xff]  ;;  %v11818_v60 = vld [vmem:[#allocation103_spill] sm:$0xff] }
  0xa1   :  { %1073 = vmatmul.mubr.f32.gmra.mrb[42].mxu0 %v8857_v2  ;;  %v8986_v16 = vsub.f32 %v11812_v20, %v11811_v18  ;;  %v9005_v20 = vsub.f32 %v8605_v54, %v8618_v50  ;;  %v9010_v18 = vsub.f32 %v11818_v60, %v11817_v63  ;;  %v11820_v56 = vld [vmem:[#allocation105_spill] sm:$0xff]  ;;  %v11821_v54 = vld [vmem:[#allocation106_spill] sm:$0xff] }
  0xa2   :  { %1278 = vmatprep.mubr.f32.mxu0 %v8868_v10  ;;  %v9017_v36 = vsub.f32 %v11820_v56, %v8648_v46  ;;  %v9022_v50 = vsub.f32 %v11821_v54, %v8652_v28  ;;  %v11822_v60 = vld [vmem:[#allocation109_spill] sm:$0xff]  ;;  %v11823_v56 = vld [vmem:[#allocation32_spill] sm:$0xff]  ;;  %v11824_v46 = vld [vmem:[#allocation110_spill] sm:$0xff] }
  0xa3   :  { %v9029_v63 = vsub.f32 %v11822_v60, %v8670_v61  ;;  %v11825_v54 = vld [vmem:[#allocation112_spill] sm:$0xff]  ;;  %v11826_v60 = vld [vmem:[#allocation113_spill] sm:$0xff] }
  0xa4   :  { %v9041_v28 = vsub.f32 %v11825_v54, %v8700_v24  ;;  %v9046_v61 = vsub.f32 %v11826_v60, %v8704_v57  ;;  %v11828_v54 = vld [vmem:[#allocation42_spill] sm:$0xff]  ;;  %v11829_v24 = vld [vmem:[#allocation117_spill] sm:$0xff]  ;;  %v11832_v57 = vld [vmem:[#allocation119_spill] sm:$0xff] }
  0xa5   :  { %1281 = vmatmul.mubr.f32.vlgmr.msra.gmra.mrb[0].mxu0 %v8874_v41  ;;  %v11831_v60 = vld [vmem:[#allocation121_spill] sm:$0xff] }
  0xa6   :  { %6737 = vmatpush1.bf16.msra.mxu0 %v8283_v34  ;;  %1287 = vmatprep.mubr.f32.mxu0 %v8880_v45  ;;  %v81_v34 = vld [vmem:[%s11121_s1 + $0x1b8] sm:$0xff] }
  0xa7   :  { %6738 = vmatprep.subr.bf16.mxu0 %v11610_v38 }
  0xa9   :  { %1290 = vmatmul.mubr.f32.gmra.mrb[2].mxu0 %v8885_v35 }
  0xaa   :  { %1296 = vmatprep.mubr.f32.mxu0 %v8891_v4  ;;  %6740 = vmatpush1.bf16.msra.mxu0 %v8295_v62  ;;  %v77_v62 = vld [vmem:[%s11121_s1 + $0x198] sm:$0xff] }
  0xab   :  { %6741 = vmatprep.subr.bf16.mxu0 %v11610_v38 }
  0xad   :  { %1299 = vmatmul.mubr.f32.gmra.mrb[4].mxu0 %v8897_v11 }
  0xae   :  { %1305 = vmatprep.mubr.f32.mxu0 %v8903_v9  ;;  %6743 = vmatpush1.bf16.msra.mxu0 %v8312_v55  ;;  %v72_v55 = vld [vmem:[%s11121_s1 + $0x170] sm:$0xff] }
  0xaf   :  { %6744 = vmatprep.subr.bf16.mxu0 %v11610_v38 }
  0xb1   :  { %1308 = vmatmul.mubr.f32.gmra.mrb[6].mxu0 %v8909_v0 }
  0xb2   :  { %1314 = vmatprep.mubr.f32.mxu0 %v8914_v1  ;;  %6746 = vmatpush1.bf16.msra.mxu0 %v8338_v12 }
  0xb3   :  { %6747 = vmatprep.subr.bf16.mxu0 %v11610_v38 }
  0xb5   :  { %1317 = vmatmul.mubr.f32.gmra.mrb[8].mxu0 %v8921_v25 }
  0xb6   :  { %1323 = vmatprep.mubr.f32.mxu0 %v8926_v3  ;;  %6749 = vmatpush1.bf16.msra.mxu0 %v8368_v43 }
  0xb7   :  { %6750 = vmatprep.subr.bf16.mxu0 %v11610_v38 }
  0xb9   :  { %1326 = vmatmul.mubr.f32.gmra.mrb[10].mxu0 %v8933_v39 }
  0xba   :  { %1332 = vmatprep.mubr.f32.mxu0 %v8938_v31  ;;  %6752 = vmatpush1.bf16.msra.mxu0 %v11804_v51  ;;  %v11810_v51 = vld [vmem:[#allocation86_spill] sm:$0xff] }
  0xbb   :  { %6753 = vmatprep.subr.bf16.mxu0 %v11610_v38 }
  0xbd   :  { %1335 = vmatmul.mubr.f32.gmra.mrb[12].mxu0 %v8945_v44 }
  0xbe   :  { %1341 = vmatprep.mubr.f32.mxu0 %v8950_v5  ;;  %6755 = vmatpush1.bf16.msra.mxu0 %v11807_v19  ;;  %v11813_v19 = vld [vmem:[#allocation19_spill] sm:$0xff] }
  0xbf   :  { %6756 = vmatprep.subr.bf16.mxu0 %v11610_v38 }
  0xc1   :  { %1344 = vmatmul.mubr.f32.gmra.mrb[14].mxu0 %v8957_v6 }
  0xc2   :  { %1350 = vmatprep.mubr.f32.mxu0 %v8962_v17  ;;  %6758 = vmatpush1.bf16.msra.mxu0 %v11810_v51  ;;  %v11816_v51 = vld [vmem:[#allocation24_spill] sm:$0xff] }
  0xc3   :  { %6759 = vmatprep.subr.bf16.mxu0 %v11610_v38 }
  0xc5   :  { %1353 = vmatmul.mubr.f32.gmra.mrb[16].mxu0 %v8969_v26 }
  0xc6   :  { %1359 = vmatprep.mubr.f32.mxu0 %v8974_v59  ;;  %6761 = vmatpush1.bf16.msra.mxu0 %v11813_v19  ;;  %v11819_v19 = vld [vmem:[#allocation29_spill] sm:$0xff] }
  0xc7   :  { %6762 = vmatprep.subr.bf16.mxu0 %v11610_v38 }
  0xc9   :  { %1362 = vmatmul.mubr.f32.gmra.mrb[18].mxu0 %v8981_v22 }
  0xca   :  { %1368 = vmatprep.mubr.f32.mxu0 %v8986_v16  ;;  %6764 = vmatpush1.bf16.msra.mxu0 %v11816_v51 }
  0xcb   :  { %6765 = vmatprep.subr.bf16.mxu0 %v11610_v38 }
  0xcd   :  { %1371 = vmatmul.mubr.f32.gmra.mrb[20].mxu0 %v8993_v32 }
  0xce   :  { %1377 = vmatprep.mubr.f32.mxu0 %v8998_v42  ;;  %6767 = vmatpush1.bf16.msra.mxu0 %v11819_v19  ;;  %v9034_v19 = vsub.f32 %v11824_v46, %v11823_v56  ;;  %v11827_v46 = vld [vmem:[#allocation116_spill] sm:$0xff] }
  0xcf   :  { %6768 = vmatprep.subr.bf16.mxu0 %v11610_v38  ;;  %v9053_v56 = vsub.f32 %v11827_v46, %v8722_v49  ;;  %v11833_v46 = vld [vmem:[#allocation122_spill] sm:$0xff]  ;;  %v11834_v49 = vld [vmem:[#allocation120_spill] sm:$0xff] }
  0xd0   :  { %v9070_v51 = vsub.f32 %v11834_v49, %v11833_v46  ;;  %v11839_v49 = vld [vmem:[#allocation128_spill] sm:$0xff]  ;;  %v11840_v46 = vld [vmem:[#allocation126_spill] sm:$0xff] }
  0xd1   :  { %1380 = vmatmul.mubr.f32.gmra.mrb[22].mxu0 %v9005_v20  ;;  %v9087_v43 = vsub.f32 %v11840_v46, %v11839_v49  ;;  %v71_v46 = vld [vmem:[%s11121_s1 + $0x168] sm:$0xff] }
  0xd2   :  { %1386 = vmatprep.mubr.f32.mxu0 %v9010_v18  ;;  %6770 = vmatpush1.bf16.msra.mxu0 %v8676_v15  ;;  %v11830_v15 = vld [vmem:[#allocation48_spill] sm:$0xff]  ;;  %v9117_v49 = vand.u32 4294901760, %v71_v46 }
  0xd3   :  { %6771 = vmatprep.subr.bf16.mxu0 %v11610_v38 }
  0xd4   :  { %11849 = vst [vmem:[#allocation57_spill] sm:$0xff] %v9117_v49 }
  0xd5   :  { %1389 = vmatmul.mubr.f32.gmra.mrb[24].mxu0 %v9017_v36 }
  0xd6   :  { %1395 = vmatprep.mubr.f32.mxu0 %v9022_v50  ;;  %6773 = vmatpush1.bf16.msra.mxu0 %v8728_v48  ;;  %v9058_v48 = vsub.f32 %v11829_v24, %v11828_v54  ;;  %v11835_v24 = vld [vmem:[#allocation125_spill] sm:$0xff]  ;;  %v11836_v54 = vld [vmem:[#allocation123_spill] sm:$0xff] }
  0xd7   :  { %6774 = vmatprep.subr.bf16.mxu0 %v11610_v38 }
  0xd9   :  { %1398 = vmatmul.mubr.f32.gmra.mrb[26].mxu0 %v9029_v63 }
  0xda   :  { %1404 = vmatprep.mubr.f32.mxu0 %v9034_v19  ;;  %6776 = vmatpush1.bf16.msra.mxu0 %v8780_v33  ;;  %v9065_v33 = vsub.f32 %v11832_v57, %v11831_v60  ;;  %v11837_v57 = vld [vmem:[#allocation45_spill] sm:$0xff]  ;;  %v11838_v60 = vld [vmem:[#allocation124_spill] sm:$0xff] }
  0xdb   :  { %6777 = vmatprep.subr.bf16.mxu0 %v11610_v38  ;;  %v9082_v30 = vsub.f32 %v11838_v60, %v11837_v57  ;;  %v11845_v60 = vld [vmem:[#allocation51_spill] sm:$0xff] }
  0xdc   :  { %v11846_v57 = vld [vmem:[#allocation131_spill] sm:$0xff] }
  0xdd   :  { %1407 = vmatmul.mubr.f32.gmra.mrb[28].mxu0 %v9041_v28  ;;  %v9102_v47 = vsub.f32 %v11846_v57, %v11845_v60  ;;  %v70_v57 = vld [vmem:[%s11121_s1 + $0x160] sm:$0xff]  ;;  %v73_v60 = vld [vmem:[%s11121_s1 + $0x178] sm:$0xff] }
  0xde   :  { %1413 = vmatprep.mubr.f32.mxu0 %v9046_v61  ;;  %6779 = vmatpush1.bf16.msra.mxu0 %v11830_v15  ;;  %v9077_v15 = vsub.f32 %v11836_v54, %v11835_v24  ;;  %v11843_v54 = vld [vmem:[#allocation132_spill] sm:$0xff]  ;;  %v11844_v24 = vld [vmem:[#allocation130_spill] sm:$0xff]  ;;  %v9130_v29 = vand.u32 4294901760, %v70_v57 }
  0xdf   :  { %6780 = vmatprep.subr.bf16.mxu0 %v11610_v38  ;;  %v9097_v12 = vsub.f32 %v11844_v24, %v11843_v54  ;;  %v11848_v24 = vld [vmem:[#allocation134_spill] sm:$0xff] }
  0xe0   :  { %v9115_v54 = vsub.f32 %v11848_v24, %v8848_v58  ;;  %11851 = vst [vmem:[#allocation46_spill] sm:$0xff] %v9130_v29  ;;  %v9134_v24 = vsub.f32 %v71_v46, %v9117_v49  ;;  %v9136_v58 = vand.u32 4294901760, %v73_v60  ;;  %v9154_v49 = vand.u32 4294901760, %v75_v40 }
  0xe1   :  { %1416 = vmatmul.mubr.f32.gmra.mrb[30].mxu0 %v9053_v56 }
  0xe2   :  { %1422 = vmatprep.mubr.f32.mxu0 %v9058_v48  ;;  %6782 = vmatpush1.bf16.msra.mxu0 %v8863_v37  ;;  %v11841_v37 = vld [vmem:[#allocation129_spill] sm:$0xff]  ;;  %11852 = vst [vmem:[#allocation88_spill] sm:$0xff] %v9136_v58  ;;  %v9152_v46 = vsub.f32 %v73_v60, %v9136_v58  ;;  %11854 = vst [vmem:[#allocation93_spill] sm:$0xff] %v9154_v49  ;;  %v9170_v60 = vsub.f32 %v75_v40, %v9154_v49  ;;  %v9172_v58 = vand.u32 4294901760, %v77_v62 }
  0xe3   :  { %6783 = vmatprep.subr.bf16.mxu0 %v11610_v38  ;;  %v9092_v21 = vsub.f32 %v11842_v53, %v11841_v37  ;;  %v11847_v53 = vld [vmem:[#allocation133_spill] sm:$0xff]  ;;  %v9190_v49 = vand.u32 4294901760, %v79_v7 }
  0xe4   :  { %v9110_v37 = vsub.f32 %v11847_v53, %v8844_v27  ;;  %v11850_v53 = vld [vmem:[#allocation137_spill] sm:$0xff]  ;;  %11856 = vst [vmem:[#allocation97_spill] sm:$0xff] %v9172_v58  ;;  %v9188_v40 = vsub.f32 %v77_v62, %v9172_v58  ;;  %v9208_v58 = vand.u32 4294901760, %v81_v34 }
  0xe5   :  { %1425 = vmatmul.mubr.f32.gmra.mrb[32].mxu0 %v9065_v33  ;;  %v9128_v27 = vsub.f32 %v11850_v53, %v8857_v2  ;;  %v9146_v53 = vsub.f32 %v70_v57, %v9130_v29  ;;  %v9148_v2 = vand.u32 4294901760, %v72_v55  ;;  %v9166_v29 = vand.u32 4294901760, %v74_v13  ;;  %11860 = vst [vmem:[#allocation105_spill] sm:$0xff] %v9190_v49 }
  0xe6   :  { %1431 = vmatprep.mubr.f32.mxu0 %v9070_v51  ;;  %11859 = vst [vmem:[#allocation103_spill] sm:$0xff] %v9188_v40  ;;  %v9206_v62 = vsub.f32 %v79_v7, %v9190_v49  ;;  %11864 = vst [vmem:[#allocation112_spill] sm:$0xff] %v9208_v58  ;;  %v9224_v7 = vsub.f32 %v81_v34, %v9208_v58  ;;  %v9226_v49 = vand.u32 4294901760, %v83_v23 }
  0xe7   :  { %11853 = vst [vmem:[#allocation91_spill] sm:$0xff] %v9148_v2  ;;  %v9164_v57 = vsub.f32 %v72_v55, %v9148_v2  ;;  %11855 = vst [vmem:[#allocation94_spill] sm:$0xff] %v9166_v29  ;;  %v9182_v55 = vsub.f32 %v74_v13, %v9166_v29  ;;  %v9184_v2 = vand.u32 4294901760, %v76_v14  ;;  %v9202_v29 = vand.u32 4294901760, %v78_v8 }
  0xe8   :  { %11863 = vst [vmem:[#allocation110_spill] sm:$0xff] %v9206_v62  ;;  %11867 = vst [vmem:[#allocation117_spill] sm:$0xff] %v9224_v7  ;;  %v9242_v34 = vsub.f32 %v83_v23, %v9226_v49 }
  0xe9   :  { %1434 = vmatmul.mubr.f32.gmra.mrb[34].mxu0 %v9077_v15  ;;  %11857 = vst [vmem:[#allocation99_spill] sm:$0xff] %v9182_v55  ;;  %11858 = vst [vmem:[#allocation100_spill] sm:$0xff] %v9184_v2  ;;  %v9200_v13 = vsub.f32 %v76_v14, %v9184_v2  ;;  %v9218_v14 = vsub.f32 %v78_v8, %v9202_v29  ;;  %v9220_v2 = vand.u32 4294901760, %v80_v52 }
  0xea   :  { %1440 = vmatprep.mubr.f32.mxu0 %v9082_v30  ;;  %11862 = vst [vmem:[#allocation109_spill] sm:$0xff] %v9202_v29  ;;  %11868 = vst [vmem:[#allocation119_spill] sm:$0xff] %v9226_v49 }
  0xeb   :  { %11861 = vst [vmem:[#allocation106_spill] sm:$0xff] %v9200_v13  ;;  %11865 = vst [vmem:[#allocation113_spill] sm:$0xff] %v9218_v14  ;;  %v9236_v8 = vsub.f32 %v80_v52, %v9220_v2 }
  0xec   :  { %11866 = vst [vmem:[#allocation116_spill] sm:$0xff] %v9220_v2  ;;  %11871 = vst [vmem:[#allocation124_spill] sm:$0xff] %v9242_v34 }
  0xed   :  { %1443 = vmatmul.mubr.f32.gmra.mrb[36].mxu0 %v9087_v43  ;;  %11869 = vst [vmem:[#allocation120_spill] sm:$0xff] %v9236_v8 }
  0xee   :  { %1449 = vmatprep.mubr.f32.mxu0 %v9092_v21 }
  0xf1   :  { %1452 = vmatmul.mubr.f32.gmra.mrb[38].mxu0 %v9097_v12 }
  0xf2   :  { %1458 = vmatprep.mubr.f32.mxu0 %v9102_v47 }
  0xf5   :  { %1461 = vmatmul.mubr.f32.gmra.mrb[40].mxu0 %v9110_v37 }
  0xf6   :  { %1467 = vmatprep.mubr.f32.mxu0 %v9115_v54 }
  0xf9   :  { %1470 = vmatmul.mubr.f32.gmra.mrb[42].mxu0 %v9128_v27 }
  0xfa   :  { %1476 = vmatprep.mubr.f32.mxu0 %v9134_v24 }
  0xfd   :  { %1479 = vmatmul.mubr.f32.gmra.mrb[44].mxu0 %v9146_v53 }
  0xfe   :  { %1485 = vmatprep.mubr.f32.mxu0 %v9152_v46 }
 0x101   :  { %1488 = vmatmul.mubr.f32.gmra.mrb[46].mxu0 %v9164_v57 }
 0x102   :  { %1494 = vmatprep.mubr.f32.mxu0 %v9170_v60 }
 0x105   :  { %1497 = vmatmul.mubr.f32.gmra.mrb[48].mxu0 %v9182_v55 }
 0x106   :  { %1503 = vmatprep.mubr.f32.mxu0 %v9188_v40  ;;  %v82_v40 = vld [vmem:[%s11121_s1 + $0x1c0] sm:$0xff] }
 0x107   :  { %v9238_v29 = vand.u32 4294901760, %v82_v40 }
 0x109   :  { %1506 = vmatmul.mubr.f32.gmra.mrb[50].mxu0 %v9200_v13  ;;  %v85_v13 = vld [vmem:[%s11121_s1 + $0x1d8] sm:$0xff]  ;;  %11870 = vst [vmem:[#allocation123_spill] sm:$0xff] %v9238_v29  ;;  %v9254_v52 = vsub.f32 %v82_v40, %v9238_v29 }
 0x10a   :  { %1512 = vmatprep.mubr.f32.mxu0 %v9206_v62  ;;  %v9244_v58 = vand.u32 4294901760, %v85_v13  ;;  %v84_v62 = vld [vmem:[%s11121_s1 + $0x1d0] sm:$0xff] }
 0x10b   :  { %11873 = vst [vmem:[#allocation127_spill] sm:$0xff] %v9254_v52  ;;  %v9256_v2 = vand.u32 4294901760, %v84_v62 }
 0x10c   :  { %11872 = vst [vmem:[#allocation126_spill] sm:$0xff] %v9244_v58  ;;  %v9260_v23 = vsub.f32 %v85_v13, %v9244_v58 }
 0x10d   :  { %1515 = vmatmul.mubr.f32.gmra.mrb[52].mxu0 %v9218_v14  ;;  %v87_v14 = vld [vmem:[%s11121_s1 + $0x1e8] sm:$0xff]  ;;  %11874 = vst [vmem:[#allocation130_spill] sm:$0xff] %v9256_v2  ;;  %v9272_v40 = vsub.f32 %v84_v62, %v9256_v2 }
 0x10e   :  { %1521 = vmatprep.mubr.f32.mxu0 %v9224_v7  ;;  %11875 = vst [vmem:[#allocation131_spill] sm:$0xff] %v9260_v23  ;;  %v9262_v49 = vand.u32 4294901760, %v87_v14  ;;  %v86_v7 = vld [vmem:[%s11121_s1 + $0x1e0] sm:$0xff] }
 0x10f   :  { %11877 = vst [vmem:[#allocation134_spill] sm:$0xff] %v9272_v40  ;;  %v9274_v29 = vand.u32 4294901760, %v86_v7 }
 0x110   :  { %11876 = vst [vmem:[#allocation133_spill] sm:$0xff] %v9262_v49  ;;  %v9278_v13 = vsub.f32 %v87_v14, %v9262_v49  ;;  %v11438_v49 = vand.u32 4294901760, %v8868_v10 }
 0x111   :  { %1524 = vmatmul.mubr.f32.gmra.mrb[54].mxu0 %v9236_v8  ;;  %v89_v8 = vld [vmem:[%s11121_s1 + $0x1f8] sm:$0xff]  ;;  %11878 = vst [vmem:[#allocation137_spill] sm:$0xff] %v9274_v29 }
 0x112   :  { %1530 = vmatprep.mubr.f32.mxu0 %v9242_v34  ;;  %11879 = vst [vmem:[#allocation139_spill] sm:$0xff] %v9278_v13  ;;  %v9280_v58 = vand.u32 4294901760, %v89_v8  ;;  %v88_v34 = vld [vmem:[%s11121_s1 + $0x1f0] sm:$0xff] }
 0x113   :  { %v9289_v62 = vand.u32 4294901760, %v88_v34 }
 0x114   :  { %11880 = vst [vmem:[#allocation140_spill] sm:$0xff] %v9280_v58  ;;  %v9293_v2 = vsub.f32 %v89_v8, %v9280_v58  ;;  %v11887_v8 = vld [vmem:[#allocation3_spill] sm:$0xff] }
 0x115   :  { %1533 = vmatmul.mubr.f32.gmra.mrb[56].mxu0 %v9254_v52  ;;  %v9287_v52 = vsub.f32 %v86_v7, %v9274_v29  ;;  %11882 = vst [vmem:[#allocation142_spill] sm:$0xff] %v9289_v62  ;;  %v9297_v14 = vsub.f32 %v88_v34, %v9289_v62  ;;  %v11444_v7 = vand.u32 4294901760, %v8874_v41  ;;  %v11885_v29 = vld [vmem:[#allocation2_spill] sm:$0xff]  ;;  %v11888_v58 = vand.u32 4294901760, %v11887_v8 }
 0x116   :  { %1539 = vmatprep.mubr.f32.mxu0 %v9260_v23  ;;  %11883 = vst [vmem:[#allocation143_spill] sm:$0xff] %v9293_v2  ;;  %v11446_v34 = vand.u32 4294901760, %v8885_v35  ;;  %v11445_v62 = vand.u32 4294901760, %v8891_v4 }
 0x117   :  { %11881 = vst [vmem:[#allocation141_spill] sm:$0xff] %v9287_v52  ;;  %11884 = vst [vmem:[#allocation144_spill] sm:$0xff] %v9297_v14 }
 0x119   :  { %1542 = vmatmul.mubr.f32.gmra.mrb[58].mxu0 %v9272_v40 }
 0x11a   :  { %1548 = vmatprep.mubr.f32.mxu0 %v9278_v13  ;;  %v11886_v13 = vand.u32 4294901760, %v11885_v29 }
 0x11c   :  { %v6784_v40 = vpack.c.bf16 %v11888_v58, %v11886_v13  ;;  %v11448_v58 = vand.u32 4294901760, %v8897_v11  ;;  %v11893_v13 = vld [vmem:[#allocation6_spill] sm:$0xff] }
 0x11d   :  { %1551 = vmatmul.mubr.f32.gmra.mrb[60].mxu0 %v9287_v52  ;;  %v11443_v52 = vand.u32 4294901760, %v8880_v45  ;;  %v11894_v8 = vand.u32 4294901760, %v11893_v13 }
 0x11e   :  { %1557 = vmatprep.mubr.f32.mxu0 %v9293_v2  ;;  %v11891_v2 = vld [vmem:[#allocation5_spill] sm:$0xff] }
 0x11f   :  { %v11892_v29 = vand.u32 4294901760, %v11891_v2  ;;  %v11450_v2 = vand.u32 4294901760, %v8909_v0 }
 0x121   :  { %1560 = vmatmul.mubr.f32.gmra.mrb[62].mxu0 %v9297_v14  ;;  %v11889_v14 = vld [vmem:[#allocation4_spill] sm:$0xff] }
 0x122   :  { %1664 = vmatprep.mubr.f32.mxu0 %v11438_v49  ;;  %v11890_v49 = vand.u32 4294901760, %v11889_v14 }
 0x124   :  { %v6787_v23 = vpack.c.bf16 %v11892_v29, %v11890_v49  ;;  %v11449_v49 = vand.u32 4294901760, %v8914_v1 }
 0x125   :  { %1668 = vmatmul.mubr.f32.vlgmr.msra.gmra.mrb[0].mxu0 %v11444_v7 }
 0x126   :  { %6785 = vmatpush1.bf16.msra.mxu0 %v6784_v40  ;;  %1675 = vmatprep.mubr.f32.mxu0 %v11443_v52  ;;  %v11447_v40 = vand.u32 4294901760, %v8903_v9  ;;  %v11895_v52 = vld [vmem:[#allocation7_spill] sm:$0xff] }
 0x127   :  { %6786 = vmatprep.subr.bf16.mxu0 %v11610_v38  ;;  %v11896_v14 = vand.u32 4294901760, %v11895_v52  ;;  %v11452_v52 = vand.u32 4294901760, %v8921_v25 }
 0x129   :  { %1679 = vmatmul.mubr.f32.gmra.mrb[2].mxu0 %v11446_v34  ;;  %v6790_v7 = vpack.c.bf16 %v11896_v14, %v11894_v8  ;;  %v11451_v8 = vand.u32 4294901760, %v8926_v3  ;;  %v11901_v14 = vld [vmem:[#allocation12_spill] sm:$0xff] }
 0x12a   :  { %1686 = vmatprep.mubr.f32.mxu0 %v11445_v62  ;;  %6788 = vmatpush1.bf16.msra.mxu0 %v6787_v23  ;;  %v11897_v23 = vld [vmem:[#allocation8_spill] sm:$0xff]  ;;  %v11899_v62 = vld [vmem:[#allocation9_spill] sm:$0xff] }
 0x12b   :  { %6789 = vmatprep.subr.bf16.mxu0 %v11610_v38  ;;  %v11898_v29 = vand.u32 4294901760, %v11897_v23  ;;  %v11900_v13 = vand.u32 4294901760, %v11899_v62  ;;  %v11454_v62 = vand.u32 4294901760, %v8933_v39 }
 0x12d   :  { %1690 = vmatmul.mubr.f32.gmra.mrb[4].mxu0 %v11448_v58  ;;  %v6793_v34 = vpack.c.bf16 %v11900_v13, %v11898_v29  ;;  %v11453_v29 = vand.u32 4294901760, %v8938_v31  ;;  %v11905_v13 = vld [vmem:[#allocation14_spill] sm:$0xff] }
 0x12e   :  { %1697 = vmatprep.mubr.f32.mxu0 %v11447_v40  ;;  %6791 = vmatpush1.bf16.msra.mxu0 %v6790_v7  ;;  %v11902_v7 = vand.u32 4294901760, %v11901_v14  ;;  %v11903_v40 = vld [vmem:[#allocation13_spill] sm:$0xff] }
 0x12f   :  { %6792 = vmatprep.subr.bf16.mxu0 %v11610_v38  ;;  %v11904_v23 = vand.u32 4294901760, %v11903_v40  ;;  %v11456_v40 = vand.u32 4294901760, %v8945_v44 }
 0x131   :  { %1701 = vmatmul.mubr.f32.gmra.mrb[6].mxu0 %v11450_v2  ;;  %v6796_v58 = vpack.c.bf16 %v11904_v23, %v11902_v7  ;;  %v11455_v7 = vand.u32 4294901760, %v8950_v5  ;;  %v11909_v23 = vld [vmem:[#allocation16_spill] sm:$0xff] }
 0x132   :  { %1708 = vmatprep.mubr.f32.mxu0 %v11449_v49  ;;  %6794 = vmatpush1.bf16.msra.mxu0 %v6793_v34  ;;  %v11906_v34 = vand.u32 4294901760, %v11905_v13  ;;  %v11907_v49 = vld [vmem:[#allocation15_spill] sm:$0xff] }
 0x133   :  { %6795 = vmatprep.subr.bf16.mxu0 %v11610_v38  ;;  %v11908_v14 = vand.u32 4294901760, %v11907_v49  ;;  %v11458_v49 = vand.u32 4294901760, %v8957_v6 }
 0x135   :  { %1712 = vmatmul.mubr.f32.gmra.mrb[8].mxu0 %v11452_v52  ;;  %v6799_v2 = vpack.c.bf16 %v11908_v14, %v11906_v34  ;;  %v11457_v34 = vand.u32 4294901760, %v8962_v17  ;;  %v11913_v14 = vld [vmem:[#allocation20_spill] sm:$0xff] }
 0x136   :  { %1719 = vmatprep.mubr.f32.mxu0 %v11451_v8  ;;  %6797 = vmatpush1.bf16.msra.mxu0 %v6796_v58  ;;  %v11910_v58 = vand.u32 4294901760, %v11909_v23  ;;  %v11911_v8 = vld [vmem:[#allocation17_spill] sm:$0xff] }
 0x137   :  { %6798 = vmatprep.subr.bf16.mxu0 %v11610_v38  ;;  %v11912_v13 = vand.u32 4294901760, %v11911_v8  ;;  %v11460_v8 = vand.u32 4294901760, %v8969_v26 }
 0x139   :  { %1723 = vmatmul.mubr.f32.gmra.mrb[10].mxu0 %v11454_v62  ;;  %v6802_v52 = vpack.c.bf16 %v11912_v13, %v11910_v58  ;;  %v11459_v58 = vand.u32 4294901760, %v8974_v59  ;;  %v11917_v13 = vld [vmem:[#allocation27_spill] sm:$0xff] }
 0x13a   :  { %1730 = vmatprep.mubr.f32.mxu0 %v11453_v29  ;;  %6800 = vmatpush1.bf16.msra.mxu0 %v6799_v2  ;;  %v11914_v2 = vand.u32 4294901760, %v11913_v14  ;;  %v11915_v29 = vld [vmem:[#allocation23_spill] sm:$0xff] }
 0x13b   :  { %6801 = vmatprep.subr.bf16.mxu0 %v11610_v38  ;;  %v11916_v23 = vand.u32 4294901760, %v11915_v29  ;;  %v11462_v29 = vand.u32 4294901760, %v8981_v22 }
 0x13d   :  { %1734 = vmatmul.mubr.f32.gmra.mrb[12].mxu0 %v11456_v40  ;;  %v6805_v62 = vpack.c.bf16 %v11916_v23, %v11914_v2  ;;  %v11461_v2 = vand.u32 4294901760, %v8986_v16  ;;  %v11921_v23 = vld [vmem:[#allocation33_spill] sm:$0xff] }
 0x13e   :  { %1741 = vmatprep.mubr.f32.mxu0 %v11455_v7  ;;  %6803 = vmatpush1.bf16.msra.mxu0 %v6802_v52  ;;  %v11918_v52 = vand.u32 4294901760, %v11917_v13  ;;  %v11919_v7 = vld [vmem:[#allocation28_spill] sm:$0xff] }
 0x13f   :  { %6804 = vmatprep.subr.bf16.mxu0 %v11610_v38  ;;  %v11920_v14 = vand.u32 4294901760, %v11919_v7  ;;  %v11463_v7 = vand.u32 4294901760, %v8993_v32 }
 0x141   :  { %1745 = vmatmul.mubr.f32.gmra.mrb[14].mxu0 %v11458_v49  ;;  %v6808_v40 = vpack.c.bf16 %v11920_v14, %v11918_v52  ;;  %v11464_v52 = vand.u32 4294901760, %v8998_v42  ;;  %v11925_v14 = vld [vmem:[#allocation36_spill] sm:$0xff] }
 0x142   :  { %1752 = vmatprep.mubr.f32.mxu0 %v11457_v34  ;;  %6806 = vmatpush1.bf16.msra.mxu0 %v6805_v62  ;;  %v11922_v62 = vand.u32 4294901760, %v11921_v23  ;;  %v11923_v34 = vld [vmem:[#allocation34_spill] sm:$0xff] }
 0x143   :  { %6807 = vmatprep.subr.bf16.mxu0 %v11610_v38  ;;  %v11924_v13 = vand.u32 4294901760, %v11923_v34  ;;  %v391_v34 = vand.u32 4294901760, %v9005_v20 }
 0x145   :  { %1756 = vmatmul.mubr.f32.gmra.mrb[16].mxu0 %v11460_v8  ;;  %v6811_v49 = vpack.c.bf16 %v11924_v13, %v11922_v62  ;;  %v11467_v62 = vand.u32 4294901760, %v9010_v18  ;;  %v11929_v13 = vld [vmem:[#allocation40_spill] sm:$0xff] }
 0x146   :  { %1763 = vmatprep.mubr.f32.mxu0 %v11459_v58  ;;  %6809 = vmatpush1.bf16.msra.mxu0 %v6808_v40  ;;  %v11926_v40 = vand.u32 4294901760, %v11925_v14  ;;  %v11927_v58 = vld [vmem:[#allocation39_spill] sm:$0xff] }
 0x147   :  { %6810 = vmatprep.subr.bf16.mxu0 %v11610_v38  ;;  %v11928_v23 = vand.u32 4294901760, %v11927_v58  ;;  %v11933_v58 = vand.u32 4294901760, %v8868_v10 }
 0x149   :  { %1767 = vmatmul.mubr.f32.gmra.mrb[18].mxu0 %v11462_v29  ;;  %v6814_v8 = vpack.c.bf16 %v11928_v23, %v11926_v40  ;;  %v221_v40 = vsub.f32 %v8868_v10, %v11933_v58  ;;  %v11934_v23 = vand.u32 4294901760, %v8874_v41 }
 0x14a   :  { %1774 = vmatprep.mubr.f32.mxu0 %v11461_v2  ;;  %6812 = vmatpush1.bf16.msra.mxu0 %v6811_v49  ;;  %v11930_v49 = vand.u32 4294901760, %v11929_v13  ;;  %v11931_v2 = vld [vmem:[#allocation41_spill] sm:$0xff]  ;;  %v11935_v13 = vld [vmem:[#allocation47_spill] sm:$0xff] }
 0x14b   :  { %6813 = vmatprep.subr.bf16.mxu0 %v11610_v38  ;;  %v11932_v14 = vand.u32 4294901760, %v11931_v2  ;;  %v415_v2 = vand.u32 4294901760, %v9022_v50 }
 0x14d   :  { %1778 = vmatmul.mubr.f32.gmra.mrb[20].mxu0 %v11463_v7  ;;  %v6817_v29 = vpack.c.bf16 %v11932_v14, %v11930_v49  ;;  %v227_v7 = vsub.f32 %v8874_v41, %v11934_v23  ;;  %v11936_v49 = vand.u32 4294901760, %v11935_v13  ;;  %v11937_v14 = vld [vmem:[#allocation50_spill] sm:$0xff]  ;;  %v11939_v41 = vand.u32 4294901760, %v8880_v45 }
 0x14e   :  { %1785 = vmatprep.mubr.f32.mxu0 %v11464_v52  ;;  %6815 = vmatpush1.bf16.msra.mxu0 %v6814_v8  ;;  %v406_v8 = vand.u32 4294901760, %v9017_v36  ;;  %v222_v52 = vand.u32 4294901760, %v221_v40  ;;  %v11938_v10 = vand.u32 4294901760, %v11937_v14  ;;  %v11940_v40 = vand.u32 4294901760, %v8885_v35 }
 0x14f   :  { %6816 = vmatprep.subr.bf16.mxu0 %v11610_v38  ;;  %v228_v55 = vand.u32 4294901760, %v227_v7  ;;  %v236_v23 = vsub.f32 %v8880_v45, %v11939_v41  ;;  %v430_v7 = vand.u32 4294901760, %v9034_v19  ;;  %v11942_v45 = vld [vmem:[#allocation53_spill] sm:$0xff]  ;;  %v11946_v41 = vand.u32 4294901760, %v8891_v4 }
 0x150   :  { %v6820_v58 = vpack.c.bf16 %v11938_v10, %v11936_v49  ;;  %223 = vmatprep.mubr.f32.mxu1 %v222_v52  ;;  %v11941_v49 = vld [vmem:[#allocation10_spill] sm:$0xff] }
 0x151   :  { %1789 = vmatmul.mubr.f32.gmra.mrb[22].mxu0 %v391_v34  ;;  %229 = vmatmul.mubr.f32.vlgmr.msra.gmra.mrb[0].mxu1 %v228_v55  ;;  %v237_v13 = vand.u32 4294901760, %v236_v23  ;;  %v11943_v55 = vand.u32 4294901760, %v11942_v45  ;;  %v11944_v52 = vld [vmem:[#allocation54_spill] sm:$0xff]  ;;  %v251_v23 = vsub.f32 %v8891_v4, %v11946_v41  ;;  %v11948_v45 = vld [vmem:[#allocation11_spill] sm:$0xff]  ;;  %v445_v4 = vand.u32 4294901760, %v9046_v61 }
 0x152   :  { %1796 = vmatprep.mubr.f32.mxu0 %v11467_v62  ;;  %6818 = vmatpush1.bf16.msra.mxu0 %v6817_v29  ;;  %v242_v62 = vsub.f32 %v8885_v35, %v11940_v40  ;;  %v421_v29 = vand.u32 4294901760, %v9029_v63  ;;  %v11945_v14 = vand.u32 4294901760, %v11944_v52  ;;  %v11947_v40 = vand.u32 4294901760, %v8897_v11  ;;  %v11951_v52 = vld [vmem:[#allocation59_spill] sm:$0xff] }
 0x153   :  { %6819 = vmatprep.subr.bf16.mxu0 %v11610_v38  ;;  %6943 = vmatpush1.bf16.msra.mxu1 %v11941_v49  ;;  %v11953_v41 = vand.u32 4294901760, %v8903_v9 }
 0x154   :  { %v6823_v10 = vpack.c.bf16 %v11945_v14, %v11943_v55  ;;  %v243_v35 = vand.u32 4294901760, %v242_v62  ;;  %238 = vmatprep.mubr.f32.mxu1 %v237_v13  ;;  %v257_v49 = vsub.f32 %v8897_v11, %v11947_v40  ;;  %6928 = vmatprep.subr.bf16.mxu1 %v11610_v38  ;;  %v252_v62 = vand.u32 4294901760, %v251_v23  ;;  %v11949_v13 = vld [vmem:[#allocation58_spill] sm:$0xff] }
 0x155   :  { %1800 = vmatmul.mubr.f32.gmra.mrb[24].mxu0 %v406_v8  ;;  %v11950_v55 = vand.u32 4294901760, %v11949_v13  ;;  %v11952_v11 = vand.u32 4294901760, %v11951_v52  ;;  %v266_v23 = vsub.f32 %v8903_v9, %v11953_v41  ;;  %v11954_v40 = vand.u32 4294901760, %v8909_v0  ;;  %v11955_v13 = vld [vmem:[#allocation18_spill] sm:$0xff]  ;;  %v11958_v52 = vld [vmem:[#allocation63_spill] sm:$0xff] }
 0x156   :  { %1807 = vmatprep.mubr.f32.mxu0 %v415_v2  ;;  %6821 = vmatpush1.bf16.msra.mxu0 %v6820_v58  ;;  %v436_v58 = vand.u32 4294901760, %v9041_v28  ;;  %v460_v9 = vand.u32 4294901760, %v9058_v48  ;;  %v11960_v41 = vand.u32 4294901760, %v8914_v1 }
 0x157   :  { %6822 = vmatprep.subr.bf16.mxu0 %v11610_v38  ;;  %244 = vmatmul.mubr.f32.gmra.mrb[2].mxu1 %v243_v35  ;;  %v6826_v14 = vpack.c.bf16 %v11952_v11, %v11950_v55  ;;  %v258_v35 = vand.u32 4294901760, %v257_v49  ;;  %v267_v49 = vand.u32 4294901760, %v266_v23 }
 0x158   :  { %6944 = vmatpush1.bf16.msra.mxu1 %v11948_v45  ;;  %253 = vmatprep.mubr.f32.mxu1 %v252_v62  ;;  %v272_v45 = vsub.f32 %v8909_v0, %v11954_v40  ;;  %v11956_v62 = vld [vmem:[#allocation62_spill] sm:$0xff]  ;;  %v11959_v0 = vand.u32 4294901760, %v11958_v52  ;;  %v281_v23 = vsub.f32 %v8914_v1, %v11960_v41  ;;  %v11961_v40 = vand.u32 4294901760, %v8921_v25 }
 0x159   :  { %1811 = vmatmul.mubr.f32.gmra.mrb[26].mxu0 %v421_v29  ;;  %6929 = vmatprep.subr.bf16.mxu1 %v11610_v38  ;;  %v11957_v55 = vand.u32 4294901760, %v11956_v62  ;;  %v11962_v62 = vld [vmem:[#allocation22_spill] sm:$0xff]  ;;  %v475_v1 = vand.u32 4294901760, %v9070_v51  ;;  %v11964_v52 = vand.u32 4294901760, %v8933_v39 }
 0x15a   :  { %1818 = vmatprep.mubr.f32.mxu0 %v430_v7  ;;  %6824 = vmatpush1.bf16.msra.mxu0 %v6823_v10  ;;  %v451_v10 = vand.u32 4294901760, %v9053_v56  ;;  %v11965_v41 = vld [vmem:[#allocation26_spill] sm:$0xff] }
 0x15b   :  { %6825 = vmatprep.subr.bf16.mxu0 %v11610_v38  ;;  %259 = vmatmul.mubr.f32.gmra.mrb[4].mxu1 %v258_v35  ;;  %v6829_v11 = vpack.c.bf16 %v11959_v0, %v11957_v55  ;;  %v273_v35 = vand.u32 4294901760, %v272_v45  ;;  %v282_v45 = vand.u32 4294901760, %v281_v23  ;;  %v302_v0 = vsub.f32 %v8933_v39, %v11964_v52 }
 0x15c   :  { %6945 = vmatpush1.bf16.msra.mxu1 %v11955_v13  ;;  %268 = vmatprep.mubr.f32.mxu1 %v267_v49  ;;  %v287_v13 = vsub.f32 %v8921_v25, %v11961_v40  ;;  %v11963_v25 = vand.u32 4294901760, %v8926_v3  ;;  %v11966_v39 = vand.u32 4294901760, %v8938_v31 }
 0x15d   :  { %1822 = vmatmul.mubr.f32.gmra.mrb[28].mxu0 %v436_v58  ;;  %6930 = vmatprep.subr.bf16.mxu1 %v11610_v38  ;;  %v303_v23 = vand.u32 4294901760, %v302_v0  ;;  %v11970_v0 = vand.u32 4294901760, %v8957_v6 }
 0x15e   :  { %1829 = vmatprep.mubr.f32.mxu0 %v445_v4  ;;  %6827 = vmatpush1.bf16.msra.mxu0 %v6826_v14  ;;  %v466_v14 = vand.u32 4294901760, %v9065_v33  ;;  %v288_v49 = vand.u32 4294901760, %v287_v13  ;;  %v296_v55 = vsub.f32 %v8926_v3, %v11963_v25  ;;  %v490_v3 = vand.u32 4294901760, %v9082_v30  ;;  %v11968_v25 = vld [vmem:[#allocation35_spill] sm:$0xff] }
 0x15f   :  { %6828 = vmatprep.subr.bf16.mxu0 %v11610_v38  ;;  %274 = vmatmul.mubr.f32.gmra.mrb[6].mxu1 %v273_v35  ;;  %v311_v40 = vsub.f32 %v8938_v31, %v11966_v39  ;;  %v11967_v13 = vand.u32 4294901760, %v8945_v44  ;;  %v11969_v31 = vand.u32 4294901760, %v8950_v5  ;;  %v11971_v39 = vld [vmem:[#allocation38_spill] sm:$0xff] }
 0x160   :  { %6946 = vmatpush1.bf16.msra.mxu1 %v11962_v62  ;;  %283 = vmatprep.mubr.f32.mxu1 %v282_v45  ;;  %v297_v35 = vand.u32 4294901760, %v296_v55  ;;  %v496_v62 = vand.u32 4294901760, %v9087_v43  ;;  %v505_v55 = vand.u32 4294901760, %v9092_v21 }
 0x161   :  { %1833 = vmatmul.mubr.f32.gmra.mrb[30].mxu0 %v451_v10  ;;  %6931 = vmatprep.subr.bf16.mxu1 %v11610_v38  ;;  %v317_v45 = vsub.f32 %v8945_v44, %v11967_v13  ;;  %v326_v44 = vsub.f32 %v8950_v5, %v11969_v31  ;;  %v11972_v5 = vand.u32 4294901760, %v8962_v17  ;;  %v11974_v31 = vld [vmem:[#allocation43_spill] sm:$0xff] }
 0x162   :  { %1840 = vmatprep.mubr.f32.mxu0 %v460_v9  ;;  %6830 = vmatpush1.bf16.msra.mxu0 %v6829_v11  ;;  %v481_v11 = vand.u32 4294901760, %v9077_v15 }
 0x163   :  { %6831 = vmatprep.subr.bf16.mxu0 %v11610_v38  ;;  %289 = vmatmul.mubr.f32.gmra.mrb[8].mxu1 %v288_v49  ;;  %v312_v49 = vand.u32 4294901760, %v311_v40  ;;  %v318_v52 = vand.u32 4294901760, %v317_v45  ;;  %v520_v40 = vand.u32 4294901760, %v9102_v47  ;;  %v11973_v45 = vand.u32 4294901760, %v8969_v26 }
 0x164   :  { %6947 = vmatpush1.bf16.msra.mxu1 %v11965_v41  ;;  %298 = vmatprep.mubr.f32.mxu1 %v297_v35  ;;  %v332_v35 = vsub.f32 %v8957_v6, %v11970_v0  ;;  %v511_v41 = vand.u32 4294901760, %v9097_v12  ;;  %v341_v6 = vsub.f32 %v8962_v17, %v11972_v5  ;;  %v11975_v17 = vand.u32 4294901760, %v8974_v59  ;;  %v11977_v5 = vld [vmem:[#allocation49_spill] sm:$0xff] }
 0x165   :  { %1844 = vmatmul.mubr.f32.gmra.mrb[32].mxu0 %v466_v14  ;;  %6932 = vmatprep.subr.bf16.mxu1 %v11610_v38 }
 0x166   :  { %1851 = vmatprep.mubr.f32.mxu0 %v475_v1  ;;  %v333_v13 = vand.u32 4294901760, %v332_v35  ;;  %v11976_v35 = vand.u32 4294901760, %v8981_v22 }
 0x167   :  { %304 = vmatmul.mubr.f32.gmra.mrb[10].mxu1 %v303_v23  ;;  %v327_v23 = vand.u32 4294901760, %v326_v44  ;;  %v535_v44 = vand.u32 4294901760, %v9115_v54 }
 0x168   :  { %6948 = vmatpush1.bf16.msra.mxu1 %v11968_v25  ;;  %313 = vmatprep.mubr.f32.mxu1 %v312_v49  ;;  %v347_v49 = vsub.f32 %v8969_v26, %v11973_v45  ;;  %v526_v25 = vand.u32 4294901760, %v9110_v37  ;;  %v356_v26 = vsub.f32 %v8974_v59, %v11975_v17  ;;  %v11978_v59 = vand.u32 4294901760, %v8986_v16  ;;  %v11980_v17 = vld [vmem:[#allocation56_spill] sm:$0xff] }
 0x169   :  { %1855 = vmatmul.mubr.f32.gmra.mrb[34].mxu0 %v481_v11  ;;  %6933 = vmatprep.subr.bf16.mxu1 %v11610_v38 }
 0x16a   :  { %1862 = vmatprep.mubr.f32.mxu0 %v490_v3  ;;  %v348_v0 = vand.u32 4294901760, %v347_v49  ;;  %v11979_v49 = vand.u32 4294901760, %v8993_v32 }
 0x16b   :  { %319 = vmatmul.mubr.f32.gmra.mrb[12].mxu1 %v318_v52  ;;  %v342_v52 = vand.u32 4294901760, %v341_v6  ;;  %v550_v6 = vand.u32 4294901760, %v9134_v24 }
 0x16c   :  { %6949 = vmatpush1.bf16.msra.mxu1 %v11971_v39  ;;  %328 = vmatprep.mubr.f32.mxu1 %v327_v23  ;;  %v362_v23 = vsub.f32 %v8981_v22, %v11976_v35  ;;  %v541_v39 = vand.u32 4294901760, %v9128_v27  ;;  %v371_v22 = vsub.f32 %v8986_v16, %v11978_v59  ;;  %v11981_v16 = vand.u32 4294901760, %v8998_v42 }
 0x16d   :  { %1866 = vmatmul.mubr.f32.gmra.mrb[36].mxu0 %v496_v62  ;;  %6934 = vmatprep.subr.bf16.mxu1 %v11610_v38  ;;  %v580_v59 = vand.u32 4294901760, %v9170_v60 }
 0x16e   :  { %1873 = vmatprep.mubr.f32.mxu0 %v505_v55  ;;  %v363_v45 = vand.u32 4294901760, %v362_v23  ;;  %v392_v23 = vsub.f32 %v9005_v20, %v391_v34  ;;  %v407_v34 = vsub.f32 %v9017_v36, %v406_v8  ;;  %v416_v36 = vsub.f32 %v9022_v50, %v415_v2  ;;  %v11987_v8 = vld [vmem:[#allocation106_spill] sm:$0xff]  ;;  %v11990_v2 = vld [vmem:[#allocation113_spill] sm:$0xff] }
 0x16f   :  { %334 = vmatmul.mubr.f32.gmra.mrb[14].mxu1 %v333_v13  ;;  %v357_v13 = vand.u32 4294901760, %v356_v26  ;;  %v565_v26 = vand.u32 4294901760, %v9152_v46  ;;  %v431_v50 = vsub.f32 %v9034_v19, %v430_v7  ;;  %v446_v19 = vsub.f32 %v9046_v61, %v445_v4  ;;  %v11993_v7 = vld [vmem:[#allocation120_spill] sm:$0xff]  ;;  %v11996_v4 = vld [vmem:[#allocation127_spill] sm:$0xff] }
 0x170   :  { %6950 = vmatpush1.bf16.msra.mxu1 %v11974_v31  ;;  %343 = vmatprep.mubr.f32.mxu1 %v342_v52  ;;  %v377_v52 = vsub.f32 %v8993_v32, %v11979_v49  ;;  %v556_v31 = vand.u32 4294901760, %v9146_v53  ;;  %v386_v32 = vsub.f32 %v8998_v42, %v11981_v16  ;;  %v11983_v42 = vand.u32 4294901760, %v9010_v18  ;;  %v11984_v49 = vld [vmem:[#allocation99_spill] sm:$0xff] }
 0x171   :  { %1877 = vmatmul.mubr.f32.gmra.mrb[38].mxu0 %v511_v41  ;;  %6935 = vmatprep.subr.bf16.mxu1 %v11610_v38  ;;  %v461_v61 = vsub.f32 %v9058_v48, %v460_v9  ;;  %v476_v48 = vsub.f32 %v9070_v51, %v475_v1  ;;  %v11999_v9 = vld [vmem:[#allocation134_spill] sm:$0xff]  ;;  %v491_v51 = vsub.f32 %v9082_v30, %v490_v3  ;;  %v12001_v1 = vld [vmem:[#allocation141_spill] sm:$0xff]  ;;  %v12003_v3 = vld [vmem:[#allocation144_spill] sm:$0xff] }
 0x172   :  { %1884 = vmatprep.mubr.f32.mxu0 %v520_v40  ;;  %v378_v35 = vand.u32 4294901760, %v377_v52  ;;  %v401_v20 = vsub.f32 %v9010_v18, %v11983_v42  ;;  %v586_v52 = vand.u32 4294901760, %v11984_v49  ;;  %v422_v18 = vsub.f32 %v9029_v63, %v421_v29 }
 0x173   :  { %349 = vmatmul.mubr.f32.gmra.mrb[16].mxu1 %v348_v0  ;;  %v372_v0 = vand.u32 4294901760, %v371_v22  ;;  %v393_v22 = vand.u32 4294901760, %v392_v23  ;;  %v601_v23 = vand.u32 4294901760, %v11987_v8  ;;  %v437_v63 = vsub.f32 %v9041_v28, %v436_v58 }
 0x174   :  { %6951 = vmatpush1.bf16.msra.mxu1 %v11977_v5  ;;  %358 = vmatprep.mubr.f32.mxu1 %v357_v13  ;;  %v571_v13 = vand.u32 4294901760, %v9164_v57  ;;  %v387_v5 = vand.u32 4294901760, %v386_v32  ;;  %v408_v32 = vand.u32 4294901760, %v407_v34  ;;  %v616_v29 = vand.u32 4294901760, %v11990_v2 }
 0x175   :  { %1888 = vmatmul.mubr.f32.gmra.mrb[40].mxu0 %v526_v25  ;;  %6936 = vmatprep.subr.bf16.mxu1 %v11610_v38  ;;  %v432_v34 = vand.u32 4294901760, %v431_v50  ;;  %v452_v28 = vsub.f32 %v9053_v56, %v451_v10  ;;  %v631_v58 = vand.u32 4294901760, %v11993_v7  ;;  %v467_v56 = vsub.f32 %v9065_v33, %v466_v14 }
 0x176   :  { %1895 = vmatprep.mubr.f32.mxu0 %v535_v44  ;;  %v646_v10 = vand.u32 4294901760, %v11996_v4  ;;  %v482_v33 = vsub.f32 %v9077_v15, %v481_v11  ;;  %v661_v14 = vand.u32 4294901760, %v11999_v9  ;;  %v497_v15 = vsub.f32 %v9087_v43, %v496_v62 }
 0x177   :  { %364 = vmatmul.mubr.f32.gmra.mrb[18].mxu1 %v363_v45  ;;  %v11982_v45 = vld [vmem:[#allocation60_spill] sm:$0xff]  ;;  %v453_v50 = vand.u32 4294901760, %v452_v28  ;;  %v477_v28 = vand.u32 4294901760, %v476_v48  ;;  %v676_v11 = vand.u32 4294901760, %v12001_v1  ;;  %v506_v30 = vsub.f32 %v9092_v21, %v505_v55 }
 0x178   :  { %6952 = vmatpush1.bf16.msra.mxu1 %v11980_v17  ;;  %373 = vmatprep.mubr.f32.mxu1 %v372_v0  ;;  %v402_v0 = vand.u32 4294901760, %v401_v20  ;;  %v11985_v17 = vld [vmem:[#allocation61_spill] sm:$0xff]  ;;  %v423_v20 = vand.u32 4294901760, %v422_v18  ;;  %v447_v18 = vand.u32 4294901760, %v446_v19  ;;  %v468_v19 = vand.u32 4294901760, %v467_v56  ;;  %v12002_v56 = vld [vmem:[#allocation143_spill] sm:$0xff] }
 0x179   :  { %1899 = vmatmul.mubr.f32.gmra.mrb[42].mxu0 %v541_v39  ;;  %6937 = vmatprep.subr.bf16.mxu1 %v11610_v38  ;;  %v512_v43 = vsub.f32 %v9097_v12, %v511_v41  ;;  %v691_v62 = vand.u32 4294901760, %v12003_v3  ;;  %v521_v21 = vsub.f32 %v9102_v47, %v520_v40  ;;  %v527_v12 = vsub.f32 %v9110_v37, %v526_v25  ;;  %v12004_v41 = vld [vmem:[#allocation52_spill] sm:$0xff]  ;;  %v12005_v40 = vld [vmem:[#allocation71_spill] sm:$0xff]  ;;  %v12006_v25 = vld [vmem:[#allocation66_spill] sm:$0xff] }
 0x17a   :  { %1906 = vmatprep.mubr.f32.mxu0 %v550_v6  ;;  %v542_v47 = vsub.f32 %v9128_v27, %v541_v39  ;;  %v557_v27 = vsub.f32 %v9146_v53, %v556_v31  ;;  %v572_v53 = vsub.f32 %v9164_v57, %v571_v13  ;;  %v587_v57 = vsub.f32 %v11984_v49, %v586_v52  ;;  %v12017_v49 = vld [vmem:[#allocation83_spill] sm:$0xff] }
 0x17b   :  { %379 = vmatmul.mubr.f32.gmra.mrb[20].mxu1 %v378_v35  ;;  %v11986_v35 = vld [vmem:[#allocation103_spill] sm:$0xff]  ;;  %v513_v48 = vand.u32 4294901760, %v512_v43  ;;  %v522_v55 = vand.u32 4294901760, %v521_v21  ;;  %v12013_v43 = vld [vmem:[#allocation70_spill] sm:$0xff]  ;;  %v12016_v21 = vld [vmem:[#allocation73_spill] sm:$0xff] }
 0x17c   :  { %6953 = vmatpush1.bf16.msra.mxu1 %v11982_v45  ;;  %388 = vmatprep.mubr.f32.mxu1 %v387_v5  ;;  %v595_v16 = vand.u32 4294901760, %v11986_v35  ;;  %v417_v5 = vand.u32 4294901760, %v416_v36  ;;  %v11988_v45 = vld [vmem:[#allocation64_spill] sm:$0xff]  ;;  %v438_v36 = vand.u32 4294901760, %v437_v63  ;;  %v462_v63 = vand.u32 4294901760, %v461_v61 }
 0x17d   :  { %1910 = vmatmul.mubr.f32.gmra.mrb[44].mxu0 %v556_v31  ;;  %6938 = vmatprep.subr.bf16.mxu1 %v11610_v38  ;;  %v492_v61 = vand.u32 4294901760, %v491_v51  ;;  %v543_v51 = vand.u32 4294901760, %v542_v47  ;;  %v12021_v47 = vld [vmem:[#allocation87_spill] sm:$0xff] }
 0x17e   :  { %1917 = vmatprep.mubr.f32.mxu0 %v565_v26 }
 0x17f   :  { %394 = vmatmul.mubr.f32.gmra.mrb[22].mxu1 %v393_v22  ;;  %v11989_v22 = vld [vmem:[#allocation110_spill] sm:$0xff] }
 0x180   :  { %6954 = vmatpush1.bf16.msra.mxu1 %v11985_v17  ;;  %403 = vmatprep.mubr.f32.mxu1 %v402_v0  ;;  %v610_v42 = vand.u32 4294901760, %v11989_v22  ;;  %v11991_v0 = vld [vmem:[#allocation65_spill] sm:$0xff] }
 0x181   :  { %1921 = vmatmul.mubr.f32.gmra.mrb[46].mxu0 %v571_v13  ;;  %6939 = vmatprep.subr.bf16.mxu1 %v11610_v38  ;;  %v11992_v17 = vld [vmem:[#allocation117_spill] sm:$0xff] }
 0x182   :  { %1928 = vmatprep.mubr.f32.mxu0 %v580_v59 }
 0x183   :  { %409 = vmatmul.mubr.f32.gmra.mrb[24].mxu1 %v408_v32  ;;  %v625_v32 = vand.u32 4294901760, %v11992_v17 }
 0x184   :  { %6955 = vmatpush1.bf16.msra.mxu1 %v11988_v45  ;;  %418 = vmatprep.mubr.f32.mxu1 %v417_v5  ;;  %v11994_v5 = vld [vmem:[#allocation67_spill] sm:$0xff]  ;;  %v11995_v45 = vld [vmem:[#allocation124_spill] sm:$0xff] }
 0x185   :  { %1932 = vmatmul.mubr.f32.gmra.mrb[48].mxu0 %v586_v52  ;;  %6940 = vmatprep.subr.bf16.mxu1 %v11610_v38 }
 0x186   :  { %1939 = vmatprep.mubr.f32.mxu0 %v595_v16 }
 0x187   :  { %424 = vmatmul.mubr.f32.gmra.mrb[26].mxu1 %v423_v20  ;;  %v640_v20 = vand.u32 4294901760, %v11995_v45 }
 0x188   :  { %6956 = vmatpush1.bf16.msra.mxu1 %v11991_v0  ;;  %433 = vmatprep.mubr.f32.mxu1 %v432_v34  ;;  %v11997_v34 = vld [vmem:[#allocation69_spill] sm:$0xff]  ;;  %v11998_v0 = vld [vmem:[#allocation131_spill] sm:$0xff] }
 0x189   :  { %1943 = vmatmul.mubr.f32.gmra.mrb[50].mxu0 %v601_v23  ;;  %6941 = vmatprep.subr.bf16.mxu1 %v11610_v38 }
 0x18a   :  { %1950 = vmatprep.mubr.f32.mxu0 %v610_v42 }
 0x18b   :  { %439 = vmatmul.mubr.f32.gmra.mrb[28].mxu1 %v438_v36  ;;  %v655_v36 = vand.u32 4294901760, %v11998_v0 }
 0x18c   :  { %6957 = vmatpush1.bf16.msra.mxu1 %v11994_v5  ;;  %448 = vmatprep.mubr.f32.mxu1 %v447_v18  ;;  %v12000_v18 = vld [vmem:[#allocation139_spill] sm:$0xff] }
 0x18d   :  { %1954 = vmatmul.mubr.f32.gmra.mrb[52].mxu0 %v616_v29  ;;  %6942 = vmatprep.subr.bf16.mxu1 %v11610_v38  ;;  %v670_v5 = vand.u32 4294901760, %v12000_v18 }
 0x18e   :  { %1961 = vmatprep.mubr.f32.mxu0 %v625_v32 }
 0x18f   :  { %454 = vmatmul.mubr.f32.gmra.mrb[30].mxu1 %v453_v50  ;;  %v483_v50 = vand.u32 4294901760, %v482_v33  ;;  %v528_v33 = vand.u32 4294901760, %v527_v12  ;;  %v588_v12 = vand.u32 4294901760, %v587_v57  ;;  %v12036_v57 = vld [vmem:[#allocation102_spill] sm:$0xff] }
 0x190   :  { %6958 = vmatpush1.bf16.msra.mxu1 %v11997_v34  ;;  %463 = vmatprep.mubr.f32.mxu1 %v462_v63  ;;  %v685_v63 = vand.u32 4294901760, %v12002_v56  ;;  %v498_v34 = vand.u32 4294901760, %v497_v15  ;;  %v12009_v15 = vld [vmem:[#allocation75_spill] sm:$0xff] }
 0x191   :  { %1965 = vmatmul.mubr.f32.gmra.mrb[54].mxu0 %v631_v58 }
 0x192   :  { %1972 = vmatprep.mubr.f32.mxu0 %v640_v20 }
 0x193   :  { %469 = vmatmul.mubr.f32.gmra.mrb[32].mxu1 %v468_v19  ;;  %v507_v19 = vand.u32 4294901760, %v506_v30  ;;  %v12012_v30 = vld [vmem:[#allocation78_spill] sm:$0xff] }
 0x194   :  { %478 = vmatprep.mubr.f32.mxu1 %v477_v28  ;;  %v536_v28 = vsub.f32 %v9115_v54, %v535_v44  ;;  %v551_v54 = vsub.f32 %v9134_v24, %v550_v6  ;;  %v12008_v44 = vld [vmem:[#allocation74_spill] sm:$0xff]  ;;  %v566_v24 = vsub.f32 %v9152_v46, %v565_v26  ;;  %v12011_v6 = vld [vmem:[#allocation77_spill] sm:$0xff]  ;;  %v581_v46 = vsub.f32 %v9170_v60, %v580_v59  ;;  %v12014_v26 = vld [vmem:[#allocation80_spill] sm:$0xff] }
 0x195   :  { %1976 = vmatmul.mubr.f32.gmra.mrb[56].mxu0 %v646_v10  ;;  %v596_v60 = vsub.f32 %v11986_v35, %v595_v16  ;;  %v602_v59 = vsub.f32 %v11987_v8, %v601_v23  ;;  %v611_v35 = vsub.f32 %v11989_v22, %v610_v42  ;;  %v617_v16 = vsub.f32 %v11990_v2, %v616_v29  ;;  %v12020_v8 = vld [vmem:[#allocation85_spill] sm:$0xff] }
 0x196   :  { %1983 = vmatprep.mubr.f32.mxu0 %v655_v36  ;;  %v537_v37 = vand.u32 4294901760, %v536_v28  ;;  %v552_v39 = vand.u32 4294901760, %v551_v54  ;;  %v567_v31 = vand.u32 4294901760, %v566_v24  ;;  %v582_v13 = vand.u32 4294901760, %v581_v46  ;;  %v12023_v2 = vld [vmem:[#allocation89_spill] sm:$0xff]  ;;  %v12025_v54 = vld [vmem:[#allocation82_spill] sm:$0xff] }
 0x197   :  { %484 = vmatmul.mubr.f32.gmra.mrb[34].mxu1 %v483_v50  ;;  %v12007_v50 = vld [vmem:[#allocation72_spill] sm:$0xff]  ;;  %v597_v52 = vand.u32 4294901760, %v596_v60  ;;  %v603_v28 = vand.u32 4294901760, %v602_v59  ;;  %v612_v23 = vand.u32 4294901760, %v611_v35  ;;  %v626_v22 = vsub.f32 %v11992_v17, %v625_v32  ;;  %v12041_v60 = vld [vmem:[#allocation31_spill] sm:$0xff] }
 0x198   :  { %493 = vmatprep.mubr.f32.mxu1 %v492_v61  ;;  %v12010_v61 = vld [vmem:[#allocation68_spill] sm:$0xff]  ;;  %v632_v42 = vsub.f32 %v11993_v7, %v631_v58  ;;  %v641_v17 = vsub.f32 %v11995_v45, %v640_v20  ;;  %v647_v32 = vsub.f32 %v11996_v4, %v646_v10  ;;  %v656_v45 = vsub.f32 %v11998_v0, %v655_v36  ;;  %v12029_v4 = vld [vmem:[#allocation95_spill] sm:$0xff] }
 0x199   :  { %1987 = vmatmul.mubr.f32.gmra.mrb[58].mxu0 %v661_v14  ;;  %v627_v29 = vand.u32 4294901760, %v626_v22  ;;  %v12026_v7 = vld [vmem:[#allocation92_spill] sm:$0xff]  ;;  %v662_v20 = vsub.f32 %v11999_v9, %v661_v14  ;;  %v671_v0 = vsub.f32 %v12000_v18, %v670_v5  ;;  %v677_v36 = vsub.f32 %v12001_v1, %v676_v11  ;;  %v12032_v9 = vld [vmem:[#allocation98_spill] sm:$0xff]  ;;  %v12035_v1 = vld [vmem:[#allocation101_spill] sm:$0xff] }
 0x19a   :  { %1994 = vmatprep.mubr.f32.mxu0 %v670_v5  ;;  %v642_v58 = vand.u32 4294901760, %v641_v17  ;;  %v657_v10 = vand.u32 4294901760, %v656_v45  ;;  %v12030_v24 = vld [vmem:[#allocation96_spill] sm:$0xff]  ;;  %v686_v18 = vsub.f32 %v12002_v56, %v685_v63  ;;  %v692_v5 = vsub.f32 %v12003_v3, %v691_v62  ;;  %v12039_v56 = vld [vmem:[#allocation57_spill] sm:$0xff]  ;;  %v12042_v3 = vld [vmem:[#allocation46_spill] sm:$0xff] }
 0x19b   :  { %499 = vmatmul.mubr.f32.gmra.mrb[36].mxu1 %v498_v34  ;;  %v558_v34 = vand.u32 4294901760, %v557_v27  ;;  %v633_v27 = vand.u32 4294901760, %v632_v42  ;;  %v672_v14 = vand.u32 4294901760, %v671_v0  ;;  %v678_v46 = vand.u32 4294901760, %v677_v36  ;;  %v12044_v59 = vld [vmem:[#allocation88_spill] sm:$0xff]  ;;  %v12048_v35 = vld [vmem:[#allocation111_spill] sm:$0xff] }
 0x19c   :  { %508 = vmatprep.mubr.f32.mxu1 %v507_v19  ;;  %v573_v19 = vand.u32 4294901760, %v572_v53  ;;  %v12031_v53 = vld [vmem:[#allocation19_spill] sm:$0xff]  ;;  %v12053_v22 = vld [vmem:[#allocation114_spill] sm:$0xff]  ;;  %v12054_v42 = vld [vmem:[#allocation97_spill] sm:$0xff] }
 0x19d   :  { %1998 = vmatmul.mubr.f32.gmra.mrb[60].mxu0 %v676_v11  ;;  %v687_v11 = vand.u32 4294901760, %v686_v18  ;;  %v12058_v17 = vld [vmem:[#allocation118_spill] sm:$0xff]  ;;  %v12063_v45 = vld [vmem:[#allocation121_spill] sm:$0xff]  ;;  %v12070_v36 = vld [vmem:[#allocation123_spill] sm:$0xff] }
 0x19e   :  { %2005 = vmatprep.mubr.f32.mxu0 %v685_v63  ;;  %v12040_v63 = vld [vmem:[#allocation30_spill] sm:$0xff]  ;;  %v12069_v0 = vld [vmem:[#allocation45_spill] sm:$0xff] }
 0x19f   :  { %514 = vmatmul.mubr.f32.gmra.mrb[38].mxu1 %v513_v48  ;;  %v12015_v48 = vld [vmem:[#allocation81_spill] sm:$0xff]  ;;  %v12074_v18 = vld [vmem:[#allocation130_spill] sm:$0xff] }
 0x1a0   :  { %523 = vmatprep.mubr.f32.mxu1 %v522_v55  ;;  %v12018_v55 = vld [vmem:[#allocation84_spill] sm:$0xff] }
 0x1a1   :  { %2009 = vmatmul.mubr.f32.gmra.mrb[62].mxu0 %v691_v62  ;;  %v12043_v62 = vld [vmem:[#allocation107_spill] sm:$0xff] }
 0x1a2   :  { %2175 = vmatprep.mubr.f32.mxu0 %v12004_v41 }
 0x1a3   :  { %529 = vmatmul.mubr.f32.gmra.mrb[40].mxu1 %v528_v33  ;;  %v12019_v33 = vld [vmem:[#allocation76_spill] sm:$0xff] }
 0x1a4   :  { %538 = vmatprep.mubr.f32.mxu1 %v537_v37  ;;  %v12022_v37 = vld [vmem:[#allocation79_spill] sm:$0xff] }
 0x1a5   :  { %2177 = vmatmul.mubr.f32.vlgmr.msra.gmra.mrb[0].mxu0 %v12005_v40 }
 0x1a6   :  { %6833 = vmatpush1.bf16.msra.mxu0 %v12006_v25  ;;  %2182 = vmatprep.mubr.f32.mxu0 %v12007_v50  ;;  %v618_v25 = vand.u32 4294901760, %v617_v16  ;;  %v12049_v16 = vld [vmem:[#allocation93_spill] sm:$0xff] }
 0x1a7   :  { %6834 = vmatprep.subr.bf16.mxu0 %v11610_v38  ;;  %544 = vmatmul.mubr.f32.gmra.mrb[42].mxu1 %v543_v51  ;;  %v12024_v51 = vld [vmem:[#allocation90_spill] sm:$0xff] }
 0x1a8   :  { %553 = vmatprep.mubr.f32.mxu1 %v552_v39  ;;  %v12027_v39 = vld [vmem:[#allocation21_spill] sm:$0xff] }
 0x1a9   :  { %2184 = vmatmul.mubr.f32.gmra.mrb[2].mxu0 %v12008_v44 }
 0x1aa   :  { %2189 = vmatprep.mubr.f32.mxu0 %v12009_v15  ;;  %6836 = vmatpush1.bf16.msra.mxu0 %v12010_v61  ;;  %v12028_v61 = vld [vmem:[#allocation86_spill] sm:$0xff] }
 0x1ab   :  { %6837 = vmatprep.subr.bf16.mxu0 %v11610_v38  ;;  %559 = vmatmul.mubr.f32.gmra.mrb[44].mxu1 %v558_v34  ;;  %v648_v34 = vand.u32 4294901760, %v647_v32  ;;  %v12059_v32 = vld [vmem:[#allocation105_spill] sm:$0xff] }
 0x1ac   :  { %568 = vmatprep.mubr.f32.mxu1 %v567_v31  ;;  %v663_v31 = vand.u32 4294901760, %v662_v20  ;;  %v12064_v20 = vld [vmem:[#allocation112_spill] sm:$0xff] }
 0x1ad   :  { %2191 = vmatmul.mubr.f32.gmra.mrb[4].mxu0 %v12011_v6 }
 0x1ae   :  { %2196 = vmatprep.mubr.f32.mxu0 %v12012_v30  ;;  %6839 = vmatpush1.bf16.msra.mxu0 %v12013_v43  ;;  %v12033_v43 = vld [vmem:[#allocation25_spill] sm:$0xff] }
 0x1af   :  { %6840 = vmatprep.subr.bf16.mxu0 %v11610_v38  ;;  %574 = vmatmul.mubr.f32.gmra.mrb[46].mxu1 %v573_v19  ;;  %v12034_v19 = vld [vmem:[#allocation24_spill] sm:$0xff] }
 0x1b0   :  { %583 = vmatprep.mubr.f32.mxu1 %v582_v13  ;;  %v12037_v13 = vld [vmem:[#allocation29_spill] sm:$0xff] }
 0x1b1   :  { %2198 = vmatmul.mubr.f32.gmra.mrb[6].mxu0 %v12014_v26 }
 0x1b2   :  { %2203 = vmatprep.mubr.f32.mxu0 %v12015_v48  ;;  %6842 = vmatpush1.bf16.msra.mxu0 %v12016_v21  ;;  %v693_v21 = vand.u32 4294901760, %v692_v5  ;;  %v12075_v5 = vld [vmem:[#allocation132_spill] sm:$0xff] }
 0x1b3   :  { %6843 = vmatprep.subr.bf16.mxu0 %v11610_v38  ;;  %589 = vmatmul.mubr.f32.gmra.mrb[48].mxu1 %v588_v12  ;;  %v12038_v12 = vld [vmem:[#allocation104_spill] sm:$0xff] }
 0x1b4   :  { %598 = vmatprep.mubr.f32.mxu1 %v597_v52  ;;  %v12045_v52 = vld [vmem:[#allocation108_spill] sm:$0xff] }
 0x1b5   :  { %2205 = vmatmul.mubr.f32.gmra.mrb[8].mxu0 %v12017_v49 }
 0x1b6   :  { %2210 = vmatprep.mubr.f32.mxu0 %v12018_v55  ;;  %6845 = vmatpush1.bf16.msra.mxu0 %v12019_v33  ;;  %v12046_v33 = vld [vmem:[#allocation37_spill] sm:$0xff] }
 0x1b7   :  { %6846 = vmatprep.subr.bf16.mxu0 %v11610_v38  ;;  %604 = vmatmul.mubr.f32.gmra.mrb[50].mxu1 %v603_v28  ;;  %v12047_v28 = vld [vmem:[#allocation91_spill] sm:$0xff] }
 0x1b8   :  { %613 = vmatprep.mubr.f32.mxu1 %v612_v23  ;;  %v12050_v23 = vld [vmem:[#allocation32_spill] sm:$0xff] }
 0x1b9   :  { %2212 = vmatmul.mubr.f32.gmra.mrb[10].mxu0 %v12020_v8 }
 0x1ba   :  { %2217 = vmatprep.mubr.f32.mxu0 %v12021_v47  ;;  %6848 = vmatpush1.bf16.msra.mxu0 %v12022_v37  ;;  %v12051_v37 = vld [vmem:[#allocation44_spill] sm:$0xff] }
 0x1bb   :  { %6849 = vmatprep.subr.bf16.mxu0 %v11610_v38  ;;  %619 = vmatmul.mubr.f32.gmra.mrb[52].mxu1 %v618_v25  ;;  %v12052_v25 = vld [vmem:[#allocation94_spill] sm:$0xff] }
 0x1bc   :  { %628 = vmatprep.mubr.f32.mxu1 %v627_v29  ;;  %v12055_v29 = vld [vmem:[#allocation115_spill] sm:$0xff] }
 0x1bd   :  { %2219 = vmatmul.mubr.f32.gmra.mrb[12].mxu0 %v12023_v2 }
 0x1be   :  { %2224 = vmatprep.mubr.f32.mxu0 %v12024_v51  ;;  %6851 = vmatpush1.bf16.msra.mxu0 %v12025_v54  ;;  %v12056_v54 = vld [vmem:[#allocation48_spill] sm:$0xff] }
 0x1bf   :  { %6852 = vmatprep.subr.bf16.mxu0 %v11610_v38  ;;  %634 = vmatmul.mubr.f32.gmra.mrb[54].mxu1 %v633_v27  ;;  %v12057_v27 = vld [vmem:[#allocation100_spill] sm:$0xff] }
 0x1c0   :  { %643 = vmatprep.mubr.f32.mxu1 %v642_v58  ;;  %v12060_v58 = vld [vmem:[#allocation42_spill] sm:$0xff] }
 0x1c1   :  { %2226 = vmatmul.mubr.f32.gmra.mrb[14].mxu0 %v12026_v7 }
 0x1c2   :  { %2231 = vmatprep.mubr.f32.mxu0 %v12027_v39  ;;  %6854 = vmatpush1.bf16.msra.mxu0 %v12028_v61  ;;  %v12061_v61 = vld [vmem:[#allocation55_spill] sm:$0xff] }
 0x1c3   :  { %6855 = vmatprep.subr.bf16.mxu0 %v11610_v38  ;;  %649 = vmatmul.mubr.f32.gmra.mrb[56].mxu1 %v648_v34  ;;  %v12062_v34 = vld [vmem:[#allocation109_spill] sm:$0xff] }
 0x1c4   :  { %658 = vmatprep.mubr.f32.mxu1 %v657_v10  ;;  %v12065_v10 = vld [vmem:[#allocation122_spill] sm:$0xff] }
 0x1c5   :  { %2233 = vmatmul.mubr.f32.gmra.mrb[16].mxu0 %v12029_v4 }
 0x1c6   :  { %2238 = vmatprep.mubr.f32.mxu0 %v12030_v24  ;;  %6857 = vmatpush1.bf16.msra.mxu0 %v12031_v53  ;;  %v12066_v53 = vld [vmem:[#allocation116_spill] sm:$0xff] }
 0x1c7   :  { %6858 = vmatprep.subr.bf16.mxu0 %v11610_v38  ;;  %664 = vmatmul.mubr.f32.gmra.mrb[58].mxu1 %v663_v31  ;;  %v12068_v31 = vld [vmem:[#allocation119_spill] sm:$0xff] }
 0x1c8   :  { %673 = vmatprep.mubr.f32.mxu1 %v672_v14  ;;  %v12071_v14 = vld [vmem:[#allocation128_spill] sm:$0xff] }
 0x1c9   :  { %2240 = vmatmul.mubr.f32.gmra.mrb[18].mxu0 %v12032_v9 }
 0x1ca   :  { %2245 = vmatprep.mubr.f32.mxu0 %v12033_v43  ;;  %6860 = vmatpush1.bf16.msra.mxu0 %v12034_v19  ;;  %v12072_v19 = vld [vmem:[#allocation126_spill] sm:$0xff] }
 0x1cb   :  { %6861 = vmatprep.subr.bf16.mxu0 %v11610_v38  ;;  %679 = vmatmul.mubr.f32.gmra.mrb[60].mxu1 %v678_v46  ;;  %v12073_v46 = vld [vmem:[#allocation129_spill] sm:$0xff] }
 0x1cc   :  { %688 = vmatprep.mubr.f32.mxu1 %v687_v11  ;;  %v12076_v11 = vld [vmem:[#allocation133_spill] sm:$0xff] }
 0x1cd   :  { %2247 = vmatmul.mubr.f32.gmra.mrb[20].mxu0 %v12035_v1 }
 0x1ce   :  { %2252 = vmatprep.mubr.f32.mxu0 %v12036_v57  ;;  %6863 = vmatpush1.bf16.msra.mxu0 %v12037_v13  ;;  %v12077_v13 = vld [vmem:[#allocation51_spill] sm:$0xff] }
 0x1cf   :  { %6864 = vmatprep.subr.bf16.mxu0 %v11610_v38  ;;  %694 = vmatmul.mubr.f32.gmra.mrb[62].mxu1 %v693_v21  ;;  %v12078_v21 = vld [vmem:[#allocation137_spill] sm:$0xff] }
 0x1d0   :  { %1078 = vmatprep.mubr.f32.mxu1 %v12039_v56 }
 0x1d1   :  { %2254 = vmatmul.mubr.f32.gmra.mrb[22].mxu0 %v12038_v12 }
 0x1d2   :  { %2259 = vmatprep.mubr.f32.mxu0 %v12040_v63  ;;  %6866 = vmatpush1.bf16.msra.mxu0 %v12041_v60  ;;  %v12079_v60 = vld [vmem:[#allocation135_spill] sm:$0xff] }
 0x1d3   :  { %6867 = vmatprep.subr.bf16.mxu0 %v11610_v38  ;;  %1080 = vmatmul.mubr.f32.vlgmr.msra.gmra.mrb[44].mxu1 %v12042_v3 }
 0x1d4   :  { %1085 = vmatprep.mubr.f32.mxu1 %v12044_v59 }
 0x1d5   :  { %2261 = vmatmul.mubr.f32.gmra.mrb[24].mxu0 %v12043_v62 }
 0x1d6   :  { %2266 = vmatprep.mubr.f32.mxu0 %v12045_v52  ;;  %6869 = vmatpush1.bf16.msra.mxu0 %v12046_v33  ;;  %v12080_v33 = vld [vmem:[#allocation140_spill] sm:$0xff] }
 0x1d7   :  { %6870 = vmatprep.subr.bf16.mxu0 %v11610_v38  ;;  %1087 = vmatmul.mubr.f32.gmra.mrb[46].mxu1 %v12047_v28 }
 0x1d8   :  { %1092 = vmatprep.mubr.f32.mxu1 %v12049_v16 }
 0x1d9   :  { %2268 = vmatmul.mubr.f32.gmra.mrb[26].mxu0 %v12048_v35 }
 0x1da   :  { %2273 = vmatprep.mubr.f32.mxu0 %v12050_v23  ;;  %6872 = vmatpush1.bf16.msra.mxu0 %v12051_v37  ;;  %v12081_v37 = vld [vmem:[#allocation136_spill] sm:$0xff] }
 0x1db   :  { %6873 = vmatprep.subr.bf16.mxu0 %v11610_v38  ;;  %1094 = vmatmul.mubr.f32.gmra.mrb[48].mxu1 %v12052_v25 }
 0x1dc   :  { %1099 = vmatprep.mubr.f32.mxu1 %v12054_v42 }
 0x1dd   :  { %2275 = vmatmul.mubr.f32.gmra.mrb[28].mxu0 %v12053_v22 }
 0x1de   :  { %2280 = vmatprep.mubr.f32.mxu0 %v12055_v29  ;;  %6875 = vmatpush1.bf16.msra.mxu0 %v12056_v54  ;;  %v12082_v54 = vld [vmem:[#allocation142_spill] sm:$0xff] }
 0x1df   :  { %6876 = vmatprep.subr.bf16.mxu0 %v11610_v38  ;;  %1101 = vmatmul.mubr.f32.gmra.mrb[50].mxu1 %v12057_v27  ;;  %v12067_v38 = vld [vmem:[#allocation125_spill] sm:$0xff] }
 0x1e0   :  { %1106 = vmatprep.mubr.f32.mxu1 %v12059_v32 }
 0x1e1   :  { %2282 = vmatmul.mubr.f32.gmra.mrb[30].mxu0 %v12058_v17 }
 0x1e2   :  { %2287 = vmatprep.mubr.f32.mxu0 %v12060_v58  ;;  %6878 = vmatpush1.bf16.msra.mxu0 %v12061_v61  ;;  %v12083_v61 = vld [vmem:[#allocation138_spill] sm:$0xff] }
 0x1e3   :  { %1108 = vmatmul.mubr.f32.gmra.mrb[52].mxu1 %v12062_v34 }
 0x1e4   :  { %1113 = vmatprep.mubr.f32.mxu1 %v12064_v20 }
 0x1e5   :  { %2289 = vmatmul.mubr.f32.gmra.mrb[32].mxu0 %v12063_v45 }
 0x1e6   :  { %2294 = vmatprep.mubr.f32.mxu0 %v12065_v10 }
 0x1e7   :  { %1115 = vmatmul.mubr.f32.gmra.mrb[54].mxu1 %v12066_v53 }
 0x1e8   :  { %1120 = vmatprep.mubr.f32.mxu1 %v12068_v31 }
 0x1e9   :  { %2296 = vmatmul.mubr.f32.gmra.mrb[34].mxu0 %v12067_v38 }
 0x1ea   :  { %2301 = vmatprep.mubr.f32.mxu0 %v12069_v0 }
 0x1eb   :  { %1122 = vmatmul.mubr.f32.gmra.mrb[56].mxu1 %v12070_v36 }
 0x1ec   :  { %1127 = vmatprep.mubr.f32.mxu1 %v12072_v19 }
 0x1ed   :  { %2303 = vmatmul.mubr.f32.gmra.mrb[36].mxu0 %v12071_v14 }
 0x1ee   :  { %2308 = vmatprep.mubr.f32.mxu0 %v12073_v46 }
 0x1ef   :  { %1129 = vmatmul.mubr.f32.gmra.mrb[58].mxu1 %v12074_v18 }
 0x1f0   :  { %1134 = vmatprep.mubr.f32.mxu1 %v12076_v11 }
 0x1f1   :  { %2310 = vmatmul.mubr.f32.gmra.mrb[38].mxu0 %v12075_v5 }
 0x1f2   :  { %2315 = vmatprep.mubr.f32.mxu0 %v12077_v13 }
 0x1f3   :  { %1136 = vmatmul.mubr.f32.gmra.mrb[60].mxu1 %v12078_v21 }
 0x1f4   :  { %1141 = vmatprep.mubr.f32.mxu1 %v12080_v33 }
 0x1f5   :  { %2317 = vmatmul.mubr.f32.gmra.mrb[40].mxu0 %v12079_v60 }
 0x1f6   :  { %2322 = vmatprep.mubr.f32.mxu0 %v12081_v37 }
 0x1f7   :  { %1143 = vmatmul.mubr.f32.gmra.mrb[62].mxu1 %v12082_v54 }
 0x1f9   :  { %2324 = vmatmul.mubr.f32.gmra.mrb[42].mxu0 %v12083_v61 }
 0x1fa   :  { %2329 = vmatprep.mubr.f32.mxu0 %v12039_v56 }
 0x1fd   :  { %2331 = vmatmul.mubr.f32.gmra.mrb[44].mxu0 %v12042_v3 }
 0x1fe   :  { %2336 = vmatprep.mubr.f32.mxu0 %v12044_v59 }
 0x201   :  { %2338 = vmatmul.mubr.f32.gmra.mrb[46].mxu0 %v12047_v28 }
 0x202   :  { %2343 = vmatprep.mubr.f32.mxu0 %v12049_v16 }
 0x205   :  { %2345 = vmatmul.mubr.f32.gmra.mrb[48].mxu0 %v12052_v25 }
 0x206   :  { %2350 = vmatprep.mubr.f32.mxu0 %v12054_v42 }
 0x209   :  { %2352 = vmatmul.mubr.f32.gmra.mrb[50].mxu0 %v12057_v27 }
 0x20a   :  { %2357 = vmatprep.mubr.f32.mxu0 %v12059_v32 }
 0x20d   :  { %2359 = vmatmul.mubr.f32.gmra.mrb[52].mxu0 %v12062_v34 }
 0x20e   :  { %2364 = vmatprep.mubr.f32.mxu0 %v12064_v20 }
 0x211   :  { %2366 = vmatmul.mubr.f32.gmra.mrb[54].mxu0 %v12066_v53 }
 0x212   :  { %2371 = vmatprep.mubr.f32.mxu0 %v12068_v31 }
 0x215   :  { %2373 = vmatmul.mubr.f32.gmra.mrb[56].mxu0 %v12070_v36 }
 0x216   :  { %2378 = vmatprep.mubr.f32.mxu0 %v12072_v19 }
 0x219   :  { %2380 = vmatmul.mubr.f32.gmra.mrb[58].mxu0 %v12074_v18 }
 0x21a   :  { %2385 = vmatprep.mubr.f32.mxu0 %v12076_v11 }
 0x21d   :  { %2387 = vmatmul.mubr.f32.gmra.mrb[60].mxu0 %v12078_v21 }
 0x21e   :  { %2392 = vmatprep.mubr.f32.mxu0 %v12080_v33 }
 0x221   :  { %2394 = vmatmul.mubr.f32.gmra.mrb[62].mxu0 %v12082_v54 }
 0x222   :  { %2496 = vmatprep.mubr.f32.mxu0 %v12004_v41 }
 0x224   :  { %v9914_v31 = vpop.f32.mrb[0].mxu1 }
 0x225   :  { %2498 = vmatmul.mubr.f32.vlgmr.msra.gmra.mrb[0].mxu0 %v12005_v40  ;;  %v232_v36 = vpop.f32.mrb[1].mxu1 }
 0x226   :  { %2503 = vmatprep.mubr.f32.mxu0 %v12007_v50 }
 0x229   :  { %2505 = vmatmul.mubr.f32.gmra.mrb[2].mxu0 %v12008_v44 }
 0x22a   :  { %2510 = vmatprep.mubr.f32.mxu0 %v12009_v15  ;;  %v9918_v11 = vpop.f32.mrb[2].mxu1 }
 0x22b   :  { %v247_v21 = vpop.f32.mrb[3].mxu1 }
 0x22d   :  { %2512 = vmatmul.mubr.f32.gmra.mrb[4].mxu0 %v12011_v6 }
 0x22e   :  { %2517 = vmatprep.mubr.f32.mxu0 %v12012_v30  ;;  %v9922_v54 = vpop.f32.mrb[4].mxu1 }
 0x22f   :  { %v262_v41 = vpop.f32.mrb[5].mxu1 }
 0x231   :  { %2519 = vmatmul.mubr.f32.gmra.mrb[6].mxu0 %v12014_v26 }
 0x232   :  { %2524 = vmatprep.mubr.f32.mxu0 %v12015_v48  ;;  %v9926_v40 = vpop.f32.mrb[6].mxu1 }
 0x233   :  { %v277_v50 = vpop.f32.mrb[7].mxu1 }
 0x235   :  { %2526 = vmatmul.mubr.f32.gmra.mrb[8].mxu0 %v12017_v49 }
 0x236   :  { %2531 = vmatprep.mubr.f32.mxu0 %v12018_v55  ;;  %v9930_v44 = vpop.f32.mrb[8].mxu1 }
 0x237   :  { %v292_v15 = vpop.f32.mrb[9].mxu1 }
 0x239   :  { %2533 = vmatmul.mubr.f32.gmra.mrb[10].mxu0 %v12020_v8 }
 0x23a   :  { %2538 = vmatprep.mubr.f32.mxu0 %v12021_v47  ;;  %v9934_v6 = vpop.f32.mrb[10].mxu1 }
 0x23b   :  { %v307_v30 = vpop.f32.mrb[11].mxu1 }
 0x23d   :  { %2540 = vmatmul.mubr.f32.gmra.mrb[12].mxu0 %v12023_v2 }
 0x23e   :  { %2545 = vmatprep.mubr.f32.mxu0 %v12024_v51  ;;  %v9938_v26 = vpop.f32.mrb[12].mxu1 }
 0x23f   :  { %v322_v48 = vpop.f32.mrb[13].mxu1 }
 0x241   :  { %2547 = vmatmul.mubr.f32.gmra.mrb[14].mxu0 %v12026_v7 }
 0x242   :  { %2552 = vmatprep.mubr.f32.mxu0 %v12027_v39  ;;  %v9942_v49 = vpop.f32.mrb[14].mxu1 }
 0x243   :  { %v337_v55 = vpop.f32.mrb[15].mxu1 }
 0x245   :  { %2554 = vmatmul.mubr.f32.gmra.mrb[16].mxu0 %v12029_v4 }
 0x246   :  { %2559 = vmatprep.mubr.f32.mxu0 %v12030_v24  ;;  %v9946_v8 = vpop.f32.mrb[16].mxu1 }
 0x247   :  { %v352_v47 = vpop.f32.mrb[17].mxu1 }
 0x249   :  { %2561 = vmatmul.mubr.f32.gmra.mrb[18].mxu0 %v12032_v9 }
 0x24a   :  { %2566 = vmatprep.mubr.f32.mxu0 %v12033_v43  ;;  %v9950_v2 = vpop.f32.mrb[18].mxu1 }
 0x24b   :  { %v367_v51 = vpop.f32.mrb[19].mxu1 }
 0x24d   :  { %2568 = vmatmul.mubr.f32.gmra.mrb[20].mxu0 %v12035_v1 }
 0x24e   :  { %2573 = vmatprep.mubr.f32.mxu0 %v12036_v57  ;;  %v9954_v7 = vpop.f32.mrb[20].mxu1 }
 0x24f   :  { %v382_v39 = vpop.f32.mrb[21].mxu1 }
 0x251   :  { %2575 = vmatmul.mubr.f32.gmra.mrb[22].mxu0 %v12038_v12  ;;  %v2720_v12 = vld [vmem:[%s11122_s2] sm:$0xf] }
 0x252   :  { %2580 = vmatprep.mubr.f32.mxu0 %v12040_v63  ;;  %v9978_v4 = vpop.f32.mrb[22].mxu1 }
 0x253   :  { %v397_v24 = vpop.f32.mrb[23].mxu1 }
 0x255   :  { %2582 = vmatmul.mubr.f32.gmra.mrb[24].mxu0 %v12043_v62 }
 0x256   :  { %2587 = vmatprep.mubr.f32.mxu0 %v12045_v52  ;;  %v9982_v9 = vpop.f32.mrb[24].mxu1 }
 0x257   :  { %v412_v43 = vpop.f32.mrb[25].mxu1 }
 0x259   :  { %2589 = vmatmul.mubr.f32.gmra.mrb[26].mxu0 %v12048_v35 }
 0x25a   :  { %2594 = vmatprep.mubr.f32.mxu0 %v12050_v23  ;;  %v9986_v1 = vpop.f32.mrb[26].mxu1 }
 0x25b   :  { %v427_v57 = vpop.f32.mrb[27].mxu1 }
 0x25d   :  { %2596 = vmatmul.mubr.f32.gmra.mrb[28].mxu0 %v12053_v22  ;;  %v12085_v22 = vld [vmem:[#allocation123_spill] sm:$0xff] }
 0x25e   :  { %2601 = vmatprep.mubr.f32.mxu0 %v12055_v29 }
 0x261   :  { %2603 = vmatmul.mubr.f32.gmra.mrb[30].mxu0 %v12058_v17 }
 0x262   :  { %2608 = vmatprep.mubr.f32.mxu0 %v12060_v58  ;;  %v12087_v58 = vld [vmem:[#allocation137_spill] sm:$0xff] }
 0x265   :  { %2610 = vmatmul.mubr.f32.gmra.mrb[32].mxu0 %v12063_v45 }
 0x266   :  { %2615 = vmatprep.mubr.f32.mxu0 %v12065_v10 }
 0x269   :  { %2617 = vmatmul.mubr.f32.gmra.mrb[34].mxu0 %v12067_v38 }
 0x26a   :  { %2622 = vmatprep.mubr.f32.mxu0 %v12069_v0 }
 0x26d   :  { %2624 = vmatmul.mubr.f32.gmra.mrb[36].mxu0 %v12071_v14 }
 0x26e   :  { %2629 = vmatprep.mubr.f32.mxu0 %v12073_v46 }
 0x271   :  { %2631 = vmatmul.mubr.f32.gmra.mrb[38].mxu0 %v12075_v5 }
 0x272   :  { %2636 = vmatprep.mubr.f32.mxu0 %v12077_v13 }
 0x275   :  { %2638 = vmatmul.mubr.f32.gmra.mrb[40].mxu0 %v12079_v60 }
 0x276   :  { %2643 = vmatprep.mubr.f32.mxu0 %v12081_v37 }
 0x279   :  { %2645 = vmatmul.mubr.f32.gmra.mrb[42].mxu0 %v12083_v61 }
 0x27a   :  { %2650 = vmatprep.mubr.f32.mxu0 %v12039_v56  ;;  %v2827_v56 = vsel %vm2825_vm0, %v2720_v12, 0 }
 0x27b   :  { %v9993_v63 = vand.u32 4294901760, %v2827_v56 }
 0x27d   :  { %2652 = vmatmul.mubr.f32.gmra.mrb[44].mxu0 %v12042_v3  ;;  %v9995_v3 = vpop.f32.mrb[28].mxu1  ;;  %6207 = vmatprep.subr.mxu1 %v9993_v63  ;;  %v10045_v48 = vsub.f32 %v2827_v56, %v9993_v63 }
 0x27e   :  { %2657 = vmatprep.mubr.f32.mxu0 %v12044_v59  ;;  %v442_v62 = vpop.f32.mrb[29].mxu1  ;;  %6208 = vmatpush3.msra.mxu1 %v9993_v63 }
 0x27f   :  { %v10001_v59 = vpop.f32.mrb[30].mxu1  ;;  %v10050_v47 = vand.u32 4294901760, %v10045_v48 }
 0x280   :  { %v457_v52 = vpop.f32.mrb[31].mxu1 }
 0x281   :  { %2659 = vmatmul.mubr.f32.gmra.mrb[46].mxu0 %v12047_v28  ;;  %v10005_v28 = vpop.f32.mrb[32].mxu1  ;;  %v3219_v39 = vsub.f32 %v10045_v48, %v10050_v47 }
 0x282   :  { %2664 = vmatprep.mubr.f32.mxu0 %v12049_v16  ;;  %v472_v35 = vpop.f32.mrb[33].mxu1  ;;  %v12084_v16 = vld [vmem:[#allocation119_spill] sm:$0xff] }
 0x283   :  { %v10009_v23 = vpop.f32.mrb[34].mxu1  ;;  %v3220_v24 = vand.u32 4294901760, %v3219_v39 }
 0x285   :  { %2666 = vmatmul.mubr.f32.gmra.mrb[48].mxu0 %v12052_v25  ;;  %v487_v25 = vpop.f32.mrb[35].mxu1  ;;  %6257 = vmatprep.subr.mxu1 %v3220_v24 }
 0x286   :  { %2671 = vmatprep.mubr.f32.mxu0 %v12054_v42  ;;  %v10013_v42 = vpop.f32.mrb[36].mxu1 }
 0x287   :  { %v502_v29 = vpop.f32.mrb[37].mxu1 }
 0x288   :  { %v10017_v17 = vpop.f32.mrb[38].mxu1 }
 0x289   :  { %2673 = vmatmul.mubr.f32.gmra.mrb[50].mxu0 %v12057_v27  ;;  %v12086_v27 = vld [vmem:[#allocation133_spill] sm:$0xff] }
 0x28a   :  { %2678 = vmatprep.mubr.f32.mxu0 %v12059_v32  ;;  %v517_v32 = vpop.f32.mrb[39].mxu1 }
 0x28d   :  { %2680 = vmatmul.mubr.f32.gmra.mrb[52].mxu0 %v12062_v34  ;;  %v10021_v34 = vpop.f32.mrb[40].mxu1 }
 0x28e   :  { %2685 = vmatprep.mubr.f32.mxu0 %v12064_v20  ;;  %v532_v45 = vpop.f32.mrb[41].mxu1  ;;  %v12088_v20 = vld [vmem:[#allocation142_spill] sm:$0xff] }
 0x28f   :  { %v10024_v10 = vpop.f32.mrb[42].mxu1 }
 0x291   :  { %2687 = vmatmul.mubr.f32.gmra.mrb[54].mxu0 %v12066_v53  ;;  %v547_v53 = vpop.f32.mrb[43].mxu1 }
 0x292   :  { %2692 = vmatprep.mubr.f32.mxu0 %v12084_v16 }
 0x295   :  { %2694 = vmatmul.mubr.f32.gmra.mrb[56].mxu0 %v12085_v22 }
 0x296   :  { %2699 = vmatprep.mubr.f32.mxu0 %v12072_v19 }
 0x299   :  { %2701 = vmatmul.mubr.f32.gmra.mrb[58].mxu0 %v12074_v18 }
 0x29a   :  { %2706 = vmatprep.mubr.f32.mxu0 %v12086_v27 }
 0x29d   :  { %2708 = vmatmul.mubr.f32.gmra.mrb[60].mxu0 %v12087_v58 }
 0x29e   :  { %2713 = vmatprep.mubr.f32.mxu0 %v12080_v33 }
 0x2a1   :  { %2715 = vmatmul.mubr.f32.gmra.mrb[62].mxu0 %v12088_v20 }
 0x2a6   :  { %v10026_v38 = vpop.f32.mrb[44].mxu1 }
 0x2a7   :  { %v1083_v0 = vpop.f32.mrb[45].mxu1 }
 0x2aa   :  { %v10028_v36 = vpop.f32.mrb[46].mxu1 }
 0x2ab   :  { %v1090_v14 = vpop.f32.mrb[47].mxu1 }
 0x2ae   :  { %v10030_v19 = vpop.f32.mrb[48].mxu1 }
 0x2af   :  { %v1097_v46 = vpop.f32.mrb[49].mxu1 }
 0x2b2   :  { %v10032_v18 = vpop.f32.mrb[50].mxu1 }
 0x2b3   :  { %v1104_v5 = vpop.f32.mrb[51].mxu1 }
 0x2b6   :  { %v10034_v13 = vpop.f32.mrb[52].mxu1 }
 0x2b7   :  { %v1111_v21 = vpop.f32.mrb[53].mxu1 }
 0x2ba   :  { %v10036_v60 = vpop.f32.mrb[54].mxu1 }
 0x2bb   :  { %v1118_v33 = vpop.f32.mrb[55].mxu1 }
 0x2be   :  { %v10038_v37 = vpop.f32.mrb[56].mxu1 }
 0x2bf   :  { %v1125_v61 = vpop.f32.mrb[57].mxu1 }
 0x2c2   :  { %v10040_v41 = vpop.f32.mrb[58].mxu1 }
 0x2c3   :  { %v1132_v50 = vpop.f32.mrb[59].mxu1 }
 0x2c6   :  { %v10042_v15 = vpop.f32.mrb[60].mxu1 }
 0x2c7   :  { %v1139_v30 = vpop.f32.mrb[61].mxu1 }
 0x2ca   :  { %v10047_v55 = vpop.f32.mrb[62].mxu1 }
 0x2cb   :  { %v1146_v51 = vpop.f32.mrb[63].mxu1 }
 0x2f8   :  { %v2499_v43 = vpop.f32.mrb[0].mxu0 }
 0x2f9   :  { %v6959_v57 = vadd.f32 %v2499_v43, %v9914_v31  ;;  %v2501_v12 = vpop.f32.mrb[1].mxu0 }
 0x2fb   :  { %v2730_v62 = vsel %vm2728_vm1, %v6959_v57, 0 }
 0x2fc   :  { %v10056_v56 = vand.u32 4294901760, %v2730_v62  ;;  %v2506_v52 = vpop.f32.mrb[2].mxu0 }
 0x2fd   :  { %v6960_v35 = vadd.f32 %v2506_v52, %v9918_v11  ;;  %v2508_v16 = vpop.f32.mrb[3].mxu0 }
 0x2fe   :  { %v10060_v25 = vsub.f32 %v2730_v62, %v10056_v56 }
 0x2ff   :  { %v2733_v22 = vsel %vm2728_vm1, %v6960_v35, 0 }
 0x300   :  { %v10063_v29 = vand.u32 4294901760, %v2733_v22  ;;  %v2513_v27 = vpop.f32.mrb[4].mxu0  ;;  %v11486_v32 = vand.u32 4294901760, %v10060_v25 }
 0x301   :  { %v6961_v31 = vadd.f32 %v2513_v27, %v9922_v54  ;;  %v2515_v58 = vpop.f32.mrb[5].mxu0 }
 0x302   :  { %v10068_v45 = vsub.f32 %v2733_v22, %v10063_v29  ;;  %v2898_v11 = vsub.f32 %v10060_v25, %v11486_v32 }
 0x303   :  { %v2736_v20 = vsel %vm2728_vm1, %v6961_v31, 0 }
 0x304   :  { %v11484_v53 = vand.u32 4294901760, %v10068_v45  ;;  %v10075_v0 = vand.u32 4294901760, %v2736_v20  ;;  %v2520_v14 = vpop.f32.mrb[6].mxu0  ;;  %v2899_v46 = vand.u32 4294901760, %v2898_v11 }
 0x305   :  { %v6962_v5 = vadd.f32 %v2520_v14, %v9926_v40  ;;  %v2522_v21 = vpop.f32.mrb[7].mxu0 }
 0x306   :  { %v2908_v54 = vsub.f32 %v10068_v45, %v11484_v53  ;;  %v10082_v33 = vsub.f32 %v2736_v20, %v10075_v0  ;;  %6209 = vmatprep.mubr.f32.mxu1 %v2899_v46 }
 0x307   :  { %v2739_v61 = vsel %vm2728_vm1, %v6962_v5, 0 }
 0x308   :  { %v2909_v50 = vand.u32 4294901760, %v2908_v54  ;;  %v10085_v30 = vand.u32 4294901760, %v2739_v61  ;;  %v2527_v51 = vpop.f32.mrb[8].mxu0  ;;  %v11482_v39 = vand.u32 4294901760, %v10082_v33 }
 0x309   :  { %v6963_v43 = vadd.f32 %v2527_v51, %v9930_v44  ;;  %v2529_v40 = vpop.f32.mrb[9].mxu0 }
 0x30a   :  { %v10090_v57 = vsub.f32 %v2739_v61, %v10085_v30  ;;  %6210 = vmatmul.mubr.f32.vlgmr.msra.gmra.mrb[64].mxu1 %v2909_v50  ;;  %v2918_v12 = vsub.f32 %v10082_v33, %v11482_v39 }
 0x30b   :  { %v2742_v62 = vsel %vm2728_vm1, %v6963_v43, 0  ;;  %6258 = vmatpush3.msra.mxu1 %v3220_v24 }
 0x30c   :  { %v10096_v52 = vand.u32 4294901760, %v2742_v62  ;;  %v2534_v35 = vpop.f32.mrb[10].mxu0  ;;  %v2919_v16 = vand.u32 4294901760, %v2918_v12  ;;  %v11480_v22 = vand.u32 4294901760, %v10090_v57  ;;  %6307 = vmatprep.subr.mxu1 %v10045_v48 }
 0x30d   :  { %v6964_v44 = vadd.f32 %v2534_v35, %v9934_v6  ;;  %v2536_v27 = vpop.f32.mrb[11].mxu0 }
 0x30e   :  { %v10102_v31 = vsub.f32 %v2742_v62, %v10096_v52  ;;  %6212 = vmatprep.mubr.f32.mxu1 %v2919_v16  ;;  %v2928_v58 = vsub.f32 %v10090_v57, %v11480_v22 }
 0x30f   :  { %v2745_v24 = vsel %vm2728_vm1, %v6964_v44, 0 }
 0x310   :  { %v10108_v11 = vand.u32 4294901760, %v2745_v24  ;;  %v2541_v20 = vpop.f32.mrb[12].mxu0  ;;  %v2929_v14 = vand.u32 4294901760, %v2928_v58  ;;  %v11478_v46 = vand.u32 4294901760, %v10102_v31 }
 0x311   :  { %v6965_v5 = vadd.f32 %v2541_v20, %v9938_v26  ;;  %v2543_v6 = vpop.f32.mrb[13].mxu0 }
 0x312   :  { %v10113_v21 = vsub.f32 %v2745_v24, %v10108_v11  ;;  %6213 = vmatmul.mubr.f32.gmra.mrb[66].mxu1 %v2929_v14  ;;  %v2938_v54 = vsub.f32 %v10102_v31, %v11478_v46 }
 0x313   :  { %v2748_v61 = vsel %vm2728_vm1, %v6965_v5, 0 }
 0x314   :  { %v10119_v50 = vand.u32 4294901760, %v2748_v61  ;;  %v2548_v51 = vpop.f32.mrb[14].mxu0  ;;  %v2939_v43 = vand.u32 4294901760, %v2938_v54  ;;  %v11476_v40 = vand.u32 4294901760, %v10113_v21 }
 0x315   :  { %v6966_v12 = vadd.f32 %v2548_v51, %v9942_v49  ;;  %v2550_v26 = vpop.f32.mrb[15].mxu0 }
 0x316   :  { %v10124_v62 = vsub.f32 %v2748_v61, %v10119_v50  ;;  %6215 = vmatprep.mubr.f32.mxu1 %v2939_v43  ;;  %v2948_v35 = vsub.f32 %v10113_v21, %v11476_v40 }
 0x317   :  { %v2751_v16 = vsel %vm2728_vm1, %v6966_v12, 0 }
 0x318   :  { %v10130_v44 = vand.u32 4294901760, %v2751_v16  ;;  %v2555_v27 = vpop.f32.mrb[16].mxu0  ;;  %v2949_v58 = vand.u32 4294901760, %v2948_v35  ;;  %v11474_v24 = vand.u32 4294901760, %v10124_v62 }
 0x319   :  { %v6967_v20 = vadd.f32 %v2555_v27, %v9946_v8  ;;  %v2557_v49 = vpop.f32.mrb[17].mxu0 }
 0x31a   :  { %v10135_v14 = vsub.f32 %v2751_v16, %v10130_v44  ;;  %6216 = vmatmul.mubr.f32.gmra.mrb[68].mxu1 %v2949_v58  ;;  %v2958_v5 = vsub.f32 %v10124_v62, %v11474_v24 }
 0x31b   :  { %v2754_v6 = vsel %vm2728_vm1, %v6967_v20, 0 }
 0x31c   :  { %v10141_v54 = vand.u32 4294901760, %v2754_v6  ;;  %v2562_v61 = vpop.f32.mrb[18].mxu0  ;;  %v2959_v51 = vand.u32 4294901760, %v2958_v5  ;;  %v11473_v43 = vand.u32 4294901760, %v10135_v14 }
 0x31d   :  { %v6968_v12 = vadd.f32 %v2562_v61, %v9950_v2  ;;  %v2564_v8 = vpop.f32.mrb[19].mxu0 }
 0x31e   :  { %v10146_v26 = vsub.f32 %v2754_v6, %v10141_v54  ;;  %6218 = vmatprep.mubr.f32.mxu1 %v2959_v51  ;;  %v2968_v35 = vsub.f32 %v10135_v14, %v11473_v43 }
 0x31f   :  { %v2757_v16 = vsel %vm2728_vm1, %v6968_v12, 0 }
 0x320   :  { %v10152_v27 = vand.u32 4294901760, %v2757_v16  ;;  %v2569_v58 = vpop.f32.mrb[20].mxu0  ;;  %v2969_v20 = vand.u32 4294901760, %v2968_v35  ;;  %v11475_v49 = vand.u32 4294901760, %v10146_v26 }
 0x321   :  { %v6969_v5 = vadd.f32 %v2569_v58, %v9954_v7  ;;  %v2571_v2 = vpop.f32.mrb[21].mxu0 }
 0x322   :  { %v10157_v61 = vsub.f32 %v2757_v16, %v10152_v27  ;;  %6219 = vmatmul.mubr.f32.gmra.mrb[70].mxu1 %v2969_v20  ;;  %v2978_v6 = vsub.f32 %v10146_v26, %v11475_v49 }
 0x323   :  { %v2760_v51 = vsel %vm2728_vm1, %v6969_v5, 0 }
 0x324   :  { %v10163_v12 = vand.u32 4294901760, %v2760_v51  ;;  %v2576_v8 = vpop.f32.mrb[22].mxu0  ;;  %v2979_v43 = vand.u32 4294901760, %v2978_v6  ;;  %v11477_v35 = vand.u32 4294901760, %v10157_v61 }
 0x325   :  { %v6970_v24 = vadd.f32 %v2576_v8, %v9978_v4  ;;  %v2578_v7 = vpop.f32.mrb[23].mxu0 }
 0x326   :  { %v10168_v58 = vsub.f32 %v2760_v51, %v10163_v12  ;;  %6221 = vmatprep.mubr.f32.mxu1 %v2979_v43  ;;  %v2988_v16 = vsub.f32 %v10157_v61, %v11477_v35 }
 0x327   :  { %v2763_v20 = vsel %vm2728_vm1, %v6970_v24, 0 }
 0x328   :  { %v10174_v5 = vand.u32 4294901760, %v2763_v20  ;;  %v2583_v2 = vpop.f32.mrb[24].mxu0  ;;  %v2989_v49 = vand.u32 4294901760, %v2988_v16  ;;  %v11479_v6 = vand.u32 4294901760, %v10168_v58 }
 0x329   :  { %v6971_v40 = vadd.f32 %v2583_v2, %v9982_v9  ;;  %v2585_v4 = vpop.f32.mrb[25].mxu0 }
 0x32a   :  { %v10179_v8 = vsub.f32 %v2763_v20, %v10174_v5  ;;  %6222 = vmatmul.mubr.f32.gmra.mrb[72].mxu1 %v2989_v49  ;;  %v2998_v43 = vsub.f32 %v10168_v58, %v11479_v6 }
 0x32b   :  { %v2766_v51 = vsel %vm2728_vm1, %v6971_v40, 0 }
 0x32c   :  { %v10185_v24 = vand.u32 4294901760, %v2766_v51  ;;  %v2590_v7 = vpop.f32.mrb[26].mxu0  ;;  %v2999_v35 = vand.u32 4294901760, %v2998_v43  ;;  %v11481_v16 = vand.u32 4294901760, %v10179_v8 }
 0x32d   :  { %v6972_v46 = vadd.f32 %v2590_v7, %v9986_v1  ;;  %v2592_v9 = vpop.f32.mrb[27].mxu0 }
 0x32e   :  { %v10190_v2 = vsub.f32 %v2766_v51, %v10185_v24  ;;  %6224 = vmatprep.mubr.f32.mxu1 %v2999_v35  ;;  %v3008_v49 = vsub.f32 %v10179_v8, %v11481_v16 }
 0x32f   :  { %v2769_v20 = vsel %vm2728_vm1, %v6972_v46, 0 }
 0x330   :  { %v10196_v40 = vand.u32 4294901760, %v2769_v20  ;;  %v2597_v4 = vpop.f32.mrb[28].mxu0  ;;  %v3009_v6 = vand.u32 4294901760, %v3008_v49  ;;  %v11483_v43 = vand.u32 4294901760, %v10190_v2 }
 0x331   :  { %v6973_v22 = vadd.f32 %v2597_v4, %v9995_v3  ;;  %v2599_v1 = vpop.f32.mrb[29].mxu0 }
 0x332   :  { %v10201_v7 = vsub.f32 %v2769_v20, %v10196_v40  ;;  %6225 = vmatmul.mubr.f32.gmra.mrb[74].mxu1 %v3009_v6  ;;  %v3018_v35 = vsub.f32 %v10190_v2, %v11483_v43 }
 0x333   :  { %v2772_v51 = vsel %vm2728_vm1, %v6973_v22, 0 }
 0x334   :  { %v10207_v46 = vand.u32 4294901760, %v2772_v51  ;;  %v2604_v9 = vpop.f32.mrb[30].mxu0  ;;  %v3019_v16 = vand.u32 4294901760, %v3018_v35  ;;  %v11485_v49 = vand.u32 4294901760, %v10201_v7 }
 0x335   :  { %v6974_v39 = vadd.f32 %v2604_v9, %v10001_v59  ;;  %v2606_v3 = vpop.f32.mrb[31].mxu0 }
 0x336   :  { %v10212_v4 = vsub.f32 %v2772_v51, %v10207_v46  ;;  %6227 = vmatprep.mubr.f32.mxu1 %v3019_v16  ;;  %v3028_v6 = vsub.f32 %v10201_v7, %v11485_v49 }
 0x337   :  { %v2775_v20 = vsel %vm2728_vm1, %v6974_v39, 0 }
 0x338   :  { %12089 = vst [vmem:[#allocation2_spill] sm:$0xff] %v10212_v4  ;;  %v10218_v22 = vand.u32 4294901760, %v2775_v20  ;;  %v2611_v1 = vpop.f32.mrb[32].mxu0  ;;  %v3029_v43 = vand.u32 4294901760, %v3028_v6  ;;  %v11487_v35 = vand.u32 4294901760, %v10212_v4 }
 0x339   :  { %v6975_v53 = vadd.f32 %v2611_v1, %v10005_v28  ;;  %v2613_v59 = vpop.f32.mrb[33].mxu0 }
 0x33a   :  { %v10223_v9 = vsub.f32 %v2775_v20, %v10218_v22  ;;  %6228 = vmatmul.mubr.f32.gmra.mrb[76].mxu1 %v3029_v43  ;;  %v3038_v16 = vsub.f32 %v10212_v4, %v11487_v35 }
 0x33b   :  { %v2778_v51 = vsel %vm2728_vm1, %v6975_v53, 0 }
 0x33c   :  { %12090 = vst [vmem:[#allocation3_spill] sm:$0xff] %v10223_v9  ;;  %v10229_v39 = vand.u32 4294901760, %v2778_v51  ;;  %v2618_v3 = vpop.f32.mrb[34].mxu0  ;;  %v3039_v49 = vand.u32 4294901760, %v3038_v16  ;;  %v11490_v6 = vand.u32 4294901760, %v10223_v9 }
 0x33d   :  { %v6976_v32 = vadd.f32 %v2618_v3, %v10009_v23  ;;  %v2620_v28 = vpop.f32.mrb[35].mxu0 }
 0x33e   :  { %v10234_v1 = vsub.f32 %v2778_v51, %v10229_v39  ;;  %6230 = vmatprep.mubr.f32.mxu1 %v3039_v49  ;;  %v3048_v43 = vsub.f32 %v10223_v9, %v11490_v6 }
 0x33f   :  { %v2781_v20 = vsel %vm2728_vm1, %v6976_v32, 0 }
 0x340   :  { %12091 = vst [vmem:[#allocation4_spill] sm:$0xff] %v10234_v1  ;;  %v10240_v53 = vand.u32 4294901760, %v2781_v20  ;;  %v2625_v59 = vpop.f32.mrb[36].mxu0  ;;  %v3049_v35 = vand.u32 4294901760, %v3048_v43  ;;  %v11493_v16 = vand.u32 4294901760, %v10234_v1 }
 0x341   :  { %v6977_v4 = vadd.f32 %v2625_v59, %v10013_v42  ;;  %v2627_v23 = vpop.f32.mrb[37].mxu0 }
 0x342   :  { %v10245_v3 = vsub.f32 %v2781_v20, %v10240_v53  ;;  %6231 = vmatmul.mubr.f32.gmra.mrb[78].mxu1 %v3049_v35  ;;  %v3058_v49 = vsub.f32 %v10234_v1, %v11493_v16 }
 0x343   :  { %v2784_v51 = vsel %vm2728_vm1, %v6977_v4, 0 }
 0x344   :  { %12092 = vst [vmem:[#allocation5_spill] sm:$0xff] %v10245_v3  ;;  %v10251_v32 = vand.u32 4294901760, %v2784_v51  ;;  %v2632_v28 = vpop.f32.mrb[38].mxu0  ;;  %v3059_v6 = vand.u32 4294901760, %v3058_v49  ;;  %v11496_v43 = vand.u32 4294901760, %v10245_v3 }
 0x345   :  { %v6978_v9 = vadd.f32 %v2632_v28, %v10017_v17  ;;  %v2634_v42 = vpop.f32.mrb[39].mxu0 }
 0x346   :  { %v10256_v59 = vsub.f32 %v2784_v51, %v10251_v32  ;;  %6233 = vmatprep.mubr.f32.mxu1 %v3059_v6  ;;  %v3068_v35 = vsub.f32 %v10245_v3, %v11496_v43 }
 0x347   :  { %v2787_v20 = vsel %vm2728_vm1, %v6978_v9, 0 }
 0x348   :  { %12093 = vst [vmem:[#allocation6_spill] sm:$0xff] %v10256_v59  ;;  %v10262_v4 = vand.u32 4294901760, %v2787_v20  ;;  %v2639_v23 = vpop.f32.mrb[40].mxu0  ;;  %v3069_v16 = vand.u32 4294901760, %v3068_v35  ;;  %v11499_v49 = vand.u32 4294901760, %v10256_v59 }
 0x349   :  { %v6979_v1 = vadd.f32 %v2639_v23, %v10021_v34  ;;  %v2641_v17 = vpop.f32.mrb[41].mxu0 }
 0x34a   :  { %v10267_v28 = vsub.f32 %v2787_v20, %v10262_v4  ;;  %6234 = vmatmul.mubr.f32.gmra.mrb[80].mxu1 %v3069_v16  ;;  %v3078_v6 = vsub.f32 %v10256_v59, %v11499_v49 }
 0x34b   :  { %v2790_v51 = vsel %vm2728_vm1, %v6979_v1, 0 }
 0x34c   :  { %12094 = vst [vmem:[#allocation7_spill] sm:$0xff] %v10267_v28  ;;  %v10273_v9 = vand.u32 4294901760, %v2790_v51  ;;  %v2646_v42 = vpop.f32.mrb[42].mxu0  ;;  %v3079_v43 = vand.u32 4294901760, %v3078_v6  ;;  %v11502_v35 = vand.u32 4294901760, %v10267_v28 }
 0x34d   :  { %v6980_v3 = vadd.f32 %v2646_v42, %v10024_v10  ;;  %v2648_v34 = vpop.f32.mrb[43].mxu0 }
 0x34e   :  { %v10278_v23 = vsub.f32 %v2790_v51, %v10273_v9  ;;  %6236 = vmatprep.mubr.f32.mxu1 %v3079_v43  ;;  %v3088_v16 = vsub.f32 %v10267_v28, %v11502_v35 }
 0x34f   :  { %v2793_v20 = vsel %vm2728_vm1, %v6980_v3, 0 }
 0x350   :  { %12095 = vst [vmem:[#allocation8_spill] sm:$0xff] %v10278_v23  ;;  %v10284_v1 = vand.u32 4294901760, %v2793_v20  ;;  %v2653_v17 = vpop.f32.mrb[44].mxu0  ;;  %v3089_v49 = vand.u32 4294901760, %v3088_v16  ;;  %v11505_v6 = vand.u32 4294901760, %v10278_v23 }
 0x351   :  { %v6981_v59 = vadd.f32 %v2653_v17, %v10026_v38  ;;  %v2655_v10 = vpop.f32.mrb[45].mxu0 }
 0x352   :  { %v10289_v42 = vsub.f32 %v2793_v20, %v10284_v1  ;;  %6237 = vmatmul.mubr.f32.gmra.mrb[82].mxu1 %v3089_v49  ;;  %v3098_v43 = vsub.f32 %v10278_v23, %v11505_v6 }
 0x353   :  { %v2796_v51 = vsel %vm2728_vm1, %v6981_v59, 0 }
 0x354   :  { %12096 = vst [vmem:[#allocation9_spill] sm:$0xff] %v10289_v42  ;;  %v10295_v3 = vand.u32 4294901760, %v2796_v51  ;;  %v2660_v34 = vpop.f32.mrb[46].mxu0  ;;  %v3099_v35 = vand.u32 4294901760, %v3098_v43  ;;  %v11508_v16 = vand.u32 4294901760, %v10289_v42 }
 0x355   :  { %v6982_v28 = vadd.f32 %v2660_v34, %v10028_v36  ;;  %v2662_v38 = vpop.f32.mrb[47].mxu0 }
 0x356   :  { %v10300_v17 = vsub.f32 %v2796_v51, %v10295_v3  ;;  %6239 = vmatprep.mubr.f32.mxu1 %v3099_v35  ;;  %v3108_v49 = vsub.f32 %v10289_v42, %v11508_v16 }
 0x357   :  { %v2799_v20 = vsel %vm2728_vm1, %v6982_v28, 0 }
 0x358   :  { %12097 = vst [vmem:[#allocation12_spill] sm:$0xff] %v10300_v17  ;;  %v10306_v59 = vand.u32 4294901760, %v2799_v20  ;;  %v2667_v10 = vpop.f32.mrb[48].mxu0  ;;  %v3109_v6 = vand.u32 4294901760, %v3108_v49  ;;  %v11511_v43 = vand.u32 4294901760, %v10300_v17 }
 0x359   :  { %v6983_v23 = vadd.f32 %v2667_v10, %v10030_v19  ;;  %v2669_v36 = vpop.f32.mrb[49].mxu0 }
 0x35a   :  { %v10311_v34 = vsub.f32 %v2799_v20, %v10306_v59  ;;  %6240 = vmatmul.mubr.f32.gmra.mrb[84].mxu1 %v3109_v6  ;;  %v3118_v35 = vsub.f32 %v10300_v17, %v11511_v43 }
 0x35b   :  { %v2802_v51 = vsel %vm2728_vm1, %v6983_v23, 0 }
 0x35c   :  { %12098 = vst [vmem:[#allocation13_spill] sm:$0xff] %v10311_v34  ;;  %v10317_v28 = vand.u32 4294901760, %v2802_v51  ;;  %v2674_v38 = vpop.f32.mrb[50].mxu0  ;;  %v3119_v16 = vand.u32 4294901760, %v3118_v35  ;;  %v11514_v49 = vand.u32 4294901760, %v10311_v34 }
 0x35d   :  { %v6984_v42 = vadd.f32 %v2674_v38, %v10032_v18  ;;  %v2676_v19 = vpop.f32.mrb[51].mxu0 }
 0x35e   :  { %12099 = vst [vmem:[#allocation14_spill] sm:$0xff] %v10317_v28  ;;  %v10322_v10 = vsub.f32 %v2802_v51, %v10317_v28  ;;  %6242 = vmatprep.mubr.f32.mxu1 %v3119_v16  ;;  %v3128_v6 = vsub.f32 %v10311_v34, %v11514_v49 }
 0x35f   :  { %v2805_v20 = vsel %vm2728_vm1, %v6984_v42, 0 }
 0x360   :  { %12100 = vst [vmem:[#allocation15_spill] sm:$0xff] %v10322_v10  ;;  %v10328_v23 = vand.u32 4294901760, %v2805_v20  ;;  %v2681_v36 = vpop.f32.mrb[52].mxu0  ;;  %v3129_v43 = vand.u32 4294901760, %v3128_v6  ;;  %v11517_v35 = vand.u32 4294901760, %v10322_v10 }
 0x361   :  { %v6985_v17 = vadd.f32 %v2681_v36, %v10034_v13  ;;  %v2683_v18 = vpop.f32.mrb[53].mxu0 }
 0x362   :  { %12101 = vst [vmem:[#allocation16_spill] sm:$0xff] %v10328_v23  ;;  %v10333_v38 = vsub.f32 %v2805_v20, %v10328_v23  ;;  %6243 = vmatmul.mubr.f32.gmra.mrb[86].mxu1 %v3129_v43  ;;  %v3138_v16 = vsub.f32 %v10322_v10, %v11517_v35 }
 0x363   :  { %v2808_v51 = vsel %vm2728_vm1, %v6985_v17, 0 }
 0x364   :  { %12102 = vst [vmem:[#allocation17_spill] sm:$0xff] %v10333_v38  ;;  %v10339_v42 = vand.u32 4294901760, %v2808_v51  ;;  %v2688_v19 = vpop.f32.mrb[54].mxu0  ;;  %v3139_v49 = vand.u32 4294901760, %v3138_v16  ;;  %v11520_v6 = vand.u32 4294901760, %v10333_v38 }
 0x365   :  { %v6986_v34 = vadd.f32 %v2688_v19, %v10036_v60  ;;  %v2690_v13 = vpop.f32.mrb[55].mxu0 }
 0x366   :  { %12103 = vst [vmem:[#allocation20_spill] sm:$0xff] %v10339_v42  ;;  %v10344_v36 = vsub.f32 %v2808_v51, %v10339_v42  ;;  %6245 = vmatprep.mubr.f32.mxu1 %v3139_v49  ;;  %v3148_v43 = vsub.f32 %v10333_v38, %v11520_v6 }
 0x367   :  { %v2811_v20 = vsel %vm2728_vm1, %v6986_v34, 0 }
 0x368   :  { %12104 = vst [vmem:[#allocation23_spill] sm:$0xff] %v10344_v36  ;;  %v10350_v17 = vand.u32 4294901760, %v2811_v20  ;;  %v2695_v18 = vpop.f32.mrb[56].mxu0  ;;  %v3149_v35 = vand.u32 4294901760, %v3148_v43  ;;  %v11523_v16 = vand.u32 4294901760, %v10344_v36 }
 0x369   :  { %v6987_v10 = vadd.f32 %v2695_v18, %v10038_v37  ;;  %v2697_v60 = vpop.f32.mrb[57].mxu0 }
 0x36a   :  { %12105 = vst [vmem:[#allocation27_spill] sm:$0xff] %v10350_v17  ;;  %v10355_v19 = vsub.f32 %v2811_v20, %v10350_v17  ;;  %6246 = vmatmul.mubr.f32.gmra.mrb[88].mxu1 %v3149_v35  ;;  %v3158_v49 = vsub.f32 %v10344_v36, %v11523_v16 }
 0x36b   :  { %v2814_v51 = vsel %vm2728_vm1, %v6987_v10, 0 }
 0x36c   :  { %12106 = vst [vmem:[#allocation28_spill] sm:$0xff] %v10355_v19  ;;  %v10361_v34 = vand.u32 4294901760, %v2814_v51  ;;  %v2702_v13 = vpop.f32.mrb[58].mxu0  ;;  %v3159_v6 = vand.u32 4294901760, %v3158_v49  ;;  %v11526_v43 = vand.u32 4294901760, %v10355_v19 }
 0x36d   :  { %v6988_v38 = vadd.f32 %v2702_v13, %v10040_v41  ;;  %v2704_v37 = vpop.f32.mrb[59].mxu0 }
 0x36e   :  { %12107 = vst [vmem:[#allocation33_spill] sm:$0xff] %v10361_v34  ;;  %v10366_v18 = vsub.f32 %v2814_v51, %v10361_v34  ;;  %6248 = vmatprep.mubr.f32.mxu1 %v3159_v6  ;;  %v3168_v35 = vsub.f32 %v10355_v19, %v11526_v43 }
 0x36f   :  { %v2817_v20 = vsel %vm2728_vm1, %v6988_v38, 0 }
 0x370   :  { %v10372_v10 = vand.u32 4294901760, %v2817_v20  ;;  %v2709_v60 = vpop.f32.mrb[60].mxu0  ;;  %v3169_v16 = vand.u32 4294901760, %v3168_v35  ;;  %v11529_v49 = vand.u32 4294901760, %v10366_v18 }
 0x371   :  { %v6989_v36 = vadd.f32 %v2709_v60, %v10042_v15  ;;  %v2711_v41 = vpop.f32.mrb[61].mxu0 }
 0x372   :  { %12108 = vst [vmem:[#allocation34_spill] sm:$0xff] %v10372_v10  ;;  %v10377_v13 = vsub.f32 %v2817_v20, %v10372_v10  ;;  %6249 = vmatmul.mubr.f32.gmra.mrb[90].mxu1 %v3169_v16  ;;  %v3178_v6 = vsub.f32 %v10366_v18, %v11529_v49 }
 0x373   :  { %v2820_v51 = vsel %vm2728_vm1, %v6989_v36, 0 }
 0x374   :  { %v10383_v38 = vand.u32 4294901760, %v2820_v51  ;;  %v2716_v37 = vpop.f32.mrb[62].mxu0  ;;  %v3179_v43 = vand.u32 4294901760, %v3178_v6  ;;  %v11532_v35 = vand.u32 4294901760, %v10377_v13 }
 0x375   :  { %v6990_v19 = vadd.f32 %v2716_v37, %v10047_v55  ;;  %v2718_v15 = vpop.f32.mrb[63].mxu0 }
 0x376   :  { %12109 = vst [vmem:[#allocation36_spill] sm:$0xff] %v10383_v38  ;;  %v10388_v60 = vsub.f32 %v2820_v51, %v10383_v38  ;;  %6251 = vmatprep.mubr.f32.mxu1 %v3179_v43  ;;  %v3188_v16 = vsub.f32 %v10377_v13, %v11532_v35  ;;  %v12112_v15 = vld [vmem:[#allocation3_spill] sm:$0xff]  ;;  %v12122_v35 = vld [vmem:[#allocation17_spill] sm:$0xff] }
 0x377   :  { %v2823_v20 = vsel %vm2728_vm1, %v6990_v19, 0 }
 0x378   :  { %v10394_v36 = vand.u32 4294901760, %v2823_v20  ;;  %v3189_v41 = vand.u32 4294901760, %v3188_v16  ;;  %v11531_v6 = vand.u32 4294901760, %v10388_v60  ;;  %v12113_v16 = vld [vmem:[#allocation4_spill] sm:$0xff] }
 0x37a   :  { %12110 = vst [vmem:[#allocation39_spill] sm:$0xff] %v10394_v36  ;;  %v10398_v49 = vsub.f32 %v2823_v20, %v10394_v36  ;;  %6252 = vmatmul.mubr.f32.gmra.mrb[92].mxu1 %v3189_v41  ;;  %v3198_v55 = vsub.f32 %v10388_v60, %v11531_v6  ;;  %v12114_v20 = vld [vmem:[#allocation5_spill] sm:$0xff]  ;;  %v12115_v41 = vld [vmem:[#allocation6_spill] sm:$0xff]  ;;  %v12121_v6 = vld [vmem:[#allocation15_spill] sm:$0xff] }
 0x37c   :  { %v3199_v43 = vand.u32 4294901760, %v3198_v55  ;;  %v11530_v51 = vand.u32 4294901760, %v10398_v49  ;;  %v12116_v55 = vld [vmem:[#allocation7_spill] sm:$0xff] }
 0x37e   :  { %6254 = vmatprep.mubr.f32.mxu1 %v3199_v43  ;;  %v3208_v19 = vsub.f32 %v10398_v49, %v11530_v51  ;;  %v12117_v43 = vld [vmem:[#allocation8_spill] sm:$0xff]  ;;  %v12120_v51 = vld [vmem:[#allocation13_spill] sm:$0xff] }
 0x380   :  { %v3209_v37 = vand.u32 4294901760, %v3208_v19  ;;  %v12118_v19 = vld [vmem:[#allocation9_spill] sm:$0xff] }
 0x382   :  { %6255 = vmatmul.mubr.f32.gmra.mrb[94].mxu1 %v3209_v37  ;;  %v12119_v37 = vld [vmem:[#allocation12_spill] sm:$0xff] }
 0x383   :  { %6259 = vmatprep.mubr.f32.mxu1 %v10056_v56 }
 0x386   :  { %6260 = vmatmul.mubr.f32.vlgmr.msra.gmra.mrb[64].mxu1 %v10063_v29 }
 0x387   :  { %6262 = vmatprep.mubr.f32.mxu1 %v10075_v0  ;;  %6308 = vmatpush3.msra.mxu1 %v10045_v48  ;;  %v12111_v48 = vld [vmem:[#allocation2_spill] sm:$0xff] }
 0x388   :  { %6357 = vmatprep.subr.mxu1 %v9993_v63 }
 0x38a   :  { %6263 = vmatmul.mubr.f32.gmra.mrb[66].mxu1 %v10085_v30 }
 0x38b   :  { %6265 = vmatprep.mubr.f32.mxu1 %v10096_v52 }
 0x38e   :  { %6266 = vmatmul.mubr.f32.gmra.mrb[68].mxu1 %v10108_v11 }
 0x38f   :  { %6268 = vmatprep.mubr.f32.mxu1 %v10119_v50 }
 0x392   :  { %6269 = vmatmul.mubr.f32.gmra.mrb[70].mxu1 %v10130_v44 }
 0x393   :  { %6271 = vmatprep.mubr.f32.mxu1 %v10141_v54 }
 0x396   :  { %6272 = vmatmul.mubr.f32.gmra.mrb[72].mxu1 %v10152_v27 }
 0x397   :  { %6274 = vmatprep.mubr.f32.mxu1 %v10163_v12 }
 0x39a   :  { %6275 = vmatmul.mubr.f32.gmra.mrb[74].mxu1 %v10174_v5 }
 0x39b   :  { %6277 = vmatprep.mubr.f32.mxu1 %v10185_v24 }
 0x39e   :  { %6278 = vmatmul.mubr.f32.gmra.mrb[76].mxu1 %v10196_v40 }
 0x39f   :  { %6280 = vmatprep.mubr.f32.mxu1 %v10207_v46 }
 0x3a2   :  { %6281 = vmatmul.mubr.f32.gmra.mrb[78].mxu1 %v10218_v22 }
 0x3a3   :  { %6283 = vmatprep.mubr.f32.mxu1 %v10229_v39 }
 0x3a6   :  { %6284 = vmatmul.mubr.f32.gmra.mrb[80].mxu1 %v10240_v53 }
 0x3a7   :  { %6286 = vmatprep.mubr.f32.mxu1 %v10251_v32 }
 0x3aa   :  { %6287 = vmatmul.mubr.f32.gmra.mrb[82].mxu1 %v10262_v4 }
 0x3ab   :  { %6289 = vmatprep.mubr.f32.mxu1 %v10273_v9 }
 0x3ae   :  { %6290 = vmatmul.mubr.f32.gmra.mrb[84].mxu1 %v10284_v1 }
 0x3af   :  { %6292 = vmatprep.mubr.f32.mxu1 %v10295_v3 }
 0x3b2   :  { %6293 = vmatmul.mubr.f32.gmra.mrb[86].mxu1 %v10306_v59 }
 0x3b3   :  { %6295 = vmatprep.mubr.f32.mxu1 %v10317_v28  ;;  %v12130_v28 = vand.u32 4294901760, %v10113_v21 }
 0x3b6   :  { %6296 = vmatmul.mubr.f32.gmra.mrb[88].mxu1 %v10328_v23  ;;  %v12129_v23 = vand.u32 4294901760, %v10102_v31 }
 0x3b7   :  { %6298 = vmatprep.mubr.f32.mxu1 %v10339_v42  ;;  %v12128_v42 = vand.u32 4294901760, %v10090_v57 }
 0x3ba   :  { %6299 = vmatmul.mubr.f32.gmra.mrb[90].mxu1 %v10350_v17  ;;  %v12127_v17 = vand.u32 4294901760, %v10082_v33 }
 0x3bb   :  { %6301 = vmatprep.mubr.f32.mxu1 %v10361_v34  ;;  %v12126_v34 = vand.u32 4294901760, %v10068_v45 }
 0x3be   :  { %6302 = vmatmul.mubr.f32.gmra.mrb[92].mxu1 %v10372_v10  ;;  %v12125_v10 = vand.u32 4294901760, %v10060_v25 }
 0x3bf   :  { %6304 = vmatprep.mubr.f32.mxu1 %v10383_v38  ;;  %v12124_v38 = vld [vmem:[#allocation28_spill] sm:$0xff] }
 0x3c2   :  { %6305 = vmatmul.mubr.f32.gmra.mrb[94].mxu1 %v10394_v36  ;;  %v12123_v36 = vld [vmem:[#allocation23_spill] sm:$0xff] }
 0x3c3   :  { %6309 = vmatprep.mubr.f32.mxu1 %v10060_v25  ;;  %v12131_v25 = vand.u32 4294901760, %v10124_v62 }
 0x3c6   :  { %6310 = vmatmul.mubr.f32.vlgmr.msra.gmra.mrb[64].mxu1 %v10068_v45  ;;  %v12132_v45 = vand.u32 4294901760, %v10135_v14 }
 0x3c7   :  { %6312 = vmatprep.mubr.f32.mxu1 %v10082_v33  ;;  %6358 = vmatpush3.msra.mxu1 %v9993_v63  ;;  %v12133_v33 = vand.u32 4294901760, %v10146_v26 }
 0x3c8   :  { %6407 = vmatprep.subr.mxu1 %v10050_v47 }
 0x3ca   :  { %6313 = vmatmul.mubr.f32.gmra.mrb[66].mxu1 %v10090_v57  ;;  %v12135_v57 = vand.u32 4294901760, %v10168_v58 }
 0x3cb   :  { %6315 = vmatprep.mubr.f32.mxu1 %v10102_v31  ;;  %v12136_v31 = vand.u32 4294901760, %v10179_v8 }
 0x3ce   :  { %6316 = vmatmul.mubr.f32.gmra.mrb[68].mxu1 %v10113_v21  ;;  %v12137_v21 = vand.u32 4294901760, %v10190_v2 }
 0x3cf   :  { %6318 = vmatprep.mubr.f32.mxu1 %v10124_v62  ;;  %v12138_v62 = vand.u32 4294901760, %v10201_v7 }
 0x3d2   :  { %6319 = vmatmul.mubr.f32.gmra.mrb[70].mxu1 %v10135_v14  ;;  %v12139_v14 = vand.u32 4294901760, %v12111_v48 }
 0x3d3   :  { %6321 = vmatprep.mubr.f32.mxu1 %v10146_v26  ;;  %v12140_v26 = vand.u32 4294901760, %v12112_v15 }
 0x3d6   :  { %6322 = vmatmul.mubr.f32.gmra.mrb[72].mxu1 %v10157_v61 }
 0x3d7   :  { %6324 = vmatprep.mubr.f32.mxu1 %v10168_v58  ;;  %v12142_v58 = vand.u32 4294901760, %v12114_v20 }
 0x3da   :  { %6325 = vmatmul.mubr.f32.gmra.mrb[74].mxu1 %v10179_v8  ;;  %v12143_v8 = vand.u32 4294901760, %v12115_v41 }
 0x3db   :  { %6327 = vmatprep.mubr.f32.mxu1 %v10190_v2  ;;  %v12144_v2 = vand.u32 4294901760, %v12116_v55 }
 0x3de   :  { %6328 = vmatmul.mubr.f32.gmra.mrb[76].mxu1 %v10201_v7  ;;  %v12145_v7 = vand.u32 4294901760, %v12117_v43 }
 0x3df   :  { %6330 = vmatprep.mubr.f32.mxu1 %v12111_v48  ;;  %v12152_v48 = vand.u32 4294901760, %v12124_v38 }
 0x3e2   :  { %6331 = vmatmul.mubr.f32.gmra.mrb[78].mxu1 %v12112_v15  ;;  %v12153_v15 = vand.u32 4294901760, %v10366_v18 }
 0x3e3   :  { %6333 = vmatprep.mubr.f32.mxu1 %v12113_v16 }
 0x3e6   :  { %6334 = vmatmul.mubr.f32.gmra.mrb[80].mxu1 %v12114_v20  ;;  %v5030_v20 = vld [vmem:[%s11123_s4 + $0x30] sm:$0xff] }
 0x3e7   :  { %6336 = vmatprep.mubr.f32.mxu1 %v12115_v41  ;;  %v5036_v41 = vld [vmem:[%s11123_s4 + $0x60] sm:$0xff] }
 0x3ea   :  { %6337 = vmatmul.mubr.f32.gmra.mrb[82].mxu1 %v12116_v55  ;;  %v5027_v55 = vld [vmem:[%s11123_s4 + $0x18] sm:$0xff] }
 0x3eb   :  { %6339 = vmatprep.mubr.f32.mxu1 %v12117_v43  ;;  %v5031_v43 = vld [vmem:[%s11123_s4 + $0x38] sm:$0xff] }
 0x3ee   :  { %6340 = vmatmul.mubr.f32.gmra.mrb[84].mxu1 %v12118_v19 }
 0x3ef   :  { %6342 = vmatprep.mubr.f32.mxu1 %v12119_v37 }
 0x3f2   :  { %6343 = vmatmul.mubr.f32.gmra.mrb[86].mxu1 %v12120_v51 }
 0x3f3   :  { %6345 = vmatprep.mubr.f32.mxu1 %v12121_v6 }
 0x3f6   :  { %6346 = vmatmul.mubr.f32.gmra.mrb[88].mxu1 %v12122_v35 }
 0x3f7   :  { %6348 = vmatprep.mubr.f32.mxu1 %v12123_v36 }
 0x3fa   :  { %6349 = vmatmul.mubr.f32.gmra.mrb[90].mxu1 %v12124_v38  ;;  %v5024_v38 = vld [vmem:[%s11123_s4] sm:$0xff] }
 0x3fb   :  { %6351 = vmatprep.mubr.f32.mxu1 %v10366_v18  ;;  %v5025_v18 = vld [vmem:[%s11123_s4 + $0x8] sm:$0xff] }
 0x3fe   :  { %6352 = vmatmul.mubr.f32.gmra.mrb[92].mxu1 %v10377_v13 }
 0x3ff   :  { %6354 = vmatprep.mubr.f32.mxu1 %v10388_v60 }
 0x402   :  { %6355 = vmatmul.mubr.f32.gmra.mrb[94].mxu1 %v10398_v49 }
 0x403   :  { %6359 = vmatprep.mubr.f32.mxu1 %v12125_v10  ;;  %v12151_v10 = vand.u32 4294901760, %v12123_v36  ;;  %v5033_v36 = vld [vmem:[%s11123_s4 + $0x48] sm:$0xff] }
 0x406   :  { %6360 = vmatmul.mubr.f32.vlgmr.msra.gmra.mrb[64].mxu1 %v12126_v34  ;;  %v12150_v34 = vand.u32 4294901760, %v12122_v35  ;;  %v7661_v35 = vmov 0  }
 0x407   :  { %6362 = vmatprep.mubr.f32.mxu1 %v12127_v17  ;;  %6408 = vmatpush3.msra.mxu1 %v10050_v47  ;;  %v12134_v47 = vand.u32 4294901760, %v10157_v61  ;;  %v12141_v61 = vand.u32 4294901760, %v12113_v16  ;;  %v12149_v17 = vand.u32 4294901760, %v12121_v6  ;;  %v12154_v16 = vand.u32 4294901760, %v10377_v13  ;;  %v5029_v13 = vld [vmem:[%s11123_s4 + $0x28] sm:$0xff] }
 0x408   :  { %6457 = vmatprep.subr.mxu1 %v9993_v63  ;;  %v12156_v6 = vand.u32 4294901760, %v10398_v49  ;;  %7466 = vset.pattern.permute.xlu0 %v7661_v35  ;;  %v5028_v49 = vld [vmem:[%s11123_s4 + $0x20] sm:$0xff] }
 0x409   :  { %7467 = vset.pattern.permute.xlu1 %v7661_v35  ;;  %5058 = vperm.xlu0 %7466, %v5024_v38   ;;  %v12164_v35 = vld [vmem:[#allocation39_spill] sm:$0xff] }
 0x40a   :  { %6363 = vmatmul.mubr.f32.gmra.mrb[66].mxu1 %v12128_v42  ;;  %v12148_v42 = vand.u32 4294901760, %v12120_v51  ;;  %v12155_v51 = vand.u32 4294901760, %v10388_v60  ;;  %5063 = vperm.xlu1 %7467, %v5025_v18   ;;  %v5032_v60 = vld [vmem:[%s11123_s4 + $0x40] sm:$0xff] }
 0x40b   :  { %6365 = vmatprep.mubr.f32.mxu1 %v12129_v23  ;;  %v12147_v23 = vand.u32 4294901760, %v12119_v37  ;;  %v5034_v37 = vld [vmem:[%s11123_s4 + $0x50] sm:$0xff] }
 0x40d   :  { %5078 = vperm.xlu0 %7466, %v5028_v49  }
 0x40e   :  { %6366 = vmatmul.mubr.f32.gmra.mrb[68].mxu1 %v12130_v28  ;;  %v12146_v28 = vand.u32 4294901760, %v12118_v19  ;;  %5083 = vperm.xlu1 %7467, %v5029_v13   ;;  %v5037_v19 = vld [vmem:[%s11123_s4 + $0x68] sm:$0xff] }
 0x40f   :  { %6368 = vmatprep.mubr.f32.mxu1 %v12131_v25  ;;  %v5040_v25 = vld [vmem:[%s11123_s4 + $0x80] sm:$0xff] }
 0x411   :  { %5098 = vperm.xlu0 %7466, %v5032_v60  }
 0x412   :  { %6369 = vmatmul.mubr.f32.gmra.mrb[70].mxu1 %v12132_v45  ;;  %5103 = vperm.xlu1 %7467, %v5033_v36   ;;  %v5041_v45 = vld [vmem:[%s11123_s4 + $0x88] sm:$0xff] }
 0x413   :  { %6371 = vmatprep.mubr.f32.mxu1 %v12133_v33  ;;  %v5035_v33 = vld [vmem:[%s11123_s4 + $0x58] sm:$0xff] }
 0x416   :  { %6372 = vmatmul.mubr.f32.gmra.mrb[72].mxu1 %v12134_v47  ;;  %5088 = vperm.xlu1 %7467, %v5030_v20   ;;  %v5038_v47 = vld [vmem:[%s11123_s4 + $0x70] sm:$0xff]  ;;  %v10765_v20 = vld [vmem:[%s11125_s5 + $0x8] sm:$0xff] }
 0x417   :  { %6374 = vmatprep.mubr.f32.mxu1 %v12135_v57  ;;  %v5044_v57 = vld [vmem:[%s11123_s4 + $0xa0] sm:$0xff] }
 0x41a   :  { %6375 = vmatmul.mubr.f32.gmra.mrb[74].mxu1 %v12136_v31  ;;  %5073 = vperm.xlu1 %7467, %v5027_v55   ;;  %v5045_v31 = vld [vmem:[%s11123_s4 + $0xa8] sm:$0xff] }
 0x41b   :  { %6377 = vmatprep.mubr.f32.mxu1 %v12137_v21  ;;  %v5039_v21 = vld [vmem:[%s11123_s4 + $0x78] sm:$0xff] }
 0x41e   :  { %6378 = vmatmul.mubr.f32.gmra.mrb[76].mxu1 %v12138_v62  ;;  %5123 = vperm.xlu1 %7467, %v5037_v19   ;;  %v5042_v62 = vld [vmem:[%s11123_s4 + $0x90] sm:$0xff] }
 0x41f   :  { %6380 = vmatprep.mubr.f32.mxu1 %v12139_v14  ;;  %v5048_v14 = vld [vmem:[%s11123_s4 + $0xc0] sm:$0xff] }
 0x422   :  { %6381 = vmatmul.mubr.f32.gmra.mrb[78].mxu1 %v12140_v26  ;;  %5138 = vperm.xlu1 %7467, %v5040_v25   ;;  %v5043_v26 = vld [vmem:[%s11123_s4 + $0x98] sm:$0xff] }
 0x423   :  { %6383 = vmatprep.mubr.f32.mxu1 %v12141_v61  ;;  %v5049_v61 = vld [vmem:[%s11123_s4 + $0xc8] sm:$0xff] }
 0x426   :  { %6384 = vmatmul.mubr.f32.gmra.mrb[80].mxu1 %v12142_v58  ;;  %5113 = vperm.xlu1 %7467, %v5035_v33   ;;  %v5046_v58 = vld [vmem:[%s11123_s4 + $0xb0] sm:$0xff] }
 0x427   :  { %6386 = vmatprep.mubr.f32.mxu1 %v12143_v8  ;;  %v5052_v8 = vld [vmem:[%s11123_s4 + $0xe0] sm:$0xff] }
 0x42a   :  { %6387 = vmatmul.mubr.f32.gmra.mrb[82].mxu1 %v12144_v2  ;;  %5158 = vperm.xlu1 %7467, %v5044_v57   ;;  %v12157_v2 = vld [vmem:[#allocation14_spill] sm:$0xff] }
 0x42b   :  { %6389 = vmatprep.mubr.f32.mxu1 %v12145_v7  ;;  %v5047_v7 = vld [vmem:[%s11123_s4 + $0xb8] sm:$0xff] }
 0x42e   :  { %6390 = vmatmul.mubr.f32.gmra.mrb[84].mxu1 %v12146_v28  ;;  %5133 = vperm.xlu1 %7467, %v5039_v21   ;;  %v12158_v28 = vld [vmem:[#allocation16_spill] sm:$0xff] }
 0x42f   :  { %6392 = vmatprep.mubr.f32.mxu1 %v12147_v23  ;;  %v5053_v23 = vld [vmem:[%s11123_s4 + $0xe8] sm:$0xff] }
 0x432   :  { %6393 = vmatmul.mubr.f32.gmra.mrb[86].mxu1 %v12148_v42  ;;  %5178 = vperm.xlu1 %7467, %v5048_v14   ;;  %v12159_v42 = vld [vmem:[#allocation20_spill] sm:$0xff] }
 0x433   :  { %6395 = vmatprep.mubr.f32.mxu1 %v12149_v17  ;;  %v5050_v17 = vld [vmem:[%s11123_s4 + $0xd0] sm:$0xff] }
 0x436   :  { %6396 = vmatmul.mubr.f32.gmra.mrb[88].mxu1 %v12150_v34  ;;  %5183 = vperm.xlu1 %7467, %v5049_v61   ;;  %v12160_v34 = vld [vmem:[#allocation27_spill] sm:$0xff] }
 0x437   :  { %6398 = vmatprep.mubr.f32.mxu1 %v12151_v10  ;;  %v5051_v10 = vld [vmem:[%s11123_s4 + $0xd8] sm:$0xff] }
 0x43a   :  { %6399 = vmatmul.mubr.f32.gmra.mrb[90].mxu1 %v12152_v48  ;;  %5198 = vperm.xlu1 %7467, %v5052_v8   ;;  %v12161_v48 = vld [vmem:[#allocation33_spill] sm:$0xff] }
 0x43b   :  { %6401 = vmatprep.mubr.f32.mxu1 %v12153_v15  ;;  %v5054_v15 = vld [vmem:[%s11123_s4 + $0xf0] sm:$0xff] }
 0x43e   :  { %6402 = vmatmul.mubr.f32.gmra.mrb[92].mxu1 %v12154_v16  ;;  %5203 = vperm.xlu1 %7467, %v5053_v23   ;;  %v12162_v16 = vld [vmem:[#allocation34_spill] sm:$0xff] }
 0x43f   :  { %6404 = vmatprep.mubr.f32.mxu1 %v12155_v51  ;;  %v5055_v51 = vld [vmem:[%s11123_s4 + $0xf8] sm:$0xff] }
 0x442   :  { %6405 = vmatmul.mubr.f32.gmra.mrb[94].mxu1 %v12156_v6  ;;  %5193 = vperm.xlu1 %7467, %v5051_v10   ;;  %v12163_v6 = vld [vmem:[#allocation36_spill] sm:$0xff] }
 0x443   :  { %6409 = vmatprep.mubr.f32.mxu1 %v10056_v56 }
 0x446   :  { %6410 = vmatmul.mubr.f32.vlgmr.msra.gmra.mrb[64].mxu1 %v10063_v29  ;;  %5213 = vperm.xlu1 %7467, %v5055_v51  }
 0x447   :  { %6412 = vmatprep.mubr.f32.mxu1 %v10075_v0  ;;  %6458 = vmatpush3.msra.mxu1 %v9993_v63  ;;  %v5026_v63 = vld [vmem:[%s11123_s4 + $0x10] sm:$0xff] }
 0x448   :  { %5068 = vperm.xlu0 %7466, %v5026_v63   ;;  %v10760_v63 = vld [vmem:[%s11125_s5] sm:$0xff] }
 0x44a   :  { %6413 = vmatmul.mubr.f32.gmra.mrb[66].mxu1 %v10085_v30 }
 0x44b   :  { %6415 = vmatprep.mubr.f32.mxu1 %v10096_v52 }
 0x44c   :  { %5118 = vperm.xlu0 %7466, %v5036_v41  }
 0x44e   :  { %6416 = vmatmul.mubr.f32.gmra.mrb[68].mxu1 %v10108_v11 }
 0x44f   :  { %6418 = vmatprep.mubr.f32.mxu1 %v10119_v50 }
 0x450   :  { %5093 = vperm.xlu0 %7466, %v5031_v43   ;;  %v5305_v43 = vand.u32 4294901760, %v10760_v63 }
 0x452   :  { %6419 = vmatmul.mubr.f32.gmra.mrb[70].mxu1 %v10130_v44 }
 0x453   :  { %6421 = vmatprep.mubr.f32.mxu1 %v10141_v54 }
 0x454   :  { %5108 = vperm.xlu0 %7466, %v5034_v37  }
 0x456   :  { %6422 = vmatmul.mubr.f32.gmra.mrb[72].mxu1 %v10152_v27 }
 0x457   :  { %6424 = vmatprep.mubr.f32.mxu1 %v10163_v12 }
 0x458   :  { %5143 = vperm.xlu0 %7466, %v5041_v45   ;;  %v11549_v45 = vand.u32 4294901760, %v10765_v20 }
 0x45a   :  { %6425 = vmatmul.mubr.f32.gmra.mrb[74].mxu1 %v10174_v5 }
 0x45b   :  { %6427 = vmatprep.mubr.f32.mxu1 %v10185_v24 }
 0x45c   :  { %5128 = vperm.xlu0 %7466, %v5038_v47   ;;  %v10782_v47 = vpack.c.bf16 %v11549_v45, %v5305_v43 }
 0x45e   :  { %6428 = vmatmul.mubr.f32.gmra.mrb[76].mxu1 %v10196_v40  ;;  %12165 = vst [vmem:[#allocation40_spill] sm:$0xff] %v10782_v47  ;;  %6880 = vmatprep.subr.bf16.mxu1 %v10782_v47 }
 0x45f   :  { %6430 = vmatprep.mubr.f32.mxu1 %v10207_v46 }
 0x460   :  { %5163 = vperm.xlu0 %7466, %v5045_v31  }
 0x462   :  { %6431 = vmatmul.mubr.f32.gmra.mrb[78].mxu1 %v10218_v22 }
 0x463   :  { %6433 = vmatprep.mubr.f32.mxu1 %v10229_v39 }
 0x464   :  { %5148 = vperm.xlu0 %7466, %v5042_v62  }
 0x466   :  { %6434 = vmatmul.mubr.f32.gmra.mrb[80].mxu1 %v10240_v53 }
 0x467   :  { %6436 = vmatprep.mubr.f32.mxu1 %v10251_v32 }
 0x468   :  { %5153 = vperm.xlu0 %7466, %v5043_v26  }
 0x46a   :  { %6437 = vmatmul.mubr.f32.gmra.mrb[82].mxu1 %v10262_v4 }
 0x46b   :  { %6439 = vmatprep.mubr.f32.mxu1 %v10273_v9 }
 0x46c   :  { %5168 = vperm.xlu0 %7466, %v5046_v58  }
 0x46e   :  { %6440 = vmatmul.mubr.f32.gmra.mrb[84].mxu1 %v10284_v1 }
 0x46f   :  { %6442 = vmatprep.mubr.f32.mxu1 %v10295_v3 }
 0x470   :  { %5173 = vperm.xlu0 %7466, %v5047_v7  }
 0x472   :  { %6443 = vmatmul.mubr.f32.gmra.mrb[86].mxu1 %v10306_v59 }
 0x473   :  { %6445 = vmatprep.mubr.f32.mxu1 %v12157_v2 }
 0x474   :  { %5188 = vperm.xlu0 %7466, %v5050_v17  }
 0x476   :  { %6446 = vmatmul.mubr.f32.gmra.mrb[88].mxu1 %v12158_v28 }
 0x477   :  { %6448 = vmatprep.mubr.f32.mxu1 %v12159_v42 }
 0x478   :  { %5208 = vperm.xlu0 %7466, %v5054_v15  }
 0x47a   :  { %6449 = vmatmul.mubr.f32.gmra.mrb[90].mxu1 %v12160_v34 }
 0x47b   :  { %6451 = vmatprep.mubr.f32.mxu1 %v12161_v48 }
 0x47e   :  { %6452 = vmatmul.mubr.f32.gmra.mrb[92].mxu1 %v12162_v16 }
 0x47f   :  { %6454 = vmatprep.mubr.f32.mxu1 %v12163_v6 }
 0x482   :  { %6455 = vmatmul.mubr.f32.gmra.mrb[94].mxu1 %v12164_v35 }
 0x483   :  { %6459 = vmatprep.mubr.f32.mxu1 %v10056_v56  ;;  %v10705_v56 = vld [vmem:[%s11124_s3] ss:$0 sm:$0xff]  ;;  %s7662_s3 = smov 96  }
 0x486   :  { %6460 = vmatmul.mubr.f32.vlgmr.msra.gmra.mrb[64].mxu1 %v10063_v29 }
 0x487   :  { %6462 = vmatprep.mubr.f32.mxu1 %v10075_v0  ;;  %6882 = vmatpush3.bf16.msra.mxu1 %v10782_v47 }
 0x488   :  { %v10799_v7 = vpop.permute.xlu0 %5058 }
 0x48a   :  { %6463 = vmatmul.mubr.f32.gmra.mrb[66].mxu1 %v10085_v30 }
 0x48b   :  { %6465 = vmatprep.mubr.f32.mxu1 %v10096_v52 }
 0x48e   :  { %6466 = vmatmul.mubr.f32.gmra.mrb[68].mxu1 %v10108_v11 }
 0x48f   :  { %6468 = vmatprep.mubr.f32.mxu1 %v10119_v50 }
 0x492   :  { %6469 = vmatmul.mubr.f32.gmra.mrb[70].mxu1 %v10130_v44 }
 0x493   :  { %6471 = vmatprep.mubr.f32.mxu1 %v10141_v54 }
 0x496   :  { %6472 = vmatmul.mubr.f32.gmra.mrb[72].mxu1 %v10152_v27 }
 0x497   :  { %6474 = vmatprep.mubr.f32.mxu1 %v10163_v12 }
 0x49a   :  { %6475 = vmatmul.mubr.f32.gmra.mrb[74].mxu1 %v10174_v5 }
 0x49b   :  { %6477 = vmatprep.mubr.f32.mxu1 %v10185_v24 }
 0x49e   :  { %6478 = vmatmul.mubr.f32.gmra.mrb[76].mxu1 %v10196_v40 }
 0x49f   :  { %6480 = vmatprep.mubr.f32.mxu1 %v10207_v46 }
 0x4a2   :  { %6481 = vmatmul.mubr.f32.gmra.mrb[78].mxu1 %v10218_v22 }
 0x4a3   :  { %6483 = vmatprep.mubr.f32.mxu1 %v10229_v39 }
 0x4a6   :  { %6484 = vmatmul.mubr.f32.gmra.mrb[80].mxu1 %v10240_v53 }
 0x4a7   :  { %6486 = vmatprep.mubr.f32.mxu1 %v10251_v32 }
 0x4aa   :  { %6487 = vmatmul.mubr.f32.gmra.mrb[82].mxu1 %v10262_v4 }
 0x4ab   :  { %6489 = vmatprep.mubr.f32.mxu1 %v10273_v9 }
 0x4ae   :  { %6490 = vmatmul.mubr.f32.gmra.mrb[84].mxu1 %v10284_v1 }
 0x4af   :  { %6492 = vmatprep.mubr.f32.mxu1 %v10295_v3 }
 0x4b2   :  { %6493 = vmatmul.mubr.f32.gmra.mrb[86].mxu1 %v10306_v59 }
 0x4b3   :  { %6495 = vmatprep.mubr.f32.mxu1 %v12157_v2 }
 0x4b6   :  { %6496 = vmatmul.mubr.f32.gmra.mrb[88].mxu1 %v12158_v28  ;;  %v10801_v28 = vpop.permute.xlu1 %5063 }
 0x4b7   :  { %6498 = vmatprep.mubr.f32.mxu1 %v12159_v42 }
 0x4ba   :  { %6499 = vmatmul.mubr.f32.gmra.mrb[90].mxu1 %v12160_v34 }
 0x4bb   :  { %6501 = vmatprep.mubr.f32.mxu1 %v12161_v48 }
 0x4be   :  { %6502 = vmatmul.mubr.f32.gmra.mrb[92].mxu1 %v12162_v16  ;;  %v10818_v16 = vpop.permute.xlu0 %5078 }
 0x4bf   :  { %6504 = vmatprep.mubr.f32.mxu1 %v12163_v6 }
 0x4c2   :  { %6505 = vmatmul.mubr.f32.gmra.mrb[94].mxu1 %v12164_v35  ;;  %v10824_v35 = vpop.permute.xlu1 %5083 }
 0x559   :  { %v6461_v29 = vpop.f32.mrb[64].mxu1 }
 0x55a   :  { %v10708_v0 = vadd.f32 %v6461_v29, %v10705_v56  ;;  %v4418_v30 = vpop.f32.mrb[65].mxu1 }
 0x55b   :  { %v10711_v52 = vadd.f32 %v10705_v56, %v4418_v30 }
 0x55c   :  { %7468 = vtanh.f32 %v10708_v0 }
 0x55d   :  { %7470 = vtanh.f32 %v10711_v52  ;;  %v6464_v11 = vpop.f32.mrb[66].mxu1 }
 0x55e   :  { %v10716_v50 = vadd.f32 %v6464_v11, %v10705_v56  ;;  %v4430_v44 = vpop.f32.mrb[67].mxu1 }
 0x55f   :  { %v10719_v54 = vadd.f32 %v10705_v56, %v4430_v44 }
 0x560   :  { %7472 = vtanh.f32 %v10716_v50 }
 0x561   :  { %7474 = vtanh.f32 %v10719_v54  ;;  %v6467_v27 = vpop.f32.mrb[68].mxu1 }
 0x562   :  { %v10724_v12 = vadd.f32 %v6467_v27, %v10705_v56  ;;  %v4442_v5 = vpop.f32.mrb[69].mxu1 }
 0x563   :  { %v10727_v24 = vadd.f32 %v10705_v56, %v4442_v5 }
 0x564   :  { %7476 = vtanh.f32 %v10724_v12 }
 0x565   :  { %7478 = vtanh.f32 %v10727_v24  ;;  %v6470_v40 = vpop.f32.mrb[70].mxu1 }
 0x566   :  { %v7469_v46 = vpop.eup %7468  ;;  %v10732_v22 = vadd.f32 %v6470_v40, %v10705_v56  ;;  %v4454_v39 = vpop.f32.mrb[71].mxu1 }
 0x567   :  { %v7471_v53 = vpop.eup %7470  ;;  %v10735_v32 = vadd.f32 %v10705_v56, %v4454_v39  ;;  %4898 = vrot.lane.b32.xlu0 %v7469_v46, %s7662_s3  ;;  %v10835_v39 = vpop.permute.xlu0 %5098 }
 0x568   :  { %7480 = vtanh.f32 %v10732_v22  ;;  %4896 = vrot.lane.b32.xlu1 %v7471_v53, %s7662_s3  ;;  %v10839_v53 = vpop.permute.xlu1 %5103 }
 0x569   :  { %7482 = vtanh.f32 %v10735_v32  ;;  %v6473_v4 = vpop.f32.mrb[72].mxu1 }
 0x56a   :  { %v7473_v9 = vpop.eup %7472  ;;  %v10742_v1 = vadd.f32 %v6473_v4, %v10705_v56  ;;  %v4466_v3 = vpop.f32.mrb[73].mxu1 }
 0x56b   :  { %v7475_v59 = vpop.eup %7474  ;;  %v10745_v38 = vadd.f32 %v10705_v56, %v4466_v3 }
 0x56c   :  { %7484 = vtanh.f32 %v10742_v1  ;;  %4900 = vrot.lane.b32.xlu0 %v7475_v59, %s7662_s3  ;;  %4902 = vrot.lane.b32.xlu1 %v7473_v9, %s7662_s3 }
 0x56d   :  { %7486 = vtanh.f32 %v10745_v38  ;;  %v6476_v18 = vpop.f32.mrb[74].mxu1 }
 0x56e   :  { %v7477_v49 = vpop.eup %7476  ;;  %v10752_v13 = vadd.f32 %v6476_v18, %v10705_v56  ;;  %v4478_v60 = vpop.f32.mrb[75].mxu1 }
 0x56f   :  { %v7479_v36 = vpop.eup %7478  ;;  %v10768_v41 = vadd.f32 %v10705_v56, %v4478_v60 }
 0x570   :  { %7488 = vtanh.f32 %v10752_v13  ;;  %4904 = vrot.lane.b32.xlu0 %v7479_v36, %s7662_s3  ;;  %4906 = vrot.lane.b32.xlu1 %v7477_v49, %s7662_s3  ;;  %v10855_v36 = vpop.permute.xlu0 %5068 }
 0x571   :  { %v6479_v55 = vpop.f32.mrb[76].mxu1 }
 0x572   :  { %v7481_v19 = vpop.eup %7480  ;;  %v10772_v37 = vadd.f32 %v6479_v55, %v10705_v56  ;;  %v4490_v25 = vpop.f32.mrb[77].mxu1 }
 0x573   :  { %v7483_v33 = vpop.eup %7482  ;;  %v10786_v57 = vadd.f32 %v10705_v56, %v4490_v25  ;;  %v10858_v25 = vpop.permute.xlu1 %5088 }
 0x574   :  { %7490 = vtanh.f32 %v10772_v37  ;;  %4910 = vrot.lane.b32.xlu0 %v7481_v19, %s7662_s3  ;;  %4908 = vrot.lane.b32.xlu1 %v7483_v33, %s7662_s3 }
 0x575   :  { %7492 = vtanh.f32 %v10768_v41  ;;  %v6482_v31 = vpop.f32.mrb[78].mxu1 }
 0x576   :  { %v7485_v21 = vpop.eup %7484  ;;  %v4502_v62 = vpop.f32.mrb[79].mxu1  ;;  %7494 = vtanh.f32 %v10786_v57  ;;  %v10794_v26 = vadd.f32 %v6482_v31, %v10705_v56 }
 0x577   :  { %v7487_v14 = vpop.eup %7486  ;;  %v10810_v42 = vadd.f32 %v10705_v56, %v4502_v62 }
 0x578   :  { %4912 = vrot.lane.b32.xlu0 %v7487_v14, %s7662_s3  ;;  %4914 = vrot.lane.b32.xlu1 %v7485_v21, %s7662_s3  ;;  %v10872_v14 = vld [vmem:[%s11125_s5 + $0x10] sm:$0xff] }
 0x579   :  { %v6485_v61 = vpop.f32.mrb[80].mxu1 }
 0x57a   :  { %v7489_v58 = vpop.eup %7488  ;;  %v10797_v8 = vadd.f32 %v6485_v61, %v10705_v56  ;;  %v4514_v2 = vpop.f32.mrb[81].mxu1  ;;  %v10877_v61 = vld [vmem:[%s11125_s5 + $0x18] sm:$0xff] }
 0x57b   :  { %v10805_v23 = vadd.f32 %v10705_v56, %v4514_v2 }
 0x57c   :  { %7496 = vtanh.f32 %v10797_v8  ;;  %4918 = vrot.lane.b32.xlu0 %v7489_v58, %s7662_s3 }
 0x57d   :  { %7498 = vtanh.f32 %v10794_v26  ;;  %v6488_v17 = vpop.f32.mrb[82].mxu1 }
 0x57e   :  { %v7491_v34 = vpop.eup %7490  ;;  %v4526_v10 = vpop.f32.mrb[83].mxu1  ;;  %7500 = vtanh.f32 %v10805_v23  ;;  %v10822_v51 = vadd.f32 %v6488_v17, %v10705_v56  ;;  %v5311_v17 = vand.u32 4294901760, %v10872_v14 }
 0x57f   :  { %v7493_v48 = vpop.eup %7492  ;;  %4922 = vrot.lane.b32.xlu1 %v7491_v34, %s7662_s3  ;;  %v10815_v15 = vadd.f32 %v10705_v56, %v4526_v10  ;;  %7502 = vtanh.f32 %v10810_v42 }
 0x580   :  { %4916 = vrot.lane.b32.xlu0 %v7493_v48, %s7662_s3  ;;  %v7495_v30 = vpop.eup %7494 }
 0x581   :  { %v6491_v6 = vpop.f32.mrb[84].mxu1  ;;  %7504 = vtanh.f32 %v10815_v15 }
 0x582   :  { %v4538_v29 = vpop.f32.mrb[85].mxu1  ;;  %v10827_v11 = vadd.f32 %v6491_v6, %v10705_v56  ;;  %7506 = vtanh.f32 %v10822_v51  ;;  %v5314_v6 = vand.u32 4294901760, %v10877_v61 }
 0x583   :  { %v10842_v4 = vadd.f32 %v10705_v56, %v4538_v29  ;;  %v10885_v29 = vpop.permute.xlu0 %5118 }
 0x584   :  { %4920 = vrot.lane.b32.xlu0 %v7495_v30, %s7662_s3  ;;  %7508 = vtanh.f32 %v10827_v11  ;;  %12167 = vst [vmem:[#allocation47_spill] sm:$0xff] %v10885_v29 }
 0x585   :  { %v6494_v44 = vpop.f32.mrb[86].mxu1 }
 0x586   :  { %v7497_v27 = vpop.eup %7496  ;;  %v10833_v5 = vadd.f32 %v6494_v44, %v10705_v56  ;;  %v4550_v40 = vpop.f32.mrb[87].mxu1 }
 0x587   :  { %v7499_v46 = vpop.eup %7498  ;;  %4930 = vrot.lane.b32.xlu1 %v7497_v27, %s7662_s3  ;;  %v10852_v60 = vadd.f32 %v10705_v56, %v4550_v40  ;;  %v10891_v44 = vpop.permute.xlu1 %5073  ;;  %v10898_v40 = vpack.c.bf16 %v5314_v6, %v5311_v17 }
 0x588   :  { %7510 = vtanh.f32 %v10833_v5  ;;  %4926 = vrot.lane.b32.xlu0 %v7499_v46, %s7662_s3  ;;  %v7501_v3 = vpop.eup %7500 }
 0x589   :  { %v6497_v9 = vpop.f32.mrb[88].mxu1  ;;  %v7503_v18 = vpop.eup %7502  ;;  %7512 = vtanh.f32 %v10842_v4  ;;  %12168 = vst [vmem:[#allocation50_spill] sm:$0xff] %v10898_v40  ;;  %6884 = vmatprep.subr.bf16.mxu1 %v10898_v40 }
 0x58a   :  { %v4562_v59 = vpop.f32.mrb[89].mxu1  ;;  %v10866_v62 = vadd.f32 %v6497_v9, %v10705_v56  ;;  %6886 = vmatpush3.bf16.msra.mxu1 %v10898_v40 }
 0x58b   :  { %v10847_v49 = vadd.f32 %v10705_v56, %v4562_v59  ;;  %4928 = vrot.lane.b32.xlu1 %v7501_v3, %s7662_s3  ;;  %v7505_v19 = vpop.eup %7504 }
 0x58c   :  { %4924 = vrot.lane.b32.xlu0 %v7503_v18, %s7662_s3  ;;  %v7507_v31 = vpop.eup %7506 }
 0x58d   :  { %7514 = vtanh.f32 %v10847_v49  ;;  %v6500_v55 = vpop.f32.mrb[90].mxu1 }
 0x58e   :  { %v4574_v33 = vpop.f32.mrb[91].mxu1  ;;  %7516 = vtanh.f32 %v10852_v60  ;;  %v7509_v58 = vpop.eup %7508  ;;  %v10895_v27 = vadd.f32 %v6500_v55, %v10705_v56 }
 0x58f   :  { %v10861_v21 = vadd.f32 %v10705_v56, %v4574_v33  ;;  %4932 = vrot.lane.b32.xlu1 %v7505_v19, %s7662_s3  ;;  %v10912_v55 = vpop.permute.xlu0 %5093 }
 0x590   :  { %4934 = vrot.lane.b32.xlu0 %v7507_v31, %s7662_s3  ;;  %v10915_v31 = vpop.permute.xlu1 %5123 }
 0x591   :  { %7518 = vtanh.f32 %v10861_v21  ;;  %v6503_v2 = vpop.f32.mrb[92].mxu1  ;;  %12170 = vst [vmem:[#allocation53_spill] sm:$0xff] %v10915_v31 }
 0x592   :  { %v7511_v34 = vpop.eup %7510  ;;  %v10882_v10 = vadd.f32 %v6503_v2, %v10705_v56  ;;  %v4586_v48 = vpop.f32.mrb[93].mxu1  ;;  %7520 = vtanh.f32 %v10866_v62 }
 0x593   :  { %v10888_v30 = vadd.f32 %v10705_v56, %v4586_v48  ;;  %4938 = vrot.lane.b32.xlu1 %v7509_v58, %s7662_s3  ;;  %v7513_v9 = vpop.eup %7512 }
 0x594   :  { %12166 = vst [vmem:[#allocation41_spill] sm:$0xff] %v10882_v10  ;;  %4942 = vrot.lane.b32.xlu0 %v7511_v34, %s7662_s3  ;;  %v10920_v34 = vpop.permute.xlu0 %5108  ;;  %v10923_v48 = vpop.permute.xlu1 %5138 }
 0x595   :  { %7522 = vtanh.f32 %v10888_v30  ;;  %v6506_v46 = vpop.f32.mrb[94].mxu1  ;;  %12171 = vst [vmem:[#allocation54_spill] sm:$0xff] %v10920_v34  ;;  %12172 = vst [vmem:[#allocation11_spill] sm:$0xff] %v10923_v48 }
 0x596   :  { %v10902_v3 = vadd.f32 %v6506_v46, %v10705_v56  ;;  %v4598_v59 = vpop.f32.mrb[95].mxu1  ;;  %7524 = vtanh.f32 %v10895_v27 }
 0x597   :  { %v7515_v18 = vpop.eup %7514  ;;  %v10906_v19 = vadd.f32 %v10705_v56, %v4598_v59  ;;  %4936 = vrot.lane.b32.xlu1 %v7513_v9, %s7662_s3 }
 0x598   :  { %12169 = vst [vmem:[#allocation10_spill] sm:$0xff] %v10902_v3  ;;  %4944 = vrot.lane.b32.xlu0 %v7515_v18, %s7662_s3  ;;  %v7517_v33 = vpop.eup %7516  ;;  %v10929_v59 = vpop.permute.xlu0 %5143 }
 0x599   :  { %7526 = vtanh.f32 %v10906_v19  ;;  %12173 = vst [vmem:[#allocation58_spill] sm:$0xff] %v10929_v59 }
 0x59a   :  { %7528 = vtanh.f32 %v10882_v10 }
 0x59b   :  { %v7519_v58 = vpop.eup %7518  ;;  %4940 = vrot.lane.b32.xlu1 %v7517_v33, %s7662_s3  ;;  %7530 = vtanh.f32 %v10902_v3  ;;  %v10931_v33 = vpop.permute.xlu1 %5113 }
 0x59c   :  { %4948 = vrot.lane.b32.xlu0 %v7519_v58, %s7662_s3  ;;  %v7521_v56 = vpop.eup %7520 }
 0x59f   :  { %v7523_v2 = vpop.eup %7522  ;;  %4946 = vrot.lane.b32.xlu1 %v7521_v56, %s7662_s3  ;;  %v10934_v56 = vpop.permute.xlu0 %5128 }
 0x5a0   :  { %4952 = vrot.lane.b32.xlu0 %v7523_v2, %s7662_s3  ;;  %v7525_v46 = vpop.eup %7524  ;;  %12174 = vst [vmem:[#allocation59_spill] sm:$0xff] %v10934_v56  ;;  %v10937_v45 = vpop.permute.xlu1 %5158  ;;  %v5415_v2 = vsub.f32 %v10760_v63, %v5305_v43 }
 0x5a1   :  { %12175 = vst [vmem:[#allocation18_spill] sm:$0xff] %v10937_v45  ;;  %v5436_v45 = vsub.f32 %v10877_v61, %v5314_v6  ;;  %v5929_v61 = vmul.f32 -1.442695, %v10708_v0  ;;  %v5935_v0 = vmul.f32 -1.442695, %v10732_v22 }
 0x5a2   :  { %v5416_v40 = vand.u32 4294901760, %v5415_v2 }
 0x5a3   :  { %v7527_v9 = vpop.eup %7526  ;;  %4950 = vrot.lane.b32.xlu1 %v7525_v46, %s7662_s3  ;;  %v12176_v46 = vand.u32 4294901760, %v10765_v20  ;;  %v10945_v48 = vpop.permute.xlu0 %5163  ;;  %v5437_v63 = vand.u32 4294901760, %v5436_v45  ;;  %7532 = vpow2.f32 %v5929_v61 }
 0x5a4   :  { %4956 = vrot.lane.b32.xlu0 %v7527_v9, %s7662_s3  ;;  %v7529_v18 = vpop.eup %7528  ;;  %12177 = vst [vmem:[#allocation62_spill] sm:$0xff] %v10945_v48  ;;  %v10947_v3 = vpop.permute.xlu1 %5133 }
 0x5a5   :  { %v7531_v58 = vpop.eup %7530  ;;  %v5422_v9 = vsub.f32 %v10765_v20, %v12176_v46  ;;  %12178 = vst [vmem:[#allocation63_spill] sm:$0xff] %v10947_v3  ;;  %v5438_v46 = vsub.f32 %v5436_v45, %v5437_v63 }
 0x5a7   :  { %4954 = vrot.lane.b32.xlu1 %v7529_v18, %s7662_s3  ;;  %v5423_v47 = vand.u32 4294901760, %v5422_v9  ;;  %v5417_v18 = vsub.f32 %v5415_v2, %v5416_v40  ;;  %v10953_v34 = vpack.c.bf16 %v5422_v9, %v5415_v2  ;;  %v10955_v31 = vpop.permute.xlu0 %5148 }
 0x5a8   :  { %v10958_v48 = vpop.permute.xlu1 %5178 }
 0x5a9   :  { %v5424_v59 = vsub.f32 %v5422_v9, %v5423_v47  ;;  %v5418_v56 = vand.u32 4294901760, %v5417_v18  ;;  %12179 = vst [vmem:[#allocation22_spill] sm:$0xff] %v10953_v34  ;;  %v5932_v9 = vmul.f32 -1.442695, %v10727_v24  ;;  %v5939_v24 = vmul.f32 -1.442695, %v10752_v13 }
 0x5aa   :  { %v10984_v22 = vpack.c.bf16 %v5423_v47, %v5416_v40  ;;  %v5942_v13 = vmul.f32 -1.442695, %v10810_v42  ;;  %v5945_v47 = vmul.f32 -1.442695, %v10797_v8 }
 0x5ab   :  { %4958 = vrot.lane.b32.xlu1 %v7531_v58, %s7662_s3  ;;  %v5429_v58 = vsub.f32 %v10872_v14, %v5311_v17  ;;  %v5425_v29 = vand.u32 4294901760, %v5424_v59  ;;  %v5439_v14 = vand.u32 4294901760, %v5438_v46  ;;  %v5931_v59 = vmul.f32 -1.442695, %v10716_v50  ;;  %v10968_v2 = vpop.permute.xlu0 %5153 }
 0x5ac   :  { %v10971_v18 = vpop.permute.xlu1 %5183  ;;  %v5937_v50 = vmul.f32 -1.442695, %v10742_v1  ;;  %12182 = vst [vmem:[#allocation38_spill] sm:$0xff] %v10984_v22  ;;  %v5940_v1 = vmul.f32 -1.442695, %v10786_v57 }
 0x5ad   :  { %v5430_v10 = vand.u32 4294901760, %v5429_v58  ;;  %v10951_v43 = vpack.c.bf16 %v5425_v29, %v5418_v56  ;;  %v10960_v17 = vpack.c.bf16 %v5436_v45, %v5429_v58  ;;  %v5928_v29 = vmul.f32 -1.442695, %v10711_v52 }
 0x5ae   :  { %v5930_v56 = vmul.f32 -1.442695, %v10719_v54  ;;  %v5933_v45 = vmul.f32 -1.442695, %v10724_v12  ;;  %v5934_v52 = vmul.f32 -1.442695, %v10735_v32 }
 0x5af   :  { %v5431_v20 = vsub.f32 %v5429_v58, %v5430_v10  ;;  %6888 = vmatprep.subr.bf16.mxu1 %v10951_v43  ;;  %12180 = vst [vmem:[#allocation26_spill] sm:$0xff] %v10960_v17  ;;  %7534 = vpow2.f32 %v5928_v29  ;;  %v5936_v54 = vmul.f32 -1.442695, %v10745_v38  ;;  %v5938_v12 = vmul.f32 -1.442695, %v10768_v41 }
 0x5b0   :  { %7536 = vpow2.f32 %v5931_v59  ;;  %v10981_v58 = vpop.permute.xlu1 %5198  ;;  %v5941_v32 = vmul.f32 -1.442695, %v10772_v37  ;;  %v5943_v38 = vmul.f32 -1.442695, %v10794_v26  ;;  %v10992_v61 = vpack.c.bf16 %v5437_v63, %v5430_v10 }
 0x5b1   :  { %v5432_v3 = vand.u32 4294901760, %v5431_v20  ;;  %7538 = vpow2.f32 %v5930_v56  ;;  %v7533_v20 = vpop.eup %7532  ;;  %v5944_v57 = vmul.f32 -1.442695, %v10805_v23 }
 0x5b2   :  { %7540 = vpow2.f32 %v5932_v9  ;;  %12183 = vst [vmem:[#allocation43_spill] sm:$0xff] %v10992_v61  ;;  %v4705_v26 = vadd.f32 1.0, %v7533_v20  ;;  %v5947_v20 = vmul.f32 -1.442695, %v10822_v51  ;;  %v5949_v51 = vmul.f32 -1.442695, %v10827_v11 }
 0x5b3   :  { %v10963_v6 = vpack.c.bf16 %v5439_v14, %v5432_v3  ;;  %7542 = vpow2.f32 %v5933_v45  ;;  %v10978_v3 = vpop.permute.xlu0 %5168 }
 0x5b4   :  { %7544 = vpow2.f32 %v5935_v0  ;;  %v10995_v37 = vpop.permute.xlu1 %5203 }
 0x5b5   :  { %12181 = vst [vmem:[#allocation35_spill] sm:$0xff] %v10963_v6  ;;  %7546 = vpow2.f32 %v5934_v52 }
 0x5b6   :  { %7548 = vpow2.f32 %v5937_v50 }
 0x5b7   :  { %7550 = vpow2.f32 %v5936_v54  ;;  %v10990_v14 = vpop.permute.xlu0 %5173 }
 0x5b8   :  { %7552 = vpow2.f32 %v5939_v24  ;;  %v11000_v0 = vpop.permute.xlu1 %5193 }
 0x5b9   :  { %v7535_v46 = vpop.eup %7534  ;;  %7554 = vpow2.f32 %v5938_v12 }
 0x5ba   :  { %v7537_v41 = vpop.eup %7536  ;;  %7556 = vpow2.f32 %v5941_v32  ;;  %v4704_v42 = vadd.f32 1.0, %v7535_v46  ;;  %v5946_v46 = vmul.f32 -1.442695, %v10815_v15  ;;  %v5948_v15 = vmul.f32 -1.442695, %v10842_v4 }
 0x5bb   :  { %v7539_v40 = vpop.eup %7538  ;;  %7558 = vpow2.f32 %v5940_v1  ;;  %v10998_v9 = vpop.permute.xlu0 %5188  ;;  %v4707_v50 = vadd.f32 1.0, %v7537_v41 }
 0x5bc   :  { %v7541_v29 = vpop.eup %7540  ;;  %7560 = vpow2.f32 %v5943_v38  ;;  %v4706_v10 = vadd.f32 1.0, %v7539_v40  ;;  %v11008_v40 = vpop.permute.xlu1 %5213 }
 0x5bd   :  { %v7543_v59 = vpop.eup %7542  ;;  %7562 = vpow2.f32 %v5942_v13  ;;  %v4708_v8 = vadd.f32 1.0, %v7541_v29 }
 0x5be   :  { %v7545_v56 = vpop.eup %7544  ;;  %7564 = vpow2.f32 %v5945_v47  ;;  %v4709_v52 = vadd.f32 1.0, %v7543_v59 }
 0x5bf   :  { %v7547_v63 = vpop.eup %7546  ;;  %7566 = vpow2.f32 %v5944_v57  ;;  %v4711_v24 = vadd.f32 1.0, %v7545_v56  ;;  %v11004_v13 = vpop.permute.xlu0 %5208 }
 0x5c0   :  { %v7549_v45 = vpop.eup %7548  ;;  %7568 = vrcp.f32 %v4705_v26  ;;  %v4710_v32 = vadd.f32 1.0, %v7547_v63 }
 0x5c1   :  { %v7551_v23 = vpop.eup %7550  ;;  %7570 = vrcp.f32 %v4704_v42  ;;  %v4713_v29 = vadd.f32 1.0, %v7549_v45 }
 0x5c2   :  { %v7553_v54 = vpop.eup %7552  ;;  %7572 = vrcp.f32 %v4706_v10  ;;  %v4712_v41 = vadd.f32 1.0, %v7551_v23  ;;  %v5951_v10 = vmul.f32 -1.442695, %v10833_v5 }
 0x5c3   :  { %v7555_v12 = vpop.eup %7554  ;;  %7574 = vrcp.f32 %v4708_v8  ;;  %v4715_v23 = vadd.f32 1.0, %v7553_v54 }
 0x5c4   :  { %v7557_v1 = vpop.eup %7556  ;;  %7576 = vrcp.f32 %v4709_v52  ;;  %v5950_v52 = vmul.f32 -1.442695, %v10852_v60  ;;  %v4714_v61 = vadd.f32 1.0, %v7555_v12 }
 0x5c5   :  { %v7559_v38 = vpop.eup %7558  ;;  %7578 = vrcp.f32 %v4707_v50  ;;  %v4717_v11 = vadd.f32 1.0, %v7557_v1  ;;  %v5952_v1 = vmul.f32 -1.442695, %v10847_v49 }
 0x5c6   :  { %v11006_v47 = vpop.eup %7560  ;;  %7580 = vrcp.f32 %v4711_v24 }
 0x5c7   :  { %v11010_v57 = vpop.eup %7562  ;;  %7582 = vrcp.f32 %v4710_v32 }
 0x5c8   :  { %v7565_v26 = vpop.eup %7564  ;;  %7584 = vpow2.f32 %v5947_v20 }
 0x5c9   :  { %v11013_v59 = vpop.eup %7566  ;;  %7586 = vpow2.f32 %v5946_v46 }
 0x5ca   :  { %v7569_v56 = vpop.eup %7568  ;;  %7588 = vrcp.f32 %v4712_v41 }
 0x5cb   :  { %v7571_v8 = vpop.eup %7570  ;;  %7590 = vrcp.f32 %v4713_v29  ;;  %v4833_v32 = vsub.f32 1.0, %v7569_v56 }
 0x5cc   :  { %v7573_v45 = vpop.eup %7572  ;;  %7592 = vpow2.f32 %v5949_v51  ;;  %v4832_v4 = vsub.f32 1.0, %v7571_v8 }
 0x5cd   :  { %v7575_v50 = vpop.eup %7574  ;;  %7594 = vpow2.f32 %v5948_v15  ;;  %v4834_v12 = vsub.f32 1.0, %v7573_v45 }
 0x5ce   :  { %v7577_v24 = vpop.eup %7576  ;;  %7596 = vpow2.f32 %v5951_v10  ;;  %v4836_v29 = vsub.f32 1.0, %v7575_v50  ;;  %v4716_v10 = vadd.f32 1.0, %v7559_v38 }
 0x5cf   :  { %v7579_v5 = vpop.eup %7578  ;;  %7598 = vpow2.f32 %v5950_v52  ;;  %v4837_v51 = vsub.f32 1.0, %v7577_v24 }
 0x5d0   :  { %v7581_v41 = vpop.eup %7580  ;;  %7600 = vrcp.f32 %v4715_v23  ;;  %v4835_v34 = vsub.f32 1.0, %v7579_v5 }
 0x5d1   :  { %v7583_v60 = vpop.eup %7582  ;;  %7602 = vrcp.f32 %v4717_v11  ;;  %v4839_v50 = vsub.f32 1.0, %v7581_v41 }
 0x5d2   :  { %v11018_v54 = vpop.eup %7584  ;;  %7604 = vrcp.f32 %v4714_v61  ;;  %v4838_v11 = vsub.f32 1.0, %v7583_v60 }
 0x5d3   :  { %v7587_v8 = vpop.eup %7586  ;;  %7606 = vpow2.f32 %v5952_v1  ;;  %v5954_v1 = vmul.f32 -1.442695, %v10861_v21 }
 0x5d4   :  { %7608 = vrcp.f32 %v4716_v10  ;;  %v4720_v10 = vadd.f32 1.0, %v11013_v59 }
 0x5d9   :  { %v4899_v42 = vpop.permute.xlu0 %4898 }
 0x5da   :  { %v4897_v63 = vpop.permute.xlu1 %4896  ;;  %v4993_v22 = vmul.f32 %v4899_v42, %v4833_v32  ;;  %v7589_v42 = vpop.eup %7588 }
 0x5db   :  { %v4992_v17 = vmul.f32 %v4897_v63, %v4832_v4  ;;  %v7591_v24 = vpop.eup %7590  ;;  %v4840_v41 = vsub.f32 1.0, %v7589_v42 }
 0x5dc   :  { %v5217_v63 = vmul.f32 %v10801_v28, %v4993_v22  ;;  %v7593_v38 = vpop.eup %7592  ;;  %v4841_v60 = vsub.f32 1.0, %v7591_v24  ;;  %v4722_v24 = vadd.f32 1.0, %v7587_v8 }
 0x5dd   :  { %v5216_v23 = vmul.f32 %v10799_v7, %v4992_v17 }
 0x5de   :  { %v4901_v20 = vpop.permute.xlu0 %4900  ;;  %v4903_v46 = vpop.permute.xlu1 %4902 }
 0x5df   :  { %v4994_v32 = vmul.f32 %v4901_v20, %v4834_v12  ;;  %v4995_v4 = vmul.f32 %v4903_v46, %v4835_v34  ;;  %v4719_v34 = vadd.f32 1.0, %v11006_v47 }
 0x5e2   :  { %v4905_v15 = vpop.permute.xlu0 %4904  ;;  %v4907_v56 = vpop.permute.xlu1 %4906 }
 0x5e3   :  { %v4996_v52 = vmul.f32 %v4905_v15, %v4836_v29  ;;  %v4997_v6 = vmul.f32 %v4907_v56, %v4837_v51  ;;  %v4721_v29 = vadd.f32 1.0, %v7565_v26  ;;  %v11025_v51 = vpop.eup %7594 }
 0x5e4   :  { %v7597_v17 = vpop.eup %7596 }
 0x5e5   :  { %v5220_v49 = vmul.f32 %v10818_v16, %v4996_v52  ;;  %v5221_v61 = vmul.f32 %v10824_v35, %v4997_v6  ;;  %v11028_v16 = vpop.eup %7598  ;;  %v5218_v35 = vmul.f32 %v10855_v36, %v4994_v32  ;;  %v5219_v6 = vmul.f32 %v10891_v44, %v4995_v4 }
 0x5e6   :  { %v4911_v45 = vpop.permute.xlu0 %4910  ;;  %v4909_v5 = vpop.permute.xlu1 %4908  ;;  %7610 = vrcp.f32 %v4721_v29  ;;  %v4718_v44 = vadd.f32 1.0, %v11010_v57  ;;  %v4723_v57 = vadd.f32 1.0, %v11018_v54 }
 0x5e7   :  { %v5248_v15 = vadd.f32 %v5220_v49, %v5216_v23  ;;  %v5249_v28 = vadd.f32 %v5221_v61, %v5217_v63  ;;  %v4999_v22 = vmul.f32 %v4911_v45, %v4839_v50  ;;  %v4998_v7 = vmul.f32 %v4909_v5, %v4838_v11  ;;  %v7601_v46 = vpop.eup %7600 }
 0x5e8   :  { %v7603_v52 = vpop.eup %7602  ;;  %7612 = vrcp.f32 %v4719_v34  ;;  %v4843_v50 = vsub.f32 1.0, %v7601_v46  ;;  %v5956_v11 = vmul.f32 -1.442695, %v10888_v30  ;;  %v5958_v30 = vmul.f32 -1.442695, %v10906_v19 }
 0x5e9   :  { %v5223_v26 = vmul.f32 %v10912_v55, %v4999_v22  ;;  %v5222_v20 = vmul.f32 %v10858_v25, %v4998_v7  ;;  %v7605_v36 = vpop.eup %7604  ;;  %v5953_v55 = vmul.f32 -1.442695, %v10866_v62  ;;  %7614 = vpow2.f32 %v5954_v1 }
 0x5ea   :  { %v4913_v56 = vpop.permute.xlu0 %4912  ;;  %v4915_v12 = vpop.permute.xlu1 %4914  ;;  %7616 = vrcp.f32 %v4720_v10  ;;  %v4845_v45 = vsub.f32 1.0, %v7603_v52  ;;  %v4842_v5 = vsub.f32 1.0, %v7605_v36  ;;  %v4725_v7 = vadd.f32 1.0, %v7593_v38 }
 0x5eb   :  { %v5251_v47 = vadd.f32 %v5223_v26, %v5219_v6  ;;  %v5250_v42 = vadd.f32 %v5222_v20, %v5218_v35  ;;  %v5000_v63 = vmul.f32 %v4913_v56, %v4840_v41  ;;  %v5001_v23 = vmul.f32 %v4915_v12, %v4841_v60  ;;  %v7607_v61 = vpop.eup %7606  ;;  %v12184_v60 = vld [vmem:[#allocation53_spill] sm:$0xff] }
 0x5ec   :  { %7618 = vrcp.f32 %v4718_v44  ;;  %v7609_v29 = vpop.eup %7608  ;;  %v4727_v34 = vadd.f32 1.0, %v7597_v17  ;;  %v12186_v26 = vld [vmem:[#allocation41_spill] sm:$0xff]  ;;  %v4724_v38 = vadd.f32 1.0, %v11025_v51  ;;  %v4728_v52 = vadd.f32 1.0, %v7607_v61 }
 0x5ed   :  { %v5224_v25 = vmul.f32 %v10835_v39, %v5000_v63  ;;  %v5225_v21 = vmul.f32 %v10839_v53, %v5001_v23  ;;  %7620 = vpow2.f32 %v5953_v55  ;;  %v5955_v39 = vmul.f32 -1.442695, %v10895_v27  ;;  %v12185_v27 = vld [vmem:[#allocation54_spill] sm:$0xff] }
 0x5ee   :  { %v4919_v59 = vpop.permute.xlu0 %4918  ;;  %7622 = vpow2.f32 %v5956_v11  ;;  %v4844_v35 = vsub.f32 1.0, %v7609_v29  ;;  %v5957_v20 = vmul.f32 -1.442695, %v12186_v26  ;;  %v12188_v55 = vld [vmem:[#allocation10_spill] sm:$0xff]  ;;  %v4726_v51 = vadd.f32 1.0, %v11028_v16 }
 0x5ef   :  { %v5252_v32 = vadd.f32 %v5248_v15, %v5224_v25  ;;  %v5253_v4 = vadd.f32 %v5249_v28, %v5225_v21  ;;  %v5003_v49 = vmul.f32 %v4919_v59, %v4843_v50  ;;  %7624 = vrcp.f32 %v4722_v24 }
 0x5f0   :  { %v7611_v41 = vpop.eup %7610  ;;  %7626 = vrcp.f32 %v4723_v57  ;;  %v5959_v25 = vmul.f32 -1.442695, %v12188_v55 }
 0x5f1   :  { %v5227_v53 = vmul.f32 %v10931_v33, %v5003_v49  ;;  %v4923_v62 = vpop.permute.xlu1 %4922  ;;  %7628 = vpow2.f32 %v5955_v39  ;;  %v4849_v10 = vsub.f32 1.0, %v7611_v41  ;;  %v12190_v39 = vld [vmem:[#allocation63_spill] sm:$0xff] }
 0x5f2   :  { %v5005_v8 = vmul.f32 %v4923_v62, %v4845_v45  ;;  %v4917_v15 = vpop.permute.xlu0 %4916  ;;  %v7613_v6 = vpop.eup %7612  ;;  %7630 = vpow2.f32 %v5958_v30 }
 0x5f3   :  { %v5255_v28 = vadd.f32 %v5251_v47, %v5227_v53  ;;  %v5002_v22 = vmul.f32 %v4917_v15, %v4842_v5  ;;  %7632 = vrcp.f32 %v4725_v7  ;;  %v7615_v12 = vpop.eup %7614  ;;  %v12187_v47 = vld [vmem:[#allocation47_spill] sm:$0xff]  ;;  %v4847_v36 = vsub.f32 1.0, %v7613_v6 }
 0x5f4   :  { %v5229_v54 = vmul.f32 %v12184_v60, %v5005_v8  ;;  %7634 = vrcp.f32 %v4727_v34  ;;  %v7617_v17 = vpop.eup %7616  ;;  %v4730_v45 = vadd.f32 1.0, %v7615_v12  ;;  %v12191_v60 = vld [vmem:[#allocation11_spill] sm:$0xff] }
 0x5f5   :  { %v5226_v33 = vmul.f32 %v12185_v27, %v5002_v22  ;;  %7636 = vpow2.f32 %v5957_v20  ;;  %v4848_v61 = vsub.f32 1.0, %v7617_v17 }
 0x5f6   :  { %v5257_v19 = vadd.f32 %v5253_v4, %v5229_v54  ;;  %v4921_v46 = vpop.permute.xlu0 %4920  ;;  %v7619_v44 = vpop.eup %7618  ;;  %7638 = vrcp.f32 %v4724_v38  ;;  %v12189_v4 = vld [vmem:[#allocation58_spill] sm:$0xff] }
 0x5f7   :  { %v5254_v1 = vadd.f32 %v5250_v42, %v5226_v33  ;;  %v5004_v56 = vmul.f32 %v4921_v46, %v4844_v35  ;;  %v7621_v42 = vpop.eup %7620  ;;  %7640 = vrcp.f32 %v4728_v52  ;;  %v4846_v5 = vsub.f32 1.0, %v7619_v44  ;;  %v12192_v35 = vld [vmem:[#allocation59_spill] sm:$0xff] }
 0x5f8   :  { %v7623_v24 = vpop.eup %7622  ;;  %7642 = vpow2.f32 %v5959_v25  ;;  %v4729_v16 = vadd.f32 1.0, %v7621_v42 }
 0x5f9   :  { %v5228_v63 = vmul.f32 %v12187_v47, %v5004_v56  ;;  %v4931_v23 = vpop.permute.xlu1 %4930  ;;  %v7625_v57 = vpop.eup %7624  ;;  %7644 = vrcp.f32 %v4726_v51  ;;  %v4732_v27 = vadd.f32 1.0, %v7623_v24  ;;  %v12193_v24 = vld [vmem:[#allocation62_spill] sm:$0xff] }
 0x5fa   :  { %v5009_v21 = vmul.f32 %v4931_v23, %v4849_v10  ;;  %v4927_v50 = vpop.permute.xlu0 %4926  ;;  %v7627_v29 = vpop.eup %7626  ;;  %v4850_v34 = vsub.f32 1.0, %v7625_v57  ;;  %7646 = vrcp.f32 %v4730_v45 }
 0x5fb   :  { %v5256_v11 = vadd.f32 %v5252_v32, %v5228_v63  ;;  %v5007_v59 = vmul.f32 %v4927_v50, %v4847_v36  ;;  %v7629_v15 = vpop.eup %7628  ;;  %v4851_v20 = vsub.f32 1.0, %v7627_v29  ;;  %7648 = vrcp.f32 %v4729_v16 }
 0x5fc   :  { %v5233_v49 = vmul.f32 %v12189_v4, %v5009_v21  ;;  %v7631_v41 = vpop.eup %7630  ;;  %v4731_v10 = vadd.f32 1.0, %v7629_v15  ;;  %7650 = vrcp.f32 %v4732_v27 }
 0x5fd   :  { %v5231_v53 = vmul.f32 %v12190_v39, %v5007_v59  ;;  %v4929_v62 = vpop.permute.xlu1 %4928  ;;  %v7633_v33 = vpop.eup %7632  ;;  %v4734_v63 = vadd.f32 1.0, %v7631_v41 }
 0x5fe   :  { %v5261_v30 = vadd.f32 %v5257_v19, %v5233_v49  ;;  %v5008_v8 = vmul.f32 %v4929_v62, %v4848_v61  ;;  %v4925_v32 = vpop.permute.xlu0 %4924  ;;  %v7635_v46 = vpop.eup %7634  ;;  %v4853_v47 = vsub.f32 1.0, %v7633_v33  ;;  %7652 = vrcp.f32 %v4731_v10 }
 0x5ff   :  { %v5259_v22 = vadd.f32 %v5255_v28, %v5231_v53  ;;  %v5006_v7 = vmul.f32 %v4925_v32, %v4846_v5  ;;  %v7637_v52 = vpop.eup %7636  ;;  %v4855_v55 = vsub.f32 1.0, %v7635_v46  ;;  %7654 = vrcp.f32 %v4734_v63  ;;  %v12194_v32 = vld [vmem:[#allocation18_spill] sm:$0xff] }
 0x600   :  { %v5232_v54 = vmul.f32 %v12191_v60, %v5008_v8  ;;  %v7639_v23 = vpop.eup %7638  ;;  %v4733_v59 = vadd.f32 1.0, %v7637_v52 }
 0x601   :  { %v5230_v6 = vmul.f32 %v12192_v35, %v5006_v7  ;;  %v4933_v26 = vpop.permute.xlu1 %4932  ;;  %v7641_v25 = vpop.eup %7640 }
 0x602   :  { %v5260_v19 = vadd.f32 %v5256_v11, %v5232_v54  ;;  %v5010_v56 = vmul.f32 %v4933_v26, %v4850_v34  ;;  %v4935_v38 = vpop.permute.xlu0 %4934  ;;  %v7643_v51 = vpop.eup %7642  ;;  %7656 = vrcp.f32 %v4733_v59 }
 0x603   :  { %v5258_v12 = vadd.f32 %v5254_v1, %v5230_v6  ;;  %v5011_v28 = vmul.f32 %v4935_v38, %v4851_v20  ;;  %v7645_v49 = vpop.eup %7644  ;;  %v4735_v8 = vadd.f32 1.0, %v7643_v51 }
 0x604   :  { %v5234_v17 = vmul.f32 %v10955_v31, %v5010_v56  ;;  %v4852_v31 = vsub.f32 1.0, %v7639_v23  ;;  %v7647_v57 = vpop.eup %7646 }
 0x605   :  { %v5235_v36 = vmul.f32 %v10968_v2, %v5011_v28  ;;  %v4939_v44 = vpop.permute.xlu1 %4938  ;;  %v4856_v2 = vsub.f32 1.0, %v7641_v25  ;;  %v7649_v7 = vpop.eup %7648  ;;  %v4858_v60 = vsub.f32 1.0, %v7647_v57  ;;  %7658 = vrcp.f32 %v4735_v8 }
 0x606   :  { %v5262_v21 = vadd.f32 %v5258_v12, %v5234_v17  ;;  %v5013_v50 = vmul.f32 %v4939_v44, %v4853_v47  ;;  %v4943_v42 = vpop.permute.xlu0 %4942  ;;  %v7651_v54 = vpop.eup %7650  ;;  %v4857_v6 = vsub.f32 1.0, %v7649_v7 }
 0x607   :  { %v5263_v11 = vadd.f32 %v5259_v22, %v5235_v36  ;;  %v5015_v1 = vmul.f32 %v4943_v42, %v4855_v55  ;;  %v4854_v22 = vsub.f32 1.0, %v7645_v49  ;;  %v4860_v56 = vsub.f32 1.0, %v7651_v54 }
 0x608   :  { %v5237_v4 = vmul.f32 %v12193_v24, %v5013_v50  ;;  %v7653_v26 = vpop.eup %7652 }
 0x609   :  { %v5239_v61 = vmul.f32 %v10990_v14, %v5015_v1  ;;  %v4937_v45 = vpop.permute.xlu1 %4936  ;;  %v7655_v38 = vpop.eup %7654  ;;  %v4859_v17 = vsub.f32 1.0, %v7653_v26 }
 0x60a   :  { %v5265_v39 = vadd.f32 %v5261_v30, %v5237_v4  ;;  %v5012_v53 = vmul.f32 %v4937_v45, %v4852_v31  ;;  %v4945_v62 = vpop.permute.xlu0 %4944 }
 0x60b   :  { %v5267_v5 = vadd.f32 %v5263_v11, %v5239_v61  ;;  %v5016_v29 = vmul.f32 %v4945_v62, %v4856_v2 }
 0x60c   :  { %v5236_v15 = vmul.f32 %v12194_v32, %v5012_v53  ;;  %v7657_v47 = vpop.eup %7656 }
 0x60d   :  { %v5240_v16 = vmul.f32 %v10958_v48, %v5016_v29  ;;  %v4941_v41 = vpop.permute.xlu1 %4940  ;;  %v4861_v50 = vsub.f32 1.0, %v7657_v47 }
 0x60e   :  { %v5264_v14 = vadd.f32 %v5260_v19, %v5236_v15  ;;  %v5014_v34 = vmul.f32 %v4941_v41, %v4854_v22  ;;  %v4949_v27 = vpop.permute.xlu0 %4948 }
 0x60f   :  { %v5018_v33 = vmul.f32 %v4949_v27, %v4858_v60  ;;  %v7659_v42 = vpop.eup %7658 }
 0x610   :  { %v5268_v30 = vadd.f32 %v5264_v14, %v5240_v16  ;;  %v5238_v35 = vmul.f32 %v10978_v3, %v5014_v34  ;;  %v4862_v3 = vsub.f32 1.0, %v7655_v38  ;;  %v4863_v49 = vsub.f32 1.0, %v7659_v42  ;;  %v12199_v38 = vld [vmem:[#allocation50_spill] sm:$0xff] }
 0x611   :  { %v5242_v20 = vmul.f32 %v10998_v9, %v5018_v33  ;;  %v4947_v46 = vpop.permute.xlu1 %4946 }
 0x612   :  { %v5266_v12 = vadd.f32 %v5262_v21, %v5238_v35  ;;  %v5017_v48 = vmul.f32 %v4947_v46, %v4857_v6  ;;  %v4953_v28 = vpop.permute.xlu0 %4952  ;;  %v12196_v46 = vld [vmem:[#allocation22_spill] sm:$0xff] }
 0x613   :  { %v5020_v10 = vmul.f32 %v4953_v28, %v4860_v56  ;;  %v12197_v56 = vld [vmem:[#allocation26_spill] sm:$0xff] }
 0x614   :  { %v5270_v52 = vadd.f32 %v5266_v12, %v5242_v20  ;;  %v5241_v19 = vmul.f32 %v10971_v18, %v5017_v48  ;;  %v12195_v20 = vld [vmem:[#allocation35_spill] sm:$0xff]  ;;  %v12200_v12 = vld [vmem:[#allocation38_spill] sm:$0xff] }
 0x615   :  { %v5244_v63 = vmul.f32 %v10981_v58, %v5020_v10  ;;  %v4951_v23 = vpop.permute.xlu1 %4950  ;;  %v12201_v48 = vld [vmem:[#allocation43_spill] sm:$0xff]  ;;  %v5960_v28 = vld [vmem:[%s11126_s6] ss:$0 sm:$0xff] }
 0x616   :  { %v5269_v36 = vadd.f32 %v5265_v39, %v5241_v19  ;;  %v5019_v44 = vmul.f32 %v4951_v23, %v4859_v17  ;;  %v4957_v55 = vpop.permute.xlu0 %4956 }
 0x617   :  { %v5272_v9 = vadd.f32 %v5268_v30, %v5244_v63  ;;  %v5022_v25 = vmul.f32 %v4957_v55, %v4862_v3 }
 0x618   :  { %v5243_v21 = vmul.f32 %v11000_v0, %v5019_v44 }
 0x619   :  { %v5276_v11 = vmax.f32 %v5272_v9, 0.0  ;;  %v5246_v1 = vmul.f32 %v11004_v13, %v5022_v25  ;;  %v4955_v18 = vpop.permute.xlu1 %4954 }
 0x61a   :  { %v5271_v59 = vadd.f32 %v5267_v5, %v5243_v21  ;;  %v5021_v51 = vmul.f32 %v4955_v18, %v4861_v50 }
 0x61b   :  { %v5293_v58 = vsel %vm5291_vm2, %v5276_v11, 0  ;;  %v5274_v24 = vadd.f32 %v5270_v52, %v5246_v1 }
 0x61c   :  { %v11069_v4 = vand.u32 4294901760, %v5293_v58  ;;  %v5245_v31 = vmul.f32 %v10995_v37, %v5021_v51 }
 0x61d   :  { %v5278_v61 = vmax.f32 %v5274_v24, 0.0  ;;  %v4959_v45 = vpop.permute.xlu1 %4958 }
 0x61e   :  { %v5374_v0 = vsub.f32 %v5293_v58, %v11069_v4  ;;  %v5273_v2 = vadd.f32 %v5269_v36, %v5245_v31  ;;  %v5023_v57 = vmul.f32 %v4959_v45, %v4863_v49 }
 0x61f   :  { %v5299_v39 = vsel %vm5291_vm2, %v5278_v61, 0 }
 0x620   :  { %v11074_v13 = vand.u32 4294901760, %v5299_v39  ;;  %v5277_v53 = vmax.f32 %v5273_v2, 0.0  ;;  %v5247_v62 = vmul.f32 %v11008_v40, %v5023_v57  ;;  %v5375_v5 = vand.u32 4294901760, %v5374_v0 }
 0x622   :  { %v5394_v29 = vsub.f32 %v5299_v39, %v11074_v13  ;;  %v5296_v8 = vsel %vm5291_vm2, %v5277_v53, 0  ;;  %v5275_v37 = vadd.f32 %v5271_v59, %v5247_v62  ;;  %v5376_v32 = vsub.f32 %v5374_v0, %v5375_v5 }
 0x623   :  { %v5383_v15 = vand.u32 4294901760, %v5296_v8 }
 0x624   :  { %v5279_v22 = vmax.f32 %v5275_v37, 0.0  ;;  %v5377_v7 = vand.u32 4294901760, %v5376_v32  ;;  %v5395_v16 = vand.u32 4294901760, %v5394_v29 }
 0x625   :  { %v5384_v41 = vsub.f32 %v5296_v8, %v5383_v15 }
 0x626   :  { %v5302_v60 = vsel %vm5291_vm2, %v5279_v22, 0  ;;  %6515 = vmatprep.mubr.f32.mxu1 %v5377_v7  ;;  %v5396_v34 = vsub.f32 %v5394_v29, %v5395_v16 }
 0x627   :  { %v5385_v54 = vand.u32 4294901760, %v5384_v41  ;;  %v5403_v14 = vand.u32 4294901760, %v5302_v60 }
 0x628   :  { %v5397_v35 = vand.u32 4294901760, %v5396_v34 }
 0x629   :  { %v5404_v27 = vsub.f32 %v5302_v60, %v5403_v14  ;;  %v5386_v40 = vsub.f32 %v5384_v41, %v5385_v54 }
 0x62b   :  { %v5387_v33 = vand.u32 4294901760, %v5386_v40  ;;  %v5405_v30 = vand.u32 4294901760, %v5404_v27 }
 0x62d   :  { %6516 = vmatmul.mubr.f32.vlgmr.msra.gmra.mrb[96].mxu1 %v5387_v33  ;;  %v5406_v6 = vsub.f32 %v5404_v27, %v5405_v30 }
 0x62e   :  { %6518 = vmatprep.mubr.f32.mxu1 %v5397_v35  ;;  %6890 = vmatpush3.bf16.msra.mxu1 %v10951_v43  ;;  %v12198_v43 = vld [vmem:[#allocation40_spill] sm:$0xff] }
 0x62f   :  { %v5407_v26 = vand.u32 4294901760, %v5406_v6  ;;  %6892 = vmatprep.subr.bf16.mxu1 %v12195_v20 }
 0x631   :  { %6519 = vmatmul.mubr.f32.gmra.mrb[98].mxu1 %v5407_v26 }
 0x632   :  { %6894 = vmatpush3.bf16.msra.mxu1 %v12195_v20  ;;  %6529 = vmatprep.mubr.f32.mxu1 %v11069_v4 }
 0x633   :  { %6896 = vmatprep.subr.bf16.mxu1 %v12196_v46 }
 0x635   :  { %6530 = vmatmul.mubr.f32.vlgmr.msra.gmra.mrb[96].mxu1 %v5383_v15 }
 0x636   :  { %6532 = vmatprep.mubr.f32.mxu1 %v11074_v13  ;;  %6898 = vmatpush3.bf16.msra.mxu1 %v12196_v46 }
 0x637   :  { %6900 = vmatprep.subr.bf16.mxu1 %v12197_v56 }
 0x639   :  { %6533 = vmatmul.mubr.f32.gmra.mrb[98].mxu1 %v5403_v14 }
 0x63a   :  { %6902 = vmatpush3.bf16.msra.mxu1 %v12197_v56  ;;  %6543 = vmatprep.mubr.f32.mxu1 %v5374_v0 }
 0x63b   :  { %6904 = vmatprep.subr.bf16.mxu1 %v12198_v43 }
 0x63d   :  { %6544 = vmatmul.mubr.f32.vlgmr.msra.gmra.mrb[96].mxu1 %v5384_v41 }
 0x63e   :  { %6546 = vmatprep.mubr.f32.mxu1 %v5394_v29  ;;  %6906 = vmatpush3.bf16.msra.mxu1 %v12198_v43 }
 0x63f   :  { %6908 = vmatprep.subr.bf16.mxu1 %v12199_v38 }
 0x641   :  { %6547 = vmatmul.mubr.f32.gmra.mrb[98].mxu1 %v5404_v27 }
 0x642   :  { %6910 = vmatpush3.bf16.msra.mxu1 %v12199_v38  ;;  %6557 = vmatprep.mubr.f32.mxu1 %v5375_v5 }
 0x643   :  { %6912 = vmatprep.subr.bf16.mxu1 %v12200_v12 }
 0x645   :  { %6558 = vmatmul.mubr.f32.vlgmr.msra.gmra.mrb[96].mxu1 %v5385_v54 }
 0x646   :  { %6560 = vmatprep.mubr.f32.mxu1 %v5395_v16  ;;  %6914 = vmatpush3.bf16.msra.mxu1 %v12200_v12 }
 0x647   :  { %6916 = vmatprep.subr.bf16.mxu1 %v12201_v48 }
 0x649   :  { %6561 = vmatmul.mubr.f32.gmra.mrb[98].mxu1 %v5405_v30 }
 0x64a   :  { %6918 = vmatpush3.bf16.msra.mxu1 %v12201_v48  ;;  %6571 = vmatprep.mubr.f32.mxu1 %v11069_v4 }
 0x64b   :  { %6920 = vmatprep.subr.bf16.mxu1 %v12198_v43 }
 0x64d   :  { %6572 = vmatmul.mubr.f32.vlgmr.msra.gmra.mrb[96].mxu1 %v5383_v15 }
 0x64e   :  { %6574 = vmatprep.mubr.f32.mxu1 %v11074_v13  ;;  %6922 = vmatpush3.bf16.msra.mxu1 %v12198_v43 }
 0x64f   :  { %6924 = vmatprep.subr.bf16.mxu1 %v12199_v38 }
 0x651   :  { %6575 = vmatmul.mubr.f32.gmra.mrb[98].mxu1 %v5403_v14 }
 0x652   :  { %6926 = vmatpush3.bf16.msra.mxu1 %v12199_v38  ;;  %6585 = vmatprep.mubr.f32.mxu1 %v11069_v4 }
 0x655   :  { %6586 = vmatmul.mubr.f32.vlgmr.msra.gmra.mrb[96].mxu1 %v5383_v15 }
 0x656   :  { %6588 = vmatprep.mubr.f32.mxu1 %v11074_v13 }
 0x659   :  { %6589 = vmatmul.mubr.f32.gmra.mrb[98].mxu1 %v5403_v14 }
 0x728   :  { %v6587_v10 = vpop.f32.mrb[96].mxu1 }
 0x729   :  { %v7023_v52 = vadd.f32 %v6587_v10, %v5960_v28  ;;  %v5896_v19 = vpop.f32.mrb[97].mxu1 }
 0x72a   :  { %v7024_v17 = vadd.f32 %v5960_v28, %v5896_v19 }
 0x72b   :  { %5920 = vst.msk [vmem:[%s11127_s7 + $0x8] sm:$0xff] %vm5918_vm3, %v7023_v52 }
 0x72c   :  { %5919 = vst.msk [vmem:[%s11127_s7] sm:$0xff] %vm5918_vm3, %v7024_v17  ;;  %v6590_v47 = vpop.f32.mrb[98].mxu1 }
 0x72d   :  { %v7025_v63 = vadd.f32 %v6590_v47, %v5960_v28  ;;  %v5908_v23 = vpop.f32.mrb[99].mxu1 }
 0x72e   :  { %v7026_v3 = vadd.f32 %v5960_v28, %v5908_v23 }
 0x72f   :  { %5922 = vst.msk [vmem:[%s11127_s7 + $0x18] sm:$0xff] %vm5918_vm3, %v7025_v63 }
 0x730   :  { %5921 = vst.msk [vmem:[%s11127_s7 + $0x10] sm:$0xff] %vm5918_vm3, %v7026_v3 }

</bundles_post_ra>
